<compile_context>
chip_gen: v6e
topology: v6e:2x2x1
jax: 0.10.0
libtpu: 0.0.40
codegen_flags: <defaults>
</compile_context>

<pallas_src>
import functools

import jax
import jax.numpy as jnp
from jax import lax
from jax.experimental import pallas as pl
from jax.experimental.pallas import tpu as pltpu

LN_EPS = 1e-5  # PyTorch nn.LayerNorm default eps


# ----------------------------- fused kernel -----------------------------
def _fused_kernel(x_mid_ref, x_top_ref, x_bot_ref, g_ref, b_ref, w_ref, mask_ref,
                  o_ref, pad_ref, *, strip_h, w_out):
    """One grid step = one (batch image, output-row strip).

    x_mid_ref : (strip_h*W, C_in)        flattened pixels of this strip
    x_top_ref : (W, C_in)                input row just above the strip (clamped)
    x_bot_ref : (W, C_in)                input row just below the strip (clamped)
    g_ref/b_ref: (1, C_in)               LayerNorm affine params
    w_ref     : (9, C_in, C_out)         conv taps, t = ky*3 + kx
    mask_ref  : (strip_h*W, 2)           col 0: (j != 0), col 1: (j != W-1)
    o_ref     : (C_out, strip_h*W)       lane-dense NCHW output block
    pad_ref   : ((strip_h+2)*W + 2, C_in) f32 VMEM scratch (zero-padded strip)
    """
    s_idx = pl.program_id(1)
    n_strips = pl.num_programs(1)
    sw = strip_h * w_out
    npix = (strip_h + 2) * w_out

    # ---- fused LayerNorm (over C_in) + ReLU on strip + 1-row halo ----
    xh = jnp.concatenate([x_top_ref[...], x_mid_ref[...], x_bot_ref[...]],
                         axis=0).astype(jnp.float32)            # (npix, C_in)
    mean = jnp.mean(xh, axis=-1, keepdims=True)
    xc = xh - mean
    var = jnp.mean(xc * xc, axis=-1, keepdims=True)             # biased variance
    y = xc * lax.rsqrt(var + LN_EPS) * g_ref[...] + b_ref[...]
    y = jnp.maximum(y, 0.0)                                     # ReLU

    # ---- in-VMEM "same" padding (no jnp.pad / extra HBM round trip) ----
    # Halo rows that fall outside the image become the conv's zero padding.
    top_scale = (s_idx > 0).astype(jnp.float32)
    bot_scale = (s_idx < n_strips - 1).astype(jnp.float32)
    pad_ref[...] = jnp.zeros_like(pad_ref)
    pad_ref[1:w_out + 1, :] = y[0:w_out, :] * top_scale
    pad_ref[w_out + 1:npix - w_out + 1, :] = y[w_out:npix - w_out, :]
    pad_ref[npix - w_out + 1:npix + 1, :] = y[npix - w_out:npix, :] * bot_scale

    # ---- 3x3 conv (stride 1) as 9 shifted MXU matmuls over flattened pixels ----
    left_mask = mask_ref[:, 0:1]    # zero where output col j == 0     (kx == 0 tap)
    right_mask = mask_ref[:, 1:2]   # zero where output col j == W - 1 (kx == 2 tap)
    acc = jnp.zeros((sw, w_ref.shape[2]), jnp.float32)
    for ky in range(3):
        for kx in range(3):
            off = ky * w_out + kx                       # +1 scratch pad, +(kx-1) shift
            patch = pad_ref[off:off + sw, :]            # (strip_h*W, C_in)
            if kx == 0:
                patch = patch * left_mask
            elif kx == 2:
                patch = patch * right_mask
            acc = acc + jnp.dot(patch, w_ref[ky * 3 + kx],
                                preferred_element_type=jnp.float32)

    # Lane-dense store: last dim is strip_h*W (multiple of 128 or the full extent),
    # writing the NCHW result directly -- no JAX-side transpose afterwards.
    o_ref[...] = acc.T.astype(o_ref.dtype)


# ----------------------------- strip-size heuristic -----------------------------
def _choose_strip_h(h, w, c_in, c_out, vmem_budget_bytes=4 * 1024 * 1024):
    """Largest divisor of H whose strip fits a small VMEM budget and keeps the
    output block lane-dense ((strip_h*W) % 128 == 0).  Falls back to a single
    full-image strip (full-extent blocks are always legal)."""
    bytes_per_row = 4 * w * (3 * c_in + 3 * c_out)   # rough f32, incl. double-buffering
    cap = max(1, vmem_budget_bytes // max(bytes_per_row, 1))
    for cand in range(min(h, cap), 0, -1):
        if h % cand == 0 and (cand * w) % 128 == 0:
            return cand
    return h


# ----------------------------- wrapper -----------------------------
def basic_conv3x3_attn(x, ln_gamma, ln_beta, conv_w, *, stride=1, padding=1,
                       strip_h=None):
    """x: (B, H, W, C_in) NHWC.  Returns (B, C_out, H, W) NCHW."""
    # TODO(synk): only the module's default stride=1 / padding=1 is implemented.
    assert stride == 1 and padding == 1, "fused kernel supports stride=1, padding=1"
    b, h, w, c_in = x.shape
    c_out = conv_w.shape[0]
    assert conv_w.shape == (c_out, c_in, 3, 3)
    # TODO(synk): halo-row blocks require W % 8 == 0 (TPU sublane granularity).
    assert w % 8 == 0, "W must be a multiple of 8"

    if strip_h is None:
        strip_h = _choose_strip_h(h, w, c_in, c_out)
    if h % strip_h != 0:
        raise ValueError("strip_h must divide H")
    n_strips = h // strip_h
    sw = strip_h * w
    if n_strips > 1 and sw % 128 != 0:
        raise ValueError("strip_h * W must be a multiple of 128 when using >1 strip")

    # JAX-side prep: free reshapes + tiny constants only (no big HBM copies).
    x2 = x.reshape(b, h * w, c_in)
    g2 = ln_gamma.reshape(1, c_in).astype(jnp.float32)
    b2 = ln_beta.reshape(1, c_in).astype(jnp.float32)
    # PyTorch OIHW -> (tap, C_in, C_out), tap = ky*3 + kx
    w_taps = jnp.transpose(conv_w, (2, 3, 1, 0)).reshape(9, c_in, c_out).astype(jnp.float32)
    # Edge-column masks for the left/right conv taps (same for every strip).
    j = jnp.arange(sw, dtype=jnp.int32) % w
    edge_masks = jnp.stack([(j != 0), (j != w - 1)], axis=1).astype(jnp.float32)

    kernel = functools.partial(_fused_kernel, strip_h=strip_h, w_out=w)

    out = pl.pallas_call(
        kernel,
        out_shape=jax.ShapeDtypeStruct((b, c_out, h * w), x.dtype),
        grid_spec=pltpu.PrefetchScalarGridSpec(
            num_scalar_prefetch=0,
            grid=(b, n_strips),
            in_specs=[
                # strip pixels
                pl.BlockSpec((None, sw, c_in), lambda bi, si: (bi, si, 0)),
                # one halo row above (clamped at the top image border)
                pl.BlockSpec((None, w, c_in),
                             lambda bi, si: (bi, jnp.maximum(si * strip_h - 1, 0), 0)),
                # one halo row below (clamped at the bottom image border)
                pl.BlockSpec((None, w, c_in),
                             lambda bi, si: (bi, jnp.minimum((si + 1) * strip_h, h - 1), 0)),
                pl.BlockSpec((1, c_in), lambda bi, si: (0, 0)),           # gamma
                pl.BlockSpec((1, c_in), lambda bi, si: (0, 0)),           # beta
                pl.BlockSpec((9, c_in, c_out), lambda bi, si: (0, 0, 0)),  # conv taps
                pl.BlockSpec((sw, 2), lambda bi, si: (0, 0)),             # edge masks
            ],
            out_specs=pl.BlockSpec((None, c_out, sw), lambda bi, si: (bi, 0, si)),
            scratch_shapes=[pltpu.VMEM(((strip_h + 2) * w + 2, c_in), jnp.float32)],
        ),
        compiler_params=pltpu.CompilerParams(
            dimension_semantics=("parallel", "parallel")),
    )(x2, x2, x2, g2, b2, w_taps, edge_masks)

    return out.reshape(b, c_out, h, w)   # free reshape, already NCHW-ordered


# ----------------------------- Pure-JAX reference -----------------------------
def _reference(x, ln_gamma, ln_beta, conv_w, *, stride=1, padding=1):
    mean = jnp.mean(x, axis=-1, keepdims=True)
    var = jnp.mean((x - mean) ** 2, axis=-1, keepdims=True)
    y = (x - mean) / jnp.sqrt(var + LN_EPS) * ln_gamma + ln_beta
    y = jnp.maximum(y, 0.0)
    y_nchw = jnp.transpose(y, (0, 3, 1, 2))
    return lax.conv_general_dilated(
        y_nchw, conv_w, window_strides=(stride, stride),
        padding=((padding, padding), (padding, padding)),
        dimension_numbers=("NCHW", "OIHW", "NCHW"))


if __name__ == "__main__":
    B, H, W, C_IN, C_OUT = 2, 16, 16, 4, 8

    key = jax.random.PRNGKey(0)
    kx, kg, kb, kw = jax.random.split(key, 4)
    x = jax.random.normal(kx, (B, H, W, C_IN), dtype=jnp.float32)
    ln_gamma = 1.0 + 0.1 * jax.random.normal(kg, (C_IN,), dtype=jnp.float32)
    ln_beta = 0.1 * jax.random.normal(kb, (C_IN,), dtype=jnp.float32)
    conv_w = 0.1 * jax.random.normal(kw, (C_OUT, C_IN, 3, 3), dtype=jnp.float32)

    ref = jax.block_until_ready(
        _reference(x, ln_gamma, ln_beta, conv_w, stride=1, padding=1))

    # auto strip size (single strip at this small size)
    out_auto = jax.block_until_ready(
        basic_conv3x3_attn(x, ln_gamma, ln_beta, conv_w, stride=1, padding=1))
    # forced 2-strip run to exercise the halo / boundary-padding path
    out_strips = jax.block_until_ready(
        basic_conv3x3_attn(x, ln_gamma, ln_beta, conv_w, stride=1, padding=1, strip_h=8))

    assert out_auto.shape == (B, C_OUT, H, W), out_auto.shape
    assert jnp.allclose(out_auto, ref, atol=1e-4, rtol=1e-4), "mismatch (auto strip)"
    assert jnp.allclose(out_strips, ref, atol=1e-4, rtol=1e-4), "mismatch (multi strip)"

    print("KERNEL_OK")
</pallas_src>

<mosaic_0001>
module attributes {stable_mosaic.version = 11 : i64} {
  func.func @_fused_kernel(%arg0: i32, %arg1: i32, %arg2: memref<1x256x4xf32, #tpu.memory_space<vmem>>, %arg3: memref<1x16x4xf32, #tpu.memory_space<vmem>>, %arg4: memref<1x16x4xf32, #tpu.memory_space<vmem>>, %arg5: memref<1x4xf32, #tpu.memory_space<vmem>>, %arg6: memref<1x4xf32, #tpu.memory_space<vmem>>, %arg7: memref<9x4x8xf32, #tpu.memory_space<vmem>>, %arg8: memref<256x2xf32, #tpu.memory_space<vmem>>, %arg9: memref<1x8x256xf32, #tpu.memory_space<vmem>>, %arg10: memref<290x4xf32, #tpu.memory_space<vmem>>) attributes {dimension_semantics = [#tpu.dimension_semantics<parallel>, #tpu.dimension_semantics<parallel>], iteration_bounds = array<i64: 2, 1>, scalar_prefetch = 0 : i64, scratch_operands = 1 : i64, tpu.core_type = #tpu.core_type<tc>, window_params = [{transform_indices = @transform_0, window_bounds = array<i64: 1, 256, 4>}, {transform_indices = @transform_1, window_bounds = array<i64: 1, 16, 4>}, {transform_indices = @transform_2, window_bounds = array<i64: 1, 16, 4>}, {pipeline_mode = #tpu.pipeline_mode<synchronous>, transform_indices = @transform_3, window_bounds = array<i64: 1, 4>}, {pipeline_mode = #tpu.pipeline_mode<synchronous>, transform_indices = @transform_4, window_bounds = array<i64: 1, 4>}, {pipeline_mode = #tpu.pipeline_mode<synchronous>, transform_indices = @transform_5, window_bounds = array<i64: 9, 4, 8>}, {pipeline_mode = #tpu.pipeline_mode<synchronous>, transform_indices = @transform_6, window_bounds = array<i64: 256, 2>}, {transform_indices = @transform_7, window_bounds = array<i64: 1, 8, 256>}]} {
    %c0 = arith.constant 0 : index
    %c0_0 = arith.constant 0 : index
    %c0_1 = arith.constant 0 : index
    %0 = vector.load %arg3[%c0, %c0_0, %c0_1] : memref<1x16x4xf32, #tpu.memory_space<vmem>>, vector<1x16x4xf32>
    %1 = vector.shape_cast %0 : vector<1x16x4xf32> to vector<16x4xf32>
    %c0_2 = arith.constant 0 : index
    %c0_3 = arith.constant 0 : index
    %c0_4 = arith.constant 0 : index
    %2 = vector.load %arg2[%c0_2, %c0_3, %c0_4] : memref<1x256x4xf32, #tpu.memory_space<vmem>>, vector<1x256x4xf32>
    %3 = vector.shape_cast %2 : vector<1x256x4xf32> to vector<256x4xf32>
    %c0_5 = arith.constant 0 : index
    %c0_6 = arith.constant 0 : index
    %c0_7 = arith.constant 0 : index
    %4 = vector.load %arg4[%c0_5, %c0_6, %c0_7] : memref<1x16x4xf32, #tpu.memory_space<vmem>>, vector<1x16x4xf32>
    %5 = vector.shape_cast %4 : vector<1x16x4xf32> to vector<16x4xf32>
    %6 = tpu.concatenate %1, %3, %5 in 0 : vector<16x4xf32>, vector<256x4xf32>, vector<16x4xf32> -> vector<288x4xf32>
    %cst = arith.constant dense<0.000000e+00> : vector<288xf32>
    %7 = vector.multi_reduction <add>, %6, %cst [1] : vector<288x4xf32> to vector<288xf32>
    %8 = vector.shape_cast %7 : vector<288xf32> to vector<288x1xf32>
    %cst_8 = arith.constant 4.000000e+00 : f32
    %9 = vector.broadcast %cst_8 : f32 to vector<288x1xf32>
    %10 = arith.divf %8, %9 : vector<288x1xf32>
    %11 = vector.broadcast %10 : vector<288x1xf32> to vector<288x4xf32>
    %12 = arith.subf %6, %11 : vector<288x4xf32>
    %13 = arith.mulf %12, %12 : vector<288x4xf32>
    %cst_9 = arith.constant dense<0.000000e+00> : vector<288xf32>
    %14 = vector.multi_reduction <add>, %13, %cst_9 [1] : vector<288x4xf32> to vector<288xf32>
    %15 = vector.shape_cast %14 : vector<288xf32> to vector<288x1xf32>
    %cst_10 = arith.constant 4.000000e+00 : f32
    %16 = vector.broadcast %cst_10 : f32 to vector<288x1xf32>
    %17 = arith.divf %15, %16 : vector<288x1xf32>
    %cst_11 = arith.constant 9.99999974E-6 : f32
    %18 = vector.broadcast %cst_11 : f32 to vector<288x1xf32>
    %19 = arith.addf %17, %18 : vector<288x1xf32>
    %20 = math.rsqrt %19 : vector<288x1xf32>
    %21 = vector.broadcast %20 : vector<288x1xf32> to vector<288x4xf32>
    %22 = arith.mulf %12, %21 : vector<288x4xf32>
    %c0_12 = arith.constant 0 : index
    %c0_13 = arith.constant 0 : index
    %23 = vector.load %arg5[%c0_12, %c0_13] : memref<1x4xf32, #tpu.memory_space<vmem>>, vector<1x4xf32>
    %24 = vector.broadcast %23 : vector<1x4xf32> to vector<288x4xf32>
    %25 = arith.mulf %22, %24 : vector<288x4xf32>
    %c0_14 = arith.constant 0 : index
    %c0_15 = arith.constant 0 : index
    %26 = vector.load %arg6[%c0_14, %c0_15] : memref<1x4xf32, #tpu.memory_space<vmem>>, vector<1x4xf32>
    %27 = vector.broadcast %26 : vector<1x4xf32> to vector<288x4xf32>
    %28 = arith.addf %25, %27 : vector<288x4xf32>
    %cst_16 = arith.constant 0.000000e+00 : f32
    %29 = vector.broadcast %cst_16 : f32 to vector<288x4xf32>
    %30 = arith.maximumf %28, %29 : vector<288x4xf32>
    %c0_i32 = arith.constant 0 : i32
    %31 = arith.cmpi sgt, %arg1, %c0_i32 : i32
    %32 = arith.extui %31 : i1 to i32
    %33 = arith.sitofp %32 : i32 to f32
    %c0_i32_17 = arith.constant 0 : i32
    %34 = arith.cmpi slt, %arg1, %c0_i32_17 : i32
    %35 = arith.extui %34 : i1 to i32
    %36 = arith.sitofp %35 : i32 to f32
    %cst_18 = arith.constant 0.000000e+00 : f32
    %37 = vector.broadcast %cst_18 : f32 to vector<290x4xf32>
    %c0_19 = arith.constant 0 : index
    %c0_20 = arith.constant 0 : index
    %38 = vector.load %arg10[%c0_19, %c0_20] : memref<290x4xf32, #tpu.memory_space<vmem>>, vector<290x4xf32>
    tpu.vector_store %arg10[%c0_19, %c0_20], %37 {strides = array<i32>} : memref<290x4xf32, #tpu.memory_space<vmem>>, vector<290x4xf32>,
    %39 = vector.extract_strided_slice %30 {offsets = [0, 0], sizes = [16, 4], strides = [1, 1]} : vector<288x4xf32> to vector<16x4xf32>
    %40 = vector.broadcast %33 : f32 to vector<16x4xf32>
    %41 = arith.mulf %39, %40 : vector<16x4xf32>
    %c1 = arith.constant 1 : index
    %c0_21 = arith.constant 0 : index
    %42 = vector.load %arg10[%c1, %c0_21] : memref<290x4xf32, #tpu.memory_space<vmem>>, vector<16x4xf32>
    tpu.vector_store %arg10[%c1, %c0_21], %41 {strides = array<i32>} : memref<290x4xf32, #tpu.memory_space<vmem>>, vector<16x4xf32>,
    %43 = vector.extract_strided_slice %30 {offsets = [16, 0], sizes = [256, 4], strides = [1, 1]} : vector<288x4xf32> to vector<256x4xf32>
    %c17 = arith.constant 17 : index
    %c0_22 = arith.constant 0 : index
    %44 = vector.load %arg10[%c17, %c0_22] : memref<290x4xf32, #tpu.memory_space<vmem>>, vector<256x4xf32>
    tpu.vector_store %arg10[%c17, %c0_22], %43 {strides = array<i32>} : memref<290x4xf32, #tpu.memory_space<vmem>>, vector<256x4xf32>,
    %45 = vector.extract_strided_slice %30 {offsets = [272, 0], sizes = [16, 4], strides = [1, 1]} : vector<288x4xf32> to vector<16x4xf32>
    %46 = vector.broadcast %36 : f32 to vector<16x4xf32>
    %47 = arith.mulf %45, %46 : vector<16x4xf32>
    %c273 = arith.constant 273 : index
    %c0_23 = arith.constant 0 : index
    %48 = vector.load %arg10[%c273, %c0_23] : memref<290x4xf32, #tpu.memory_space<vmem>>, vector<16x4xf32>
    tpu.vector_store %arg10[%c273, %c0_23], %47 {strides = array<i32>} : memref<290x4xf32, #tpu.memory_space<vmem>>, vector<16x4xf32>,
    %c0_24 = arith.constant 0 : index
    %c0_25 = arith.constant 0 : index
    %49 = vector.load %arg8[%c0_24, %c0_25] : memref<256x2xf32, #tpu.memory_space<vmem>>, vector<256x1xf32>
    %c0_26 = arith.constant 0 : index
    %c1_27 = arith.constant 1 : index
    %50 = vector.load %arg8[%c0_26, %c1_27] : memref<256x2xf32, #tpu.memory_space<vmem>>, vector<256x1xf32>
    %cst_28 = arith.constant 0.000000e+00 : f32
    %51 = vector.broadcast %cst_28 : f32 to vector<256x8xf32>
    %c0_29 = arith.constant 0 : index
    %c0_30 = arith.constant 0 : index
    %52 = vector.load %arg10[%c0_29, %c0_30] : memref<290x4xf32, #tpu.memory_space<vmem>>, vector<256x4xf32>
    %53 = vector.broadcast %49 : vector<256x1xf32> to vector<256x4xf32>
    %54 = arith.mulf %52, %53 : vector<256x4xf32>
    %c0_31 = arith.constant 0 : index
    %c0_32 = arith.constant 0 : index
    %c0_33 = arith.constant 0 : index
    %55 = vector.load %arg7[%c0_31, %c0_32, %c0_33] : memref<9x4x8xf32, #tpu.memory_space<vmem>>, vector<1x4x8xf32>
    %56 = vector.shape_cast %55 : vector<1x4x8xf32> to vector<4x8xf32>
    %cst_34 = arith.constant dense<0.000000e+00> : vector<256x8xf32>
    %57 = tpu.matmul %54, %56, %cst_34 {dimension_numbers = #tpu.dot_dimension_numbers<[1], [0], [0], [1], [0, 0, 1, 1], [], []>} : vector<256x4xf32>, vector<4x8xf32>, vector<256x8xf32> -> vector<256x8xf32>
    %58 = arith.addf %51, %57 : vector<256x8xf32>
    %c1_35 = arith.constant 1 : index
    %c0_36 = arith.constant 0 : index
    %59 = vector.load %arg10[%c1_35, %c0_36] : memref<290x4xf32, #tpu.memory_space<vmem>>, vector<256x4xf32>
    %c1_37 = arith.constant 1 : index
    %c0_38 = arith.constant 0 : index
    %c0_39 = arith.constant 0 : index
    %60 = vector.load %arg7[%c1_37, %c0_38, %c0_39] : memref<9x4x8xf32, #tpu.memory_space<vmem>>, vector<1x4x8xf32>
    %61 = vector.shape_cast %60 : vector<1x4x8xf32> to vector<4x8xf32>
    %cst_40 = arith.constant dense<0.000000e+00> : vector<256x8xf32>
    %62 = tpu.matmul %59, %61, %cst_40 {dimension_numbers = #tpu.dot_dimension_numbers<[1], [0], [0], [1], [0, 0, 1, 1], [], []>} : vector<256x4xf32>, vector<4x8xf32>, vector<256x8xf32> -> vector<256x8xf32>
    %63 = arith.addf %58, %62 : vector<256x8xf32>
    %c2 = arith.constant 2 : index
    %c0_41 = arith.constant 0 : index
    %64 = vector.load %arg10[%c2, %c0_41] : memref<290x4xf32, #tpu.memory_space<vmem>>, vector<256x4xf32>
    %65 = vector.broadcast %50 : vector<256x1xf32> to vector<256x4xf32>
    %66 = arith.mulf %64, %65 : vector<256x4xf32>
    %c2_42 = arith.constant 2 : index
    %c0_43 = arith.constant 0 : index
    %c0_44 = arith.constant 0 : index
    %67 = vector.load %arg7[%c2_42, %c0_43, %c0_44] : memref<9x4x8xf32, #tpu.memory_space<vmem>>, vector<1x4x8xf32>
    %68 = vector.shape_cast %67 : vector<1x4x8xf32> to vector<4x8xf32>
    %cst_45 = arith.constant dense<0.000000e+00> : vector<256x8xf32>
    %69 = tpu.matmul %66, %68, %cst_45 {dimension_numbers = #tpu.dot_dimension_numbers<[1], [0], [0], [1], [0, 0, 1, 1], [], []>} : vector<256x4xf32>, vector<4x8xf32>, vector<256x8xf32> -> vector<256x8xf32>
    %70 = arith.addf %63, %69 : vector<256x8xf32>
    %c16 = arith.constant 16 : index
    %c0_46 = arith.constant 0 : index
    %71 = vector.load %arg10[%c16, %c0_46] : memref<290x4xf32, #tpu.memory_space<vmem>>, vector<256x4xf32>
    %72 = vector.broadcast %49 : vector<256x1xf32> to vector<256x4xf32>
    %73 = arith.mulf %71, %72 : vector<256x4xf32>
    %c3 = arith.constant 3 : index
    %c0_47 = arith.constant 0 : index
    %c0_48 = arith.constant 0 : index
    %74 = vector.load %arg7[%c3, %c0_47, %c0_48] : memref<9x4x8xf32, #tpu.memory_space<vmem>>, vector<1x4x8xf32>
    %75 = vector.shape_cast %74 : vector<1x4x8xf32> to vector<4x8xf32>
    %cst_49 = arith.constant dense<0.000000e+00> : vector<256x8xf32>
    %76 = tpu.matmul %73, %75, %cst_49 {dimension_numbers = #tpu.dot_dimension_numbers<[1], [0], [0], [1], [0, 0, 1, 1], [], []>} : vector<256x4xf32>, vector<4x8xf32>, vector<256x8xf32> -> vector<256x8xf32>
    %77 = arith.addf %70, %76 : vector<256x8xf32>
    %c17_50 = arith.constant 17 : index
    %c0_51 = arith.constant 0 : index
    %78 = vector.load %arg10[%c17_50, %c0_51] : memref<290x4xf32, #tpu.memory_space<vmem>>, vector<256x4xf32>
    %c4 = arith.constant 4 : index
    %c0_52 = arith.constant 0 : index
    %c0_53 = arith.constant 0 : index
    %79 = vector.load %arg7[%c4, %c0_52, %c0_53] : memref<9x4x8xf32, #tpu.memory_space<vmem>>, vector<1x4x8xf32>
    %80 = vector.shape_cast %79 : vector<1x4x8xf32> to vector<4x8xf32>
    %cst_54 = arith.constant dense<0.000000e+00> : vector<256x8xf32>
    %81 = tpu.matmul %78, %80, %cst_54 {dimension_numbers = #tpu.dot_dimension_numbers<[1], [0], [0], [1], [0, 0, 1, 1], [], []>} : vector<256x4xf32>, vector<4x8xf32>, vector<256x8xf32> -> vector<256x8xf32>
    %82 = arith.addf %77, %81 : vector<256x8xf32>
    %c18 = arith.constant 18 : index
    %c0_55 = arith.constant 0 : index
    %83 = vector.load %arg10[%c18, %c0_55] : memref<290x4xf32, #tpu.memory_space<vmem>>, vector<256x4xf32>
    %84 = vector.broadcast %50 : vector<256x1xf32> to vector<256x4xf32>
    %85 = arith.mulf %83, %84 : vector<256x4xf32>
    %c5 = arith.constant 5 : index
    %c0_56 = arith.constant 0 : index
    %c0_57 = arith.constant 0 : index
    %86 = vector.load %arg7[%c5, %c0_56, %c0_57] : memref<9x4x8xf32, #tpu.memory_space<vmem>>, vector<1x4x8xf32>
    %87 = vector.shape_cast %86 : vector<1x4x8xf32> to vector<4x8xf32>
    %cst_58 = arith.constant dense<0.000000e+00> : vector<256x8xf32>
    %88 = tpu.matmul %85, %87, %cst_58 {dimension_numbers = #tpu.dot_dimension_numbers<[1], [0], [0], [1], [0, 0, 1, 1], [], []>} : vector<256x4xf32>, vector<4x8xf32>, vector<256x8xf32> -> vector<256x8xf32>
    %89 = arith.addf %82, %88 : vector<256x8xf32>
    %c32 = arith.constant 32 : index
    %c0_59 = arith.constant 0 : index
    %90 = vector.load %arg10[%c32, %c0_59] : memref<290x4xf32, #tpu.memory_space<vmem>>, vector<256x4xf32>
    %91 = vector.broadcast %49 : vector<256x1xf32> to vector<256x4xf32>
    %92 = arith.mulf %90, %91 : vector<256x4xf32>
    %c6 = arith.constant 6 : index
    %c0_60 = arith.constant 0 : index
    %c0_61 = arith.constant 0 : index
    %93 = vector.load %arg7[%c6, %c0_60, %c0_61] : memref<9x4x8xf32, #tpu.memory_space<vmem>>, vector<1x4x8xf32>
    %94 = vector.shape_cast %93 : vector<1x4x8xf32> to vector<4x8xf32>
    %cst_62 = arith.constant dense<0.000000e+00> : vector<256x8xf32>
    %95 = tpu.matmul %92, %94, %cst_62 {dimension_numbers = #tpu.dot_dimension_numbers<[1], [0], [0], [1], [0, 0, 1, 1], [], []>} : vector<256x4xf32>, vector<4x8xf32>, vector<256x8xf32> -> vector<256x8xf32>
    %96 = arith.addf %89, %95 : vector<256x8xf32>
    %c33 = arith.constant 33 : index
    %c0_63 = arith.constant 0 : index
    %97 = vector.load %arg10[%c33, %c0_63] : memref<290x4xf32, #tpu.memory_space<vmem>>, vector<256x4xf32>
    %c7 = arith.constant 7 : index
    %c0_64 = arith.constant 0 : index
    %c0_65 = arith.constant 0 : index
    %98 = vector.load %arg7[%c7, %c0_64, %c0_65] : memref<9x4x8xf32, #tpu.memory_space<vmem>>, vector<1x4x8xf32>
    %99 = vector.shape_cast %98 : vector<1x4x8xf32> to vector<4x8xf32>
    %cst_66 = arith.constant dense<0.000000e+00> : vector<256x8xf32>
    %100 = tpu.matmul %97, %99, %cst_66 {dimension_numbers = #tpu.dot_dimension_numbers<[1], [0], [0], [1], [0, 0, 1, 1], [], []>} : vector<256x4xf32>, vector<4x8xf32>, vector<256x8xf32> -> vector<256x8xf32>
    %101 = arith.addf %96, %100 : vector<256x8xf32>
    %c34 = arith.constant 34 : index
    %c0_67 = arith.constant 0 : index
    %102 = vector.load %arg10[%c34, %c0_67] : memref<290x4xf32, #tpu.memory_space<vmem>>, vector<256x4xf32>
    %103 = vector.broadcast %50 : vector<256x1xf32> to vector<256x4xf32>
    %104 = arith.mulf %102, %103 : vector<256x4xf32>
    %c8 = arith.constant 8 : index
    %c0_68 = arith.constant 0 : index
    %c0_69 = arith.constant 0 : index
    %105 = vector.load %arg7[%c8, %c0_68, %c0_69] : memref<9x4x8xf32, #tpu.memory_space<vmem>>, vector<1x4x8xf32>
    %106 = vector.shape_cast %105 : vector<1x4x8xf32> to vector<4x8xf32>
    %cst_70 = arith.constant dense<0.000000e+00> : vector<256x8xf32>
    %107 = tpu.matmul %104, %106, %cst_70 {dimension_numbers = #tpu.dot_dimension_numbers<[1], [0], [0], [1], [0, 0, 1, 1], [], []>} : vector<256x4xf32>, vector<4x8xf32>, vector<256x8xf32> -> vector<256x8xf32>
    %108 = arith.addf %101, %107 : vector<256x8xf32>
    %109 = tpu.transpose %108, [1, 0] : vector<256x8xf32> -> vector<8x256xf32>
    %c0_71 = arith.constant 0 : index
    %c0_72 = arith.constant 0 : index
    %c0_73 = arith.constant 0 : index
    %110 = vector.load %arg9[%c0_71, %c0_72, %c0_73] : memref<1x8x256xf32, #tpu.memory_space<vmem>>, vector<1x8x256xf32>
    %111 = vector.shape_cast %110 : vector<1x8x256xf32> to vector<8x256xf32>
    %112 = vector.shape_cast %109 : vector<8x256xf32> to vector<1x8x256xf32>
    tpu.vector_store %arg9[%c0_71, %c0_72, %c0_73], %112 {strides = array<i32>} : memref<1x8x256xf32, #tpu.memory_space<vmem>>, vector<1x8x256xf32>,
    return
  }
  func.func @transform_0(%arg0: i32, %arg1: i32) -> (i32, i32, i32) {
    %c0_i32 = arith.constant 0 : i32
    %c0_i32_0 = arith.constant 0 : i32
    return %arg0, %arg1, %c0_i32 : i32, i32, i32
  }
  func.func @transform_1(%arg0: i32, %arg1: i32) -> (i32, i32, i32) {
    %c16_i32 = arith.constant 16 : i32
    %0 = arith.muli %arg1, %c16_i32 : i32
    %c1_i32 = arith.constant 1 : i32
    %1 = arith.subi %0, %c1_i32 : i32
    %c0_i32 = arith.constant 0 : i32
    %2 = arith.maxsi %1, %c0_i32 : i32
    %c0_i32_0 = arith.constant 0 : i32
    %c0_i32_1 = arith.constant 0 : i32
    return %arg0, %2, %c0_i32_0 : i32, i32, i32
  }
  func.func @transform_2(%arg0: i32, %arg1: i32) -> (i32, i32, i32) {
    %c1_i32 = arith.constant 1 : i32
    %0 = arith.addi %arg1, %c1_i32 : i32
    %c16_i32 = arith.constant 16 : i32
    %1 = arith.muli %0, %c16_i32 : i32
    %c15_i32 = arith.constant 15 : i32
    %2 = arith.minsi %1, %c15_i32 : i32
    %c0_i32 = arith.constant 0 : i32
    %c0_i32_0 = arith.constant 0 : i32
    return %arg0, %2, %c0_i32 : i32, i32, i32
  }
  func.func @transform_3(%arg0: i32, %arg1: i32) -> (i32, i32) {
    %c0_i32 = arith.constant 0 : i32
    %c0_i32_0 = arith.constant 0 : i32
    %c0_i32_1 = arith.constant 0 : i32
    return %c0_i32, %c0_i32_0 : i32, i32
  }
  func.func @transform_4(%arg0: i32, %arg1: i32) -> (i32, i32) {
    %c0_i32 = arith.constant 0 : i32
    %c0_i32_0 = arith.constant 0 : i32
    %c0_i32_1 = arith.constant 0 : i32
    return %c0_i32, %c0_i32_0 : i32, i32
  }
  func.func @transform_5(%arg0: i32, %arg1: i32) -> (i32, i32, i32) {
    %c0_i32 = arith.constant 0 : i32
    %c0_i32_0 = arith.constant 0 : i32
    %c0_i32_1 = arith.constant 0 : i32
    %c0_i32_2 = arith.constant 0 : i32
    return %c0_i32, %c0_i32_0, %c0_i32_1 : i32, i32, i32
  }
  func.func @transform_6(%arg0: i32, %arg1: i32) -> (i32, i32) {
    %c0_i32 = arith.constant 0 : i32
    %c0_i32_0 = arith.constant 0 : i32
    %c0_i32_1 = arith.constant 0 : i32
    return %c0_i32, %c0_i32_0 : i32, i32
  }
  func.func @transform_7(%arg0: i32, %arg1: i32) -> (i32, i32, i32) {
    %c0_i32 = arith.constant 0 : i32
    %c0_i32_0 = arith.constant 0 : i32
    return %arg0, %c0_i32, %arg1 : i32, i32, i32
  }
}

</mosaic_0001>

<bundles_post_ra>
// kernel: tpu_custom_call.1
= control target key start
LH: loop header
LB: loop body
LE: loop exit
PB: predicated region body
PF: predicated region fallthrough
CT: control target
= control target key end

     0   :  { %12 = vsyncpa [#allocation4], 0  ;;  %s9188_s0 = inlined_call_operand.vmem [shape: f32[2,256,4], index: 0, kind: input, shape index: {}]   ;;  %s9189_s1 = inlined_call_operand.vmem [shape: f32[2,256,4], index: 1, kind: input, shape index: {}]   ;;  %s9190_s2 = inlined_call_operand.vmem [shape: f32[2,256,4], index: 2, kind: input, shape index: {}]   ;;  %s9191_s3 = inlined_call_operand.vmem [shape: f32[1,4], index: 3, kind: input, shape index: {}]   ;;  %s9192_s4 = inlined_call_operand.vmem [shape: f32[1,4], index: 4, kind: input, shape index: {}]   ;;  %s9193_s5 = inlined_call_operand.vmem [shape: f32[9,4,8], index: 5, kind: input, shape index: {}]   ;;  %s9194_s6 = inlined_call_operand.vmem [shape: f32[256,2], index: 6, kind: input, shape index: {}]   ;;  %s9195_s7 = inlined_call_operand.hbm [shape: f32[2,8,256], index: 7, kind: output, shape index: {}]  }
   0x1   :  { %14 = vsyncpa [#allocation4 + $0x1], 0  ;;  %s6679_s24 = smov 0   ;;  %s6681_s25 = smov 0  }
   0x2   :  { %s6683_s26 = smov 0   ;;  %s6685_s27 = smov 0  }
   0x3   :  { %s6687_s28 = smov 0   ;;  %s6689_s29 = smov 0  }
   0x4 LB: > { %s5303_s30 = sadd.s32 4294967295, %s6633_s29   ;;  %s5304_s8 = sadd.s32 4294967294, %s6633_s29   ;;  %s6633_s29 = sphi %s6689_s29, %s20_s29   ;;  %s6629_s28 = sphi %s6687_s28, %s9533_s28   ;;  %s6625_s27 = sphi %s6685_s27, %s9532_s27   ;;  %s6621_s26 = sphi %s6683_s26, %s9531_s26   ;;  %s6617_s25 = sphi %s6681_s25, %s9530_s25   ;;  %s6613_s24 = sphi %s6679_s24, %s9529_s24  }
   0x5   : > { %s32_s9 = sadd.s32 1, %s6629_s28  ;;  %s225_s10 = sadd.s32 1, %s6621_s26 }
   0x6   : > { %p34_p0 = scmp.ge.s32.totalorder %s32_s9, 2  ;;  %p235_p1 = scmp.ne.s32.totalorder %s6621_s26, %s6617_s25 }
   0x7   : > { %p236_p2 = scmp.eq.s32.totalorder %s5303_s30, 1  ;;  %p241_p3 = scmp.ne.s32.totalorder %s6617_s25, %s6613_s24 }
   0x8   : > { %s9535_s9 = smov (%p34_p0, %s32_s9), 0  ;;  %p242_p5 = scmp.eq.s32.totalorder %s5304_s8, 1 }
   0x9   : > { %p6719_p4 = por %p236_p2, %p235_p1  ;;  %s220_s12 = ssub.s32 %s6629_s28, %s9535_s9 }
   0xa   : > { %p5307_p6 = scmp.ge.s32.totalorder %s6633_s29, 1  ;;  %p223_p7 = scmp.eq.s32.totalorder %s220_s12, 0 }
   0xb   : > { %p6726_p8 = por %p242_p5, %p241_p3  ;;  %p327_p9 = scmp.lt.s32.totalorder %s6633_s29, 3 }
   0xc   : > { %s6732_s14 = scalar_select %p223_p7, %s6621_s26, %s225_s10  }
   0xd   : > { %p328_p10 = pnand %p5307_p6, %p327_p9 }
   0xf   : > { %331 = sbr.rel (%p328_p10) target bundleno = 1174 (0x496), region = 48 }
  0x14   : > { %p390_p11 = scmp.lt.s32.totalorder %s6625_s27, 1  ;;  %v9197_v0 = vmov 0   ;;  %vm472_vm0 = vcmask 31744   ;;  %vm1537_vm1 = vcmask 1043456   ;;  %vm1106_vm2 = vcmask 25600   ;;  %s386_s17 = sand.u32 1, %s6617_s25  }
  0x15   : > { %6440 = vset.pattern.permute.xlu1 %v9197_v0  ;;  %6445 = vset.pattern.permute.xlu0 %v9197_v0  ;;  %s5631_s21 = sshll.u32 %s6625_s27, 8  ;;  %s5175_s30 = scalar_lea.sflag [#allocation4], %s386_s17 }
  0x16   : > { %s391_s15 = scalar_select %p390_p11, %s6625_s27, 1 }
  0x17   : > { %s6638_s10 = smov [#allocation3]  }
  0x18   : > { %s6738_s16 = sshll.u32 %s391_s15, 8 }
  0x19   : > { %s411_s19 = scalar_lea.vmem %s9189_s1, %s6738_s16  ;;  %s6748_s22 = scalar_lea.vmem %s9188_s0, %s6738_s16 }
  0x1a   : > { %v6750_v1 = vld [vmem:[%s411_s19 + $0x8] sm:$0xff]  ;;  %v6752_v2 = vld [vmem:[%s411_s19] sm:$0xff]  ;;  %v6755_v3 = vld [vmem:[%s6748_s22 + $0x78] sm:$0xff]  ;;  %s5630_s12 = sadd.s32 240, %s6738_s16  ;;  %s5308_s16 = sshll.u32 %s386_s17, 4 }
  0x1b   : > { %v476_v4 = vsel %vm472_vm0, %v6750_v1, 0.0  ;;  %v473_v5 = vsel %vm472_vm0, %v6752_v2, 0.0  ;;  %v6762_v6 = vld [vmem:[%s6748_s22 + $0x70] sm:$0xff]  ;;  %v524_v7 = vsel %vm472_vm0, %v6755_v3, 0.0  ;;  %v6769_v9 = vld [vmem:[%s6748_s22 + $0x88] sm:$0xff]  ;;  %v6772_v10 = vld [vmem:[%s6748_s22 + $0x80] sm:$0xff]  ;;  %s7415_s19 = scalar_lea.vmem %s9190_s2, %s5630_s12 }
  0x1c   : > { %477 = vadd.xlane.f32.xlu1 %v476_v4  ;;  %474 = vadd.xlane.f32.xlu0 %v473_v5  ;;  %v521_v8 = vsel %vm472_vm0, %v6762_v6, 0.0  ;;  %v530_v11 = vsel %vm472_vm0, %v6769_v9, 0.0  ;;  %v527_v12 = vsel %vm472_vm0, %v6772_v10, 0.0  ;;  %v6779_v13 = vld [vmem:[%s6748_s22 + $0x8] sm:$0xff]  ;;  %v6782_v14 = vld [vmem:[%s6748_s22] sm:$0xff]  ;;  %v6789_v17 = vld [vmem:[%s6748_s22 + $0x98] sm:$0xff] }
  0x1d   : > { %v482_v15 = vsel %vm472_vm0, %v6779_v13, 0.0  ;;  %v479_v16 = vsel %vm472_vm0, %v6782_v14, 0.0  ;;  %v6792_v18 = vld [vmem:[%s6748_s22 + $0x90] sm:$0xff]  ;;  %v536_v19 = vsel %vm472_vm0, %v6789_v17, 0.0  ;;  %v6799_v21 = vld [vmem:[%s6748_s22 + $0x18] sm:$0xff]  ;;  %v6809_v25 = vld [vmem:[%s6748_s22 + $0xa8] sm:$0xff] }
  0x1e   : > { %v533_v20 = vsel %vm472_vm0, %v6792_v18, 0.0  ;;  %v6802_v22 = vld [vmem:[%s6748_s22 + $0x10] sm:$0xff]  ;;  %v488_v23 = vsel %vm472_vm0, %v6799_v21, 0.0  ;;  %v6812_v26 = vld [vmem:[%s6748_s22 + $0xa0] sm:$0xff]  ;;  %v542_v27 = vsel %vm472_vm0, %v6809_v25, 0.0  ;;  %v6819_v29 = vld [vmem:[%s6748_s22 + $0x28] sm:$0xff] }
  0x1f   : > { %v485_v24 = vsel %vm472_vm0, %v6802_v22, 0.0  ;;  %v539_v28 = vsel %vm472_vm0, %v6812_v26, 0.0  ;;  %v6822_v30 = vld [vmem:[%s6748_s22 + $0x20] sm:$0xff]  ;;  %v494_v31 = vsel %vm472_vm0, %v6819_v29, 0.0  ;;  %v6829_v33 = vld [vmem:[%s6748_s22 + $0xb8] sm:$0xff]  ;;  %v6832_v34 = vld [vmem:[%s6748_s22 + $0xb0] sm:$0xff] }
  0x20   : > { %525 = vadd.xlane.f32.xlu1 %v524_v7  ;;  %522 = vadd.xlane.f32.xlu0 %v521_v8  ;;  %v491_v32 = vsel %vm472_vm0, %v6822_v30, 0.0  ;;  %v548_v35 = vsel %vm472_vm0, %v6829_v33, 0.0  ;;  %v545_v36 = vsel %vm472_vm0, %v6832_v34, 0.0  ;;  %v6839_v37 = vld [vmem:[%s6748_s22 + $0x38] sm:$0xff]  ;;  %v6842_v38 = vld [vmem:[%s6748_s22 + $0x30] sm:$0xff]  ;;  %v6849_v41 = vld [vmem:[%s6748_s22 + $0xc8] sm:$0xff] }
  0x21   : > { %v500_v39 = vsel %vm472_vm0, %v6839_v37, 0.0  ;;  %v497_v40 = vsel %vm472_vm0, %v6842_v38, 0.0  ;;  %v6852_v42 = vld [vmem:[%s6748_s22 + $0xc0] sm:$0xff]  ;;  %v554_v43 = vsel %vm472_vm0, %v6849_v41, 0.0  ;;  %v6859_v45 = vld [vmem:[%s6748_s22 + $0x48] sm:$0xff]  ;;  %v6869_v49 = vld [vmem:[%s6748_s22 + $0xd8] sm:$0xff] }
  0x22   : > { %v551_v44 = vsel %vm472_vm0, %v6852_v42, 0.0  ;;  %v6862_v46 = vld [vmem:[%s6748_s22 + $0x40] sm:$0xff]  ;;  %v506_v47 = vsel %vm472_vm0, %v6859_v45, 0.0  ;;  %v6872_v50 = vld [vmem:[%s6748_s22 + $0xd0] sm:$0xff]  ;;  %v560_v51 = vsel %vm472_vm0, %v6869_v49, 0.0  ;;  %v6879_v53 = vld [vmem:[%s6748_s22 + $0x58] sm:$0xff] }
  0x23   : > { %v503_v48 = vsel %vm472_vm0, %v6862_v46, 0.0  ;;  %v557_v52 = vsel %vm472_vm0, %v6872_v50, 0.0  ;;  %v6882_v54 = vld [vmem:[%s6748_s22 + $0x50] sm:$0xff]  ;;  %v512_v55 = vsel %vm472_vm0, %v6879_v53, 0.0  ;;  %v6889_v57 = vld [vmem:[%s6748_s22 + $0xe8] sm:$0xff]  ;;  %v6892_v58 = vld [vmem:[%s6748_s22 + $0xe0] sm:$0xff] }
  0x24   : > { %531 = vadd.xlane.f32.xlu1 %v530_v11  ;;  %528 = vadd.xlane.f32.xlu0 %v527_v12  ;;  %v509_v56 = vsel %vm472_vm0, %v6882_v54, 0.0  ;;  %v566_v59 = vsel %vm472_vm0, %v6889_v57, 0.0  ;;  %v563_v60 = vsel %vm472_vm0, %v6892_v58, 0.0  ;;  %v6899_v61 = vld [vmem:[%s6748_s22 + $0x68] sm:$0xff]  ;;  %v6902_v62 = vld [vmem:[%s6748_s22 + $0x60] sm:$0xff]  ;;  %v6909_v5 = vld [vmem:[%s6748_s22 + $0xf0] sm:$0xff] }
  0x25   : > { %v518_v63 = vsel %vm472_vm0, %v6899_v61, 0.0  ;;  %v515_v4 = vsel %vm472_vm0, %v6902_v62, 0.0  ;;  %v569_v7 = vsel %vm472_vm0, %v6909_v5, 0.0  ;;  %v6916_v8 = vld [vmem:[%s9194_s6] sm:$0xff]  ;;  %v6922_v11 = vld [vmem:[%s9194_s6 + $0x10] sm:$0xff]  ;;  %v6928_v12 = vld [vmem:[%s9194_s6 + $0x18] sm:$0xff] }
  0x26   : > { %s388_s18 = scalar_lea.vmem [#allocation3], %s5308_s16  ;;  %s6561_s12 = sshll.u32 %s6638_s10, 4  ;;  %s6562_s12 = int_to_ptr.vmem [resolvable:$false] %s6561_s12 }
  0x27   : > { %s5191_s20 = sshll.u32 %s388_s18, 4  ;;  %s6563_s27 = scalar_lea.vmem %s6562_s12, 512  ;;  %s9145_s20 = int_to_ptr.vmem [resolvable:$true] %s5191_s20 }
  0x28   : > { %483 = vadd.xlane.f32.xlu1 %v482_v15  ;;  %480 = vadd.xlane.f32.xlu0 %v479_v16  ;;  %v9199_v15 = vmov 1   ;;  %s6557_s8 = scalar_lea.vmem %s9145_s20, 256  ;;  %p6564_p1 = scmp.lt.s32.totalorder %s9145_s20, %s6562_s12 }
  0x29   : > { %p6558_p12 = scmp.ne.s32.totalorder %s9145_s20, %s6557_s8  ;;  %p6565_p2 = scmp.lt.s32.totalorder %s6563_s27, %s6557_s8 }
  0x2b   : > { %p6559_p13 = pnand %p6558_p12, %p6719_p4  ;;  %p6566_p3 = por %p6565_p2, %p6564_p1 }
  0x2c   : > { %537 = vadd.xlane.f32.xlu1 %v536_v19  ;;  %534 = vadd.xlane.f32.xlu0 %v533_v20 }
  0x2d   : > { %p6560_p0 = pneg %p6559_p13 }
  0x2f   : > { %p6567_p5 = pnand %p6566_p3, %p6560_p0 }
  0x30   : > { %489 = vadd.xlane.f32.xlu1 %v488_v23  ;;  %486 = vadd.xlane.f32.xlu0 %v485_v24 }
  0x34   : > { %543 = vadd.xlane.f32.xlu1 %v542_v27  ;;  %540 = vadd.xlane.f32.xlu0 %v539_v28 }
  0x38   : > { %495 = vadd.xlane.f32.xlu1 %v494_v31  ;;  %492 = vadd.xlane.f32.xlu0 %v491_v32 }
  0x3c   : > { %549 = vadd.xlane.f32.xlu1 %v548_v35  ;;  %546 = vadd.xlane.f32.xlu0 %v545_v36 }
  0x40   : > { %501 = vadd.xlane.f32.xlu1 %v500_v39  ;;  %498 = vadd.xlane.f32.xlu0 %v497_v40 }
  0x44   : > { %555 = vadd.xlane.f32.xlu1 %v554_v43  ;;  %552 = vadd.xlane.f32.xlu0 %v551_v44 }
  0x48   : > { %507 = vadd.xlane.f32.xlu1 %v506_v47  ;;  %504 = vadd.xlane.f32.xlu0 %v503_v48 }
  0x4c   : > { %561 = vadd.xlane.f32.xlu1 %v560_v51  ;;  %558 = vadd.xlane.f32.xlu0 %v557_v52 }
  0x50   : > { %513 = vadd.xlane.f32.xlu1 %v512_v55  ;;  %510 = vadd.xlane.f32.xlu0 %v509_v56 }
  0x54   : > { %567 = vadd.xlane.f32.xlu1 %v566_v59  ;;  %564 = vadd.xlane.f32.xlu0 %v563_v60 }
  0x58   : > { %519 = vadd.xlane.f32.xlu1 %v518_v63  ;;  %516 = vadd.xlane.f32.xlu0 %v515_v4 }
  0x5c   : > { %570 = vadd.xlane.f32.xlu0 %v569_v7 }
  0x69   : > { %1216 = vperm.xlu1 %6440, %v6916_v8  }
  0x6d   : > { %1226 = vperm.xlu1 %6440, %v6922_v11  }
  0x71   : > { %1231 = vperm.xlu1 %6440, %v6928_v12  }
  0x75   : > { %6441 = vset.pattern.permute.xlu1 %v9199_v15 }
  0xa5   : > { %v478_v16 = vpop.xlane.xlu1 %477  ;;  %v475_v19 = vpop.xlane.xlu0 %474 }
  0xa6   : > { %v583_v20 = vmul.f32 0.25, %v478_v16  ;;  %v582_v23 = vmul.f32 0.25, %v475_v19 }
  0xa8   : > { %v6933_v24 = vsub.f32 %v6750_v1, %v583_v20  ;;  %v6936_v27 = vsub.f32 %v6752_v2, %v582_v23 }
  0xa9   : > { %v526_v28 = vpop.xlane.xlu1 %525  ;;  %v523_v31 = vpop.xlane.xlu0 %522 }
  0xaa   : > { %v599_v32 = vmul.f32 0.25, %v526_v28  ;;  %v598_v35 = vmul.f32 0.25, %v523_v31  ;;  %v654_v36 = vmul.f32 %v6936_v27, %v6936_v27  ;;  %v655_v39 = vmul.f32 %v6933_v24, %v6933_v24 }
  0xac   : > { %v6943_v40 = vsub.f32 %v6755_v3, %v599_v32  ;;  %v6946_v43 = vsub.f32 %v6762_v6, %v598_v35  ;;  %v690_v1 = vsel %vm472_vm0, %v654_v36, 0.0  ;;  %v693_v47 = vsel %vm472_vm0, %v655_v39, 0.0 }
  0xad   : > { %v532_v2 = vpop.xlane.xlu1 %531  ;;  %v529_v44 = vpop.xlane.xlu0 %528  ;;  %691 = vadd.xlane.f32.xlu0 %v690_v1  ;;  %v9196_v39 = vmov 0.0  }
  0xae   : > { %v601_v48 = vmul.f32 0.25, %v532_v2  ;;  %v600_v51 = vmul.f32 0.25, %v529_v44  ;;  %v670_v52 = vmul.f32 %v6946_v43, %v6946_v43  ;;  %v671_v55 = vmul.f32 %v6943_v40, %v6943_v40  ;;  %1070 = vst.msk [vmem:[#allocation2] sm:$0xff] %vm472_vm0, %v9196_v39  ;;  %1071 = vst.msk [vmem:[#allocation2 + $0x8] sm:$0xff] %vm472_vm0, %v9196_v39 }
  0xaf   : > { %1072 = vst.msk [vmem:[#allocation2 + $0x10] sm:$0xff] %vm472_vm0, %v9196_v39  ;;  %1073 = vst.msk [vmem:[#allocation2 + $0x18] sm:$0xff] %vm472_vm0, %v9196_v39 }
  0xb0   : > { %v6955_v3 = vsub.f32 %v6769_v9, %v601_v48  ;;  %v6958_v6 = vsub.f32 %v6772_v10, %v600_v51  ;;  %v738_v56 = vsel %vm472_vm0, %v670_v52, 0.0  ;;  %v741_v63 = vsel %vm472_vm0, %v671_v55, 0.0  ;;  %1074 = vst.msk [vmem:[#allocation2 + $0x20] sm:$0xff] %vm472_vm0, %v9196_v39  ;;  %1075 = vst.msk [vmem:[#allocation2 + $0x28] sm:$0xff] %vm472_vm0, %v9196_v39 }
  0xb1   : > { %739 = vadd.xlane.f32.xlu1 %v738_v56  ;;  %v484_v59 = vpop.xlane.xlu1 %483  ;;  %694 = vadd.xlane.f32.xlu0 %v693_v47  ;;  %v481_v60 = vpop.xlane.xlu0 %480  ;;  %1076 = vst.msk [vmem:[#allocation2 + $0x30] sm:$0xff] %vm472_vm0, %v9196_v39  ;;  %1077 = vst.msk [vmem:[#allocation2 + $0x38] sm:$0xff] %vm472_vm0, %v9196_v39 }
  0xb2   : > { %v585_v4 = vmul.f32 0.25, %v484_v59  ;;  %v584_v7 = vmul.f32 0.25, %v481_v60  ;;  %v672_v16 = vmul.f32 %v6958_v6, %v6958_v6  ;;  %v673_v9 = vmul.f32 %v6955_v3, %v6955_v3  ;;  %1078 = vst.msk [vmem:[#allocation2 + $0x40] sm:$0xff] %vm472_vm0, %v9196_v39  ;;  %1079 = vst.msk [vmem:[#allocation2 + $0x48] sm:$0xff] %vm472_vm0, %v9196_v39 }
  0xb3   : > { %1080 = vst.msk [vmem:[#allocation2 + $0x50] sm:$0xff] %vm472_vm0, %v9196_v39  ;;  %1081 = vst.msk [vmem:[#allocation2 + $0x58] sm:$0xff] %vm472_vm0, %v9196_v39 }
  0xb4   : > { %v6967_v19 = vsub.f32 %v6779_v13, %v585_v4  ;;  %v6970_v10 = vsub.f32 %v6782_v14, %v584_v7  ;;  %v744_v20 = vsel %vm472_vm0, %v672_v16, 0.0  ;;  %v747_v31 = vsel %vm472_vm0, %v673_v9, 0.0  ;;  %1082 = vst.msk [vmem:[#allocation2 + $0x60] sm:$0xff] %vm472_vm0, %v9196_v39  ;;  %1083 = vst.msk [vmem:[#allocation2 + $0x68] sm:$0xff] %vm472_vm0, %v9196_v39 }
  0xb5   : > { %742 = vadd.xlane.f32.xlu1 %v741_v63  ;;  %v538_v23 = vpop.xlane.xlu1 %537  ;;  %745 = vadd.xlane.f32.xlu0 %v744_v20  ;;  %v535_v28 = vpop.xlane.xlu0 %534  ;;  %1084 = vst.msk [vmem:[#allocation2 + $0x70] sm:$0xff] %vm472_vm0, %v9196_v39  ;;  %1085 = vst.msk [vmem:[#allocation2 + $0x78] sm:$0xff] %vm472_vm0, %v9196_v39 }
  0xb6   : > { %v603_v32 = vmul.f32 0.25, %v538_v23  ;;  %v602_v35 = vmul.f32 0.25, %v535_v28  ;;  %v656_v36 = vmul.f32 %v6970_v10, %v6970_v10  ;;  %v657_v13 = vmul.f32 %v6967_v19, %v6967_v19  ;;  %1086 = vst.msk [vmem:[#allocation2 + $0x80] sm:$0xff] %vm472_vm0, %v9196_v39  ;;  %1087 = vst.msk [vmem:[#allocation2 + $0x88] sm:$0xff] %vm472_vm0, %v9196_v39 }
  0xb7   : > { %1088 = vst.msk [vmem:[#allocation2 + $0x90] sm:$0xff] %vm472_vm0, %v9196_v39  ;;  %1089 = vst.msk [vmem:[#allocation2 + $0x98] sm:$0xff] %vm472_vm0, %v9196_v39 }
  0xb8   : > { %1090 = vst.msk [vmem:[#allocation2 + $0xa0] sm:$0xff] %vm472_vm0, %v9196_v39  ;;  %1091 = vst.msk [vmem:[#allocation2 + $0xa8] sm:$0xff] %vm472_vm0, %v9196_v39  ;;  %v7051_v14 = vsub.f32 %v6789_v17, %v603_v32  ;;  %v7054_v1 = vsub.f32 %v6792_v18, %v602_v35  ;;  %v696_v2 = vsel %vm472_vm0, %v656_v36, 0.0  ;;  %v699_v48 = vsel %vm472_vm0, %v657_v13, 0.0 }
  0xb9   : > { %1092 = vst.msk [vmem:[#allocation2 + $0xb0] sm:$0xff] %vm472_vm0, %v9196_v39  ;;  %1093 = vst.msk [vmem:[#allocation2 + $0xb8] sm:$0xff] %vm472_vm0, %v9196_v39  ;;  %748 = vadd.xlane.f32.xlu1 %v747_v31  ;;  %v490_v44 = vpop.xlane.xlu1 %489  ;;  %697 = vadd.xlane.f32.xlu0 %v696_v2  ;;  %v487_v47 = vpop.xlane.xlu0 %486 }
  0xba   : > { %1094 = vst.msk [vmem:[#allocation2 + $0xc0] sm:$0xff] %vm472_vm0, %v9196_v39  ;;  %1095 = vst.msk [vmem:[#allocation2 + $0xc8] sm:$0xff] %vm472_vm0, %v9196_v39  ;;  %v587_v51 = vmul.f32 0.25, %v490_v44  ;;  %v586_v52 = vmul.f32 0.25, %v487_v47  ;;  %v674_v55 = vmul.f32 %v7054_v1, %v7054_v1  ;;  %v675_v17 = vmul.f32 %v7051_v14, %v7051_v14 }
  0xbb   : > { %1096 = vst.msk [vmem:[#allocation2 + $0xd0] sm:$0xff] %vm472_vm0, %v9196_v39  ;;  %1097 = vst.msk [vmem:[#allocation2 + $0xd8] sm:$0xff] %vm472_vm0, %v9196_v39 }
  0xbc   : > { %1098 = vst.msk [vmem:[#allocation2 + $0xe0] sm:$0xff] %vm472_vm0, %v9196_v39  ;;  %1099 = vst.msk [vmem:[#allocation2 + $0xe8] sm:$0xff] %vm472_vm0, %v9196_v39  ;;  %v7063_v56 = vsub.f32 %v6799_v21, %v587_v51  ;;  %v7066_v18 = vsub.f32 %v6802_v22, %v586_v52  ;;  %v750_v59 = vsel %vm472_vm0, %v674_v55, 0.0  ;;  %v753_v4 = vsel %vm472_vm0, %v675_v17, 0.0 }
  0xbd   : > { %1100 = vst.msk [vmem:[#allocation2 + $0xf0] sm:$0xff] %vm472_vm0, %v9196_v39  ;;  %1101 = vst.msk [vmem:[#allocation2 + $0xf8] sm:$0xff] %vm472_vm0, %v9196_v39  ;;  %700 = vadd.xlane.f32.xlu1 %v699_v48  ;;  %v544_v60 = vpop.xlane.xlu1 %543  ;;  %751 = vadd.xlane.f32.xlu0 %v750_v59  ;;  %v541_v63 = vpop.xlane.xlu0 %540 }
  0xbe   : > { %1102 = vst.msk [vmem:[#allocation2 + $0x100] sm:$0xff] %vm472_vm0, %v9196_v39  ;;  %1103 = vst.msk [vmem:[#allocation2 + $0x108] sm:$0xff] %vm472_vm0, %v9196_v39  ;;  %v605_v7 = vmul.f32 0.25, %v544_v60  ;;  %v604_v16 = vmul.f32 0.25, %v541_v63  ;;  %v658_v9 = vmul.f32 %v7066_v18, %v7066_v18  ;;  %v659_v21 = vmul.f32 %v7063_v56, %v7063_v56 }
  0xbf   : > { %1104 = vst.msk [vmem:[#allocation2 + $0x110] sm:$0xff] %vm472_vm0, %v9196_v39  ;;  %1105 = vst.msk [vmem:[#allocation2 + $0x118] sm:$0xff] %vm472_vm0, %v9196_v39 }
  0xc0   : > { %v7075_v20 = vsub.f32 %v6809_v25, %v605_v7  ;;  %v7078_v22 = vsub.f32 %v6812_v26, %v604_v16  ;;  %v702_v23 = vsel %vm472_vm0, %v658_v9, 0.0  ;;  %v705_v32 = vsel %vm472_vm0, %v659_v21, 0.0 }
  0xc1   : > { %754 = vadd.xlane.f32.xlu1 %v753_v4  ;;  %v496_v28 = vpop.xlane.xlu1 %495  ;;  %703 = vadd.xlane.f32.xlu0 %v702_v23  ;;  %v493_v31 = vpop.xlane.xlu0 %492 }
  0xc2   : > { %v589_v35 = vmul.f32 0.25, %v496_v28  ;;  %v588_v36 = vmul.f32 0.25, %v493_v31  ;;  %v676_v13 = vmul.f32 %v7078_v22, %v7078_v22  ;;  %v677_v25 = vmul.f32 %v7075_v20, %v7075_v20 }
  0xc4   : > { %v7087_v2 = vsub.f32 %v6819_v29, %v589_v35  ;;  %v7090_v26 = vsub.f32 %v6822_v30, %v588_v36  ;;  %v756_v44 = vsel %vm472_vm0, %v676_v13, 0.0  ;;  %v759_v51 = vsel %vm472_vm0, %v677_v25, 0.0 }
  0xc5   : > { %706 = vadd.xlane.f32.xlu1 %v705_v32  ;;  %v550_v47 = vpop.xlane.xlu1 %549  ;;  %757 = vadd.xlane.f32.xlu0 %v756_v44  ;;  %v547_v48 = vpop.xlane.xlu0 %546 }
  0xc6   : > { %v607_v52 = vmul.f32 0.25, %v550_v47  ;;  %v606_v55 = vmul.f32 0.25, %v547_v48  ;;  %v660_v17 = vmul.f32 %v7090_v26, %v7090_v26  ;;  %v661_v29 = vmul.f32 %v7087_v2, %v7087_v2 }
  0xc8   : > { %v7099_v59 = vsub.f32 %v6829_v33, %v607_v52  ;;  %v7102_v30 = vsub.f32 %v6832_v34, %v606_v55  ;;  %v708_v60 = vsel %vm472_vm0, %v660_v17, 0.0  ;;  %v711_v7 = vsel %vm472_vm0, %v661_v29, 0.0 }
  0xc9   : > { %760 = vadd.xlane.f32.xlu1 %v759_v51  ;;  %v502_v63 = vpop.xlane.xlu1 %501  ;;  %709 = vadd.xlane.f32.xlu0 %v708_v60  ;;  %v499_v4 = vpop.xlane.xlu0 %498 }
  0xca   : > { %v591_v16 = vmul.f32 0.25, %v502_v63  ;;  %v590_v9 = vmul.f32 0.25, %v499_v4  ;;  %v679_v21 = vmul.f32 %v7099_v59, %v7099_v59  ;;  %v678_v33 = vmul.f32 %v7102_v30, %v7102_v30 }
  0xcc   : > { %v7111_v23 = vsub.f32 %v6839_v37, %v591_v16  ;;  %v7114_v34 = vsub.f32 %v6842_v38, %v590_v9  ;;  %v765_v28 = vsel %vm472_vm0, %v679_v21, 0.0  ;;  %v762_v35 = vsel %vm472_vm0, %v678_v33, 0.0 }
  0xcd   : > { %712 = vadd.xlane.f32.xlu1 %v711_v7  ;;  %v556_v31 = vpop.xlane.xlu1 %555  ;;  %766 = vadd.xlane.f32.xlu0 %v765_v28  ;;  %v553_v32 = vpop.xlane.xlu0 %552 }
  0xce   : > { %v609_v36 = vmul.f32 0.25, %v556_v31  ;;  %v608_v13 = vmul.f32 0.25, %v553_v32  ;;  %v663_v25 = vmul.f32 %v7111_v23, %v7111_v23  ;;  %v662_v37 = vmul.f32 %v7114_v34, %v7114_v34 }
  0xd0   : > { %v7123_v44 = vsub.f32 %v6849_v41, %v609_v36  ;;  %v7126_v38 = vsub.f32 %v6852_v42, %v608_v13  ;;  %v717_v47 = vsel %vm472_vm0, %v663_v25, 0.0  ;;  %v714_v52 = vsel %vm472_vm0, %v662_v37, 0.0 }
  0xd1   : > { %v508_v48 = vpop.xlane.xlu1 %507  ;;  %718 = vadd.xlane.f32.xlu0 %v717_v47  ;;  %763 = vadd.xlane.f32.xlu1 %v762_v35  ;;  %v505_v51 = vpop.xlane.xlu0 %504 }
  0xd2   : > { %v593_v55 = vmul.f32 0.25, %v508_v48  ;;  %v592_v17 = vmul.f32 0.25, %v505_v51  ;;  %v681_v29 = vmul.f32 %v7123_v44, %v7123_v44  ;;  %v680_v41 = vmul.f32 %v7126_v38, %v7126_v38 }
  0xd4   : > { %v7135_v60 = vsub.f32 %v6859_v45, %v593_v55  ;;  %v7138_v42 = vsub.f32 %v6862_v46, %v592_v17  ;;  %v771_v63 = vsel %vm472_vm0, %v681_v29, 0.0  ;;  %v768_v16 = vsel %vm472_vm0, %v680_v41, 0.0  ;;  %v5317_v17 = vld [vmem:[%s9193_s5 + $0x4] sm:$0xf] }
  0xd5   : > { %v562_v4 = vpop.xlane.xlu1 %561  ;;  %772 = vadd.xlane.f32.xlu0 %v771_v63  ;;  %715 = vadd.xlane.f32.xlu1 %v714_v52  ;;  %v559_v7 = vpop.xlane.xlu0 %558 }
  0xd6   : > { %v611_v9 = vmul.f32 0.25, %v562_v4  ;;  %v610_v21 = vmul.f32 0.25, %v559_v7  ;;  %v665_v33 = vmul.f32 %v7135_v60, %v7135_v60  ;;  %v664_v45 = vmul.f32 %v7138_v42, %v7138_v42  ;;  %5930 = vmatprep.subr.msk.mxu0 %vm1537_vm1, %v5317_v17  ;;  %6380 = vmatprep.subr.msk.mxu1 %vm1537_vm1, %v5317_v17 }
  0xd7   : > { %5931 = vmatpush3.msk.msra.mxu0 %vm1537_vm1, %v5317_v17  ;;  %6381 = vmatpush3.msk.msra.mxu1 %vm1537_vm1, %v5317_v17 }
  0xd8   : > { %v7147_v28 = vsub.f32 %v6869_v49, %v611_v9  ;;  %v7150_v46 = vsub.f32 %v6872_v50, %v610_v21  ;;  %v723_v31 = vsel %vm472_vm0, %v665_v33, 0.0  ;;  %v720_v36 = vsel %vm472_vm0, %v664_v45, 0.0 }
  0xd9   : > { %v514_v32 = vpop.xlane.xlu1 %513  ;;  %724 = vadd.xlane.f32.xlu0 %v723_v31  ;;  %769 = vadd.xlane.f32.xlu1 %v768_v16  ;;  %v511_v35 = vpop.xlane.xlu0 %510 }
  0xda   : > { %v595_v13 = vmul.f32 0.25, %v514_v32  ;;  %v594_v25 = vmul.f32 0.25, %v511_v35  ;;  %v683_v37 = vmul.f32 %v7147_v28, %v7147_v28  ;;  %v682_v49 = vmul.f32 %v7150_v46, %v7150_v46 }
  0xdc   : > { %v7159_v47 = vsub.f32 %v6879_v53, %v595_v13  ;;  %v7162_v50 = vsub.f32 %v6882_v54, %v594_v25  ;;  %v777_v48 = vsel %vm472_vm0, %v683_v37, 0.0  ;;  %v774_v55 = vsel %vm472_vm0, %v682_v49, 0.0 }
  0xdd   : > { %v568_v51 = vpop.xlane.xlu1 %567  ;;  %778 = vadd.xlane.f32.xlu0 %v777_v48  ;;  %721 = vadd.xlane.f32.xlu1 %v720_v36  ;;  %v565_v52 = vpop.xlane.xlu0 %564 }
  0xde   : > { %v613_v29 = vmul.f32 0.25, %v568_v51  ;;  %v612_v41 = vmul.f32 0.25, %v565_v52  ;;  %v667_v53 = vmul.f32 %v7159_v47, %v7159_v47  ;;  %v666_v54 = vmul.f32 %v7162_v50, %v7162_v50  ;;  %v7209_v52 = vld [vmem:[%s6748_s22 + $0xf8] sm:$0xff]  ;;  %s5189_s22 = scalar_lea.hbm %s9195_s7, %s5631_s21 }
  0xdf   : > { %v572_v17 = vsel %vm472_vm0, %v7209_v52, 0.0 }
  0xe0   : > { %v7178_v63 = vsub.f32 %v6889_v57, %v613_v29  ;;  %v7181_v4 = vsub.f32 %v6892_v58, %v612_v41  ;;  %v729_v7 = vsel %vm472_vm0, %v667_v53, 0.0  ;;  %v726_v21 = vsel %vm472_vm0, %v666_v54, 0.0  ;;  %v1154_v29 = vld [vmem:[%s9194_s6 + $0x20] sm:$0xff]  ;;  %v1155_v41 = vld [vmem:[%s9194_s6 + $0x28] sm:$0xff]  ;;  %v1156_v53 = vld [vmem:[%s9194_s6 + $0x30] sm:$0xff] }
  0xe1   : > { %v520_v16 = vpop.xlane.xlu1 %519  ;;  %730 = vadd.xlane.f32.xlu0 %v729_v7  ;;  %775 = vadd.xlane.f32.xlu1 %v774_v55  ;;  %v517_v9 = vpop.xlane.xlu0 %516  ;;  %v1158_v54 = vld [vmem:[%s9194_s6 + $0x40] sm:$0xff]  ;;  %v1160_v7 = vld [vmem:[%s9194_s6 + $0x50] sm:$0xff] }
  0xe2   : > { %v597_v33 = vmul.f32 0.25, %v520_v16  ;;  %v596_v45 = vmul.f32 0.25, %v517_v9  ;;  %v685_v31 = vmul.f32 %v7178_v63, %v7178_v63  ;;  %v684_v57 = vmul.f32 %v7181_v4, %v7181_v4  ;;  %v7244_v16 = vld [vmem:[%s9193_s5] sm:$0xf]  ;;  %v7252_v9 = vld [vmem:[%s9194_s6 + $0xb0] sm:$0xff] }
  0xe3   : > { %5980 = vmatprep.subr.msk.mxu1 %vm1537_vm1, %v7244_v16 }
  0xe4   : > { %v7190_v32 = vsub.f32 %v6899_v61, %v597_v33  ;;  %v7193_v58 = vsub.f32 %v6902_v62, %v596_v45  ;;  %v783_v35 = vsel %vm472_vm0, %v685_v31, 0.0  ;;  %v780_v37 = vsel %vm472_vm0, %v684_v57, 0.0  ;;  %v1176_v33 = vld [vmem:[%s9194_s6 + $0xd0] sm:$0xff]  ;;  %v1161_v45 = vld [vmem:[%s9194_s6 + $0x58] sm:$0xff] }
  0xe5   : > { %784 = vadd.xlane.f32.xlu0 %v783_v35  ;;  %727 = vadd.xlane.f32.xlu1 %v726_v21  ;;  %v571_v36 = vpop.xlane.xlu0 %570  ;;  %v7257_v21 = vld [vmem:[%s9193_s5 + $0x8] sm:$0xf]  ;;  %v1180_v31 = vld [vmem:[%s9194_s6 + $0xf0] sm:$0xff]  ;;  %v7273_v57 = vpop.permute.xlu1 %1216 }
  0xe6   : > { %v614_v13 = vmul.f32 0.25, %v571_v36  ;;  %v669_v25 = vmul.f32 %v7190_v32, %v7190_v32  ;;  %v668_v49 = vmul.f32 %v7193_v58, %v7193_v58  ;;  %6030 = vmatprep.subr.msk.mxu0 %vm1537_vm1, %v7257_v21  ;;  %v1162_v36 = vld [vmem:[%s9194_s6 + $0x60] sm:$0xff] }
  0xe8   : > { %v7202_v61 = vsub.f32 %v6909_v5, %v614_v13  ;;  %v735_v62 = vsel %vm472_vm0, %v669_v25, 0.0  ;;  %v732_v48 = vsel %vm472_vm0, %v668_v49, 0.0  ;;  %v1151_v5 = vld [vmem:[%s9194_s6 + $0x8] sm:$0xff] }
  0xe9   : > { %736 = vadd.xlane.f32.xlu0 %v735_v62  ;;  %781 = vadd.xlane.f32.xlu1 %v780_v37  ;;  %v7277_v35 = vpop.permute.xlu1 %1226  ;;  %v1163_v13 = vld [vmem:[%s9194_s6 + $0x68] sm:$0xff] }
  0xea   : > { %v686_v51 = vmul.f32 %v7202_v61, %v7202_v61 }
  0xec   : > { %v786_v55 = vsel %vm472_vm0, %v686_v51, 0.0 }
  0xed   : > { %733 = vadd.xlane.f32.xlu1 %v732_v48  ;;  %787 = vadd.xlane.f32.xlu0 %v786_v55  ;;  %v7289_v25 = vpop.permute.xlu1 %1231  ;;  %v7294_v48 = vld [vmem:[%s9194_s6 + $0xa0] sm:$0xff] }
  0xf1   : > { %573 = vadd.xlane.f32.xlu1 %v572_v17 }
 0x102   : > { %2123 = vperm.xlu1 %6441, %v6916_v8   ;;  %v1157_v8 = vld [vmem:[%s9194_s6 + $0x38] sm:$0xff] }
 0x103   : > { %1221 = vperm.xlu0 %6445, %v1151_v5  }
 0x106   : > { %2127 = vperm.xlu1 %6441, %v1151_v5  }
 0x107   : > { %1236 = vperm.xlu0 %6445, %v1154_v29  }
 0x10a   : > { %2131 = vperm.xlu1 %6441, %v6922_v11   ;;  %v1159_v11 = vld [vmem:[%s9194_s6 + $0x48] sm:$0xff] }
 0x10b   : > { %1241 = vperm.xlu0 %6445, %v1155_v41  }
 0x10e   : > { %2143 = vperm.xlu1 %6441, %v1155_v41  }
 0x10f   : > { %1246 = vperm.xlu0 %6445, %v1156_v53  }
 0x112   : > { %2151 = vperm.xlu1 %6441, %v1157_v8  }
 0x113   : > { %1251 = vperm.xlu0 %6445, %v1157_v8  }
 0x116   : > { %6442 = vset.pattern.permute.xlu1 %v9197_v0 }
 0x117   : > { %1256 = vperm.xlu1 %6442, %v1158_v54   ;;  %1261 = vperm.xlu0 %6445, %v1159_v11  }
 0x11b   : > { %6443 = vset.pattern.permute.xlu1 %v9199_v15  ;;  %1266 = vperm.xlu0 %6445, %v1160_v7  }
 0x11c   : > { %2155 = vperm.xlu1 %6443, %v1158_v54  }
 0x11f   : > { %1326 = vperm.xlu0 %6445, %v7252_v9  }
 0x120   : > { %2159 = vperm.xlu1 %6443, %v1159_v11  }
 0x123   : > { %1346 = vperm.xlu0 %6445, %v1176_v33  }
 0x124   : > { %6444 = vset.pattern.permute.xlu1 %v9197_v0 }
 0x125   : > { %1271 = vperm.xlu1 %6444, %v1161_v45  }
 0x127   : > { %1366 = vperm.xlu0 %6445, %v1180_v31   ;;  %v7307_v31 = vld [vmem:[%s9194_s6 + $0xc0] sm:$0xff] }
 0x129   : > { %6446 = vset.pattern.permute.xlu1 %v9199_v15 }
 0x12a   : > { %2163 = vperm.xlu1 %6446, %v1160_v7  }
 0x12b   : > { %6465 = vset.pattern.permute.xlu0 %v9199_v15 }
 0x12c   : > { %2135 = vperm.xlu0 %6465, %v6928_v12   ;;  %v1164_v12 = vld [vmem:[%s9194_s6 + $0x70] sm:$0xff] }
 0x12e   : > { %2167 = vperm.xlu1 %6446, %v1161_v45  }
 0x130   : > { %2139 = vperm.xlu0 %6465, %v1154_v29  }
 0x132   : > { %6447 = vset.pattern.permute.xlu1 %v9197_v0 }
 0x133   : > { %1276 = vperm.xlu1 %6447, %v1162_v36  }
 0x134   : > { %2147 = vperm.xlu0 %6465, %v1156_v53   ;;  %v7301_v53 = vld [vmem:[%s9194_s6 + $0xb8] sm:$0xff] }
 0x136   : > { %v692_v37 = vpop.xlane.xlu0 %691 }
 0x137   : > { %v798_v49 = vmul.f32 0.25, %v692_v37  ;;  %1281 = vperm.xlu1 %6447, %v1163_v13  }
 0x138   : > { %2179 = vperm.xlu0 %6465, %v1164_v12  }
 0x139   : > { %v834_v62 = vadd.f32 1e-05, %v798_v49 }
 0x13a   : > { %v740_v51 = vpop.xlane.xlu1 %739  ;;  %v695_v55 = vpop.xlane.xlu0 %694 }
 0x13b   : > { %6468 = vrsqrt.f32 %v834_v62  ;;  %v814_v17 = vmul.f32 0.25, %v740_v51  ;;  %v799_v5 = vmul.f32 0.25, %v695_v55  ;;  %6448 = vset.pattern.permute.xlu1 %v9199_v15  ;;  %v1177_v55 = vld [vmem:[%s9194_s6 + $0xd8] sm:$0xff] }
 0x13c   : > { %2171 = vperm.xlu1 %6448, %v1162_v36   ;;  %2203 = vperm.xlu0 %6465, %v7294_v48  }
 0x13d   : > { %v850_v29 = vadd.f32 1e-05, %v814_v17  ;;  %v835_v41 = vadd.f32 1e-05, %v799_v5 }
 0x13e   : > { %v743_v8 = vpop.xlane.xlu1 %742  ;;  %v746_v54 = vpop.xlane.xlu0 %745 }
 0x13f   : > { %6470 = vrsqrt.f32 %v850_v29  ;;  %v815_v11 = vmul.f32 0.25, %v743_v8  ;;  %v816_v7 = vmul.f32 0.25, %v746_v54  ;;  %v1165_v29 = vld [vmem:[%s9194_s6 + $0x78] sm:$0xff] }
 0x140   : > { %6472 = vrsqrt.f32 %v835_v41  ;;  %2175 = vperm.xlu1 %6448, %v1163_v13   ;;  %2215 = vperm.xlu0 %6465, %v7301_v53  }
 0x141   : > { %v851_v33 = vadd.f32 1e-05, %v815_v11  ;;  %v852_v45 = vadd.f32 1e-05, %v816_v7  ;;  %v7320_v11 = vld [vmem:[%s9191_s3] ss:$0 sm:$0xff] }
 0x142   : > { %v749_v36 = vpop.xlane.xlu1 %748  ;;  %v698_v37 = vpop.xlane.xlu0 %697 }
 0x143   : > { %6474 = vrsqrt.f32 %v851_v33  ;;  %v817_v49 = vmul.f32 0.25, %v749_v36  ;;  %v800_v62 = vmul.f32 0.25, %v698_v37  ;;  %v7329_v36 = vld [vmem:[%s9192_s4] ss:$0 sm:$0xff] }
 0x144   : > { %6476 = vrsqrt.f32 %v852_v45  ;;  %6449 = vset.pattern.permute.xlu1 %v9197_v0  ;;  %2219 = vperm.xlu0 %6465, %v7307_v31   ;;  %v1178_v45 = vld [vmem:[%s9194_s6 + $0xe0] sm:$0xff] }
 0x145   : > { %v853_v13 = vadd.f32 1e-05, %v817_v49  ;;  %v836_v51 = vadd.f32 1e-05, %v800_v62  ;;  %1286 = vperm.xlu1 %6449, %v1164_v12  }
 0x146   : > { %v701_v17 = vpop.xlane.xlu1 %700  ;;  %v752_v5 = vpop.xlane.xlu0 %751 }
 0x147   : > { %6478 = vrsqrt.f32 %v853_v13  ;;  %v801_v41 = vmul.f32 0.25, %v701_v17  ;;  %v818_v8 = vmul.f32 0.25, %v752_v5 }
 0x148   : > { %v6469_v54 = vpop.eup %6468  ;;  %6480 = vrsqrt.f32 %v836_v51  ;;  %2231 = vperm.xlu0 %6465, %v1177_v55  }
 0x149   : > { %v906_v12 = vmul.f32 %v6469_v54, %v6936_v27  ;;  %v837_v7 = vadd.f32 1e-05, %v801_v41  ;;  %v854_v33 = vadd.f32 1e-05, %v818_v8  ;;  %1291 = vperm.xlu1 %6449, %v1165_v29   ;;  %v1181_v54 = vld [vmem:[%s9194_s6 + $0xf8] sm:$0xff] }
 0x14a   : > { %v755_v37 = vpop.xlane.xlu1 %754  ;;  %v704_v49 = vpop.xlane.xlu0 %703 }
 0x14b   : > { %v949_v62 = vmul.f32 %v7320_v11, %v906_v12  ;;  %6482 = vrsqrt.f32 %v837_v7  ;;  %v819_v13 = vmul.f32 0.25, %v755_v37  ;;  %v802_v51 = vmul.f32 0.25, %v704_v49 }
 0x14c   : > { %v6471_v27 = vpop.eup %6470  ;;  %6484 = vrsqrt.f32 %v854_v33  ;;  %2235 = vperm.xlu0 %6465, %v1178_v45  }
 0x14d   : > { %v6473_v55 = vpop.eup %6472  ;;  %v992_v17 = vadd.f32 %v7329_v36, %v949_v62  ;;  %v922_v5 = vmul.f32 %v6471_v27, %v6946_v43  ;;  %v855_v41 = vadd.f32 1e-05, %v819_v13  ;;  %v838_v8 = vadd.f32 1e-05, %v802_v51  ;;  %6450 = vset.pattern.permute.xlu1 %v9199_v15  ;;  %v7344_v51 = vld [vmem:[%s9194_s6 + $0x80] sm:$0xff] }
 0x14e   : > { %v907_v12 = vmul.f32 %v6473_v55, %v6933_v24  ;;  %v707_v7 = vpop.xlane.xlu1 %706  ;;  %2183 = vperm.xlu1 %6450, %v1165_v29   ;;  %v758_v37 = vpop.xlane.xlu0 %757 }
 0x14f   : > { %v1028_v33 = vmax.f32 %v992_v17, 0.0  ;;  %v965_v45 = vmul.f32 %v7320_v11, %v922_v5  ;;  %6486 = vrsqrt.f32 %v855_v41  ;;  %v803_v49 = vmul.f32 0.25, %v707_v7 }
 0x150   : > { %v6475_v62 = vpop.eup %6474  ;;  %v950_v43 = vmul.f32 %v7320_v11, %v907_v12  ;;  %6488 = vrsqrt.f32 %v838_v8  ;;  %v820_v13 = vmul.f32 0.25, %v758_v37  ;;  %2247 = vperm.xlu0 %6465, %v1181_v54  }
 0x151   : > { %v6477_v24 = vpop.eup %6476  ;;  %v1109_v27 = vmul.f32 0.0, %v1028_v33  ;;  %v1008_v29 = vadd.f32 %v7329_v36, %v965_v45  ;;  %v923_v55 = vmul.f32 %v6475_v62, %v6943_v40  ;;  %v839_v17 = vadd.f32 1e-05, %v803_v49  ;;  %v7358_v62 = vld [vmem:[%s9194_s6 + $0x88] sm:$0xff] }
 0x152   : > { %v993_v5 = vadd.f32 %v7329_v36, %v950_v43  ;;  %v924_v41 = vmul.f32 %v6477_v24, %v6958_v6  ;;  %v856_v12 = vadd.f32 1e-05, %v820_v13  ;;  %v761_v8 = vpop.xlane.xlu1 %760  ;;  %6451 = vset.pattern.permute.xlu1 %v9197_v0  ;;  %v710_v54 = vpop.xlane.xlu0 %709 }
 0x153   : > { %1111 = vst.msk [vmem:[#allocation2 + $0x1] sm:$0xff] %vm472_vm0, %v1109_v27  ;;  %v1044_v7 = vmax.f32 %v1008_v29, 0.0  ;;  %v966_v37 = vmul.f32 %v7320_v11, %v923_v55  ;;  %6490 = vrsqrt.f32 %v839_v17  ;;  %v821_v33 = vmul.f32 0.25, %v761_v8  ;;  %1296 = vperm.xlu1 %6451, %v7344_v51  }
 0x154   : > { %v6479_v40 = vpop.eup %6478  ;;  %v1029_v45 = vmax.f32 %v993_v5, 0.0  ;;  %v967_v49 = vmul.f32 %v7320_v11, %v924_v41  ;;  %6492 = vrsqrt.f32 %v856_v12  ;;  %v804_v6 = vmul.f32 0.25, %v710_v54 }
 0x155   : > { %v6481_v43 = vpop.eup %6480  ;;  %1127 = vst.msk [vmem:[#allocation2 + $0x81] sm:$0xff] %vm472_vm0, %v1044_v7  ;;  %v1009_v13 = vadd.f32 %v7329_v36, %v966_v37  ;;  %v925_v24 = vmul.f32 %v6479_v40, %v6955_v3  ;;  %v857_v27 = vadd.f32 1e-05, %v821_v33 }
 0x156   : > { %v1110_v29 = vmul.f32 0.0, %v1029_v45  ;;  %v1010_v55 = vadd.f32 %v7329_v36, %v967_v49  ;;  %v908_v17 = vmul.f32 %v6481_v43, %v6970_v10  ;;  %v840_v5 = vadd.f32 1e-05, %v804_v6  ;;  %v713_v41 = vpop.xlane.xlu1 %712  ;;  %v767_v12 = vpop.xlane.xlu0 %766 }
 0x157   : > { %v1045_v8 = vmax.f32 %v1009_v13, 0.0  ;;  %v968_v54 = vmul.f32 %v7320_v11, %v925_v24  ;;  %6494 = vrsqrt.f32 %v857_v27  ;;  %v805_v39 = vmul.f32 0.25, %v713_v41  ;;  %1301 = vperm.xlu1 %6451, %v7358_v62  }
 0x158   : > { %v6483_v7 = vpop.eup %6482  ;;  %1112 = vst.msk [vmem:[#allocation2 + $0x9] sm:$0xff] %vm472_vm0, %v1110_v29  ;;  %v1046_v3 = vmax.f32 %v1010_v55, 0.0  ;;  %v951_v37 = vmul.f32 %v7320_v11, %v908_v17  ;;  %6496 = vrsqrt.f32 %v840_v5  ;;  %v823_v33 = vmul.f32 0.25, %v767_v12 }
 0x159   : > { %v6485_v40 = vpop.eup %6484  ;;  %1128 = vst.msk [vmem:[#allocation2 + $0x89] sm:$0xff] %vm472_vm0, %v1045_v8  ;;  %v1011_v10 = vadd.f32 %v7329_v36, %v968_v54  ;;  %v909_v45 = vmul.f32 %v6483_v7, %v6967_v19  ;;  %v841_v49 = vadd.f32 1e-05, %v805_v39 }
 0x15a   : > { %1129 = vst.msk [vmem:[#allocation2 + $0x91] sm:$0xff] %vm472_vm0, %v1046_v3  ;;  %v994_v6 = vadd.f32 %v7329_v36, %v951_v37  ;;  %v926_v43 = vmul.f32 %v6485_v40, %v7054_v1  ;;  %v859_v13 = vadd.f32 1e-05, %v823_v33  ;;  %v764_v24 = vpop.xlane.xlu1 %763  ;;  %v719_v27 = vpop.xlane.xlu0 %718  ;;  %v1407_v29 = vld [vmem:[#allocation2 + $0x1] sm:$0xff] }
 0x15b   : > { %v1047_v55 = vmax.f32 %v1011_v10, 0.0  ;;  %v952_v17 = vmul.f32 %v7320_v11, %v909_v45  ;;  %6498 = vrsqrt.f32 %v841_v49  ;;  %v822_v5 = vmul.f32 0.25, %v764_v24  ;;  %6452 = vset.pattern.permute.xlu1 %v9199_v15  ;;  %5932 = vmatprep.mubr.msk.f32.mxu0 %vm472_vm0, %v1407_v29 }
 0x15c   : > { %v6487_v19 = vpop.eup %6486  ;;  %v1030_v39 = vmax.f32 %v994_v6, 0.0  ;;  %v969_v41 = vmul.f32 %v7320_v11, %v926_v43  ;;  %6500 = vrsqrt.f32 %v859_v13  ;;  %v807_v12 = vmul.f32 0.25, %v719_v27  ;;  %2187 = vperm.xlu1 %6452, %v7344_v51   ;;  %v1423_v1 = vld [vmem:[#allocation2 + $0x81] sm:$0xff] }
 0x15d   : > { %v6489_v8 = vpop.eup %6488  ;;  %1130 = vst.msk [vmem:[#allocation2 + $0x99] sm:$0xff] %vm472_vm0, %v1047_v55  ;;  %v995_v54 = vadd.f32 %v7329_v36, %v952_v17  ;;  %v927_v7 = vmul.f32 %v6487_v19, %v7051_v14  ;;  %v858_v3 = vadd.f32 1e-05, %v822_v5  ;;  %5956 = vmatprep.mubr.msk.f32.mxu1 %vm472_vm0, %v1423_v1 }
 0x15e   : > { %1113 = vst.msk [vmem:[#allocation2 + $0x11] sm:$0xff] %vm472_vm0, %v1030_v39  ;;  %v1012_v37 = vadd.f32 %v7329_v36, %v969_v41  ;;  %v910_v33 = vmul.f32 %v6489_v8, %v7066_v18  ;;  %v843_v40 = vadd.f32 1e-05, %v807_v12  ;;  %v716_v10 = vpop.xlane.xlu1 %715  ;;  %v773_v51 = vpop.xlane.xlu0 %772 }
 0x15f   : > { %v1031_v45 = vmax.f32 %v995_v54, 0.0  ;;  %v970_v49 = vmul.f32 %v7320_v11, %v927_v7  ;;  %6502 = vrsqrt.f32 %v858_v3  ;;  %v806_v6 = vmul.f32 0.25, %v716_v10  ;;  %v1408_v43 = vld [vmem:[#allocation2 + $0x9] sm:$0xff] }
 0x160   : > { %v6491_v14 = vpop.eup %6490  ;;  %v1048_v13 = vmax.f32 %v1012_v37, 0.0  ;;  %v953_v24 = vmul.f32 %v7320_v11, %v910_v33  ;;  %6504 = vrsqrt.f32 %v843_v40  ;;  %v825_v27 = vmul.f32 0.25, %v773_v51  ;;  %5933 = vmatmul.mubr.msk.f32.vlgmr.msra.gmra.mxu0 %vm472_vm0, %v1408_v43  ;;  %2191 = vperm.xlu1 %6452, %v7358_v62   ;;  %v1424_v18 = vld [vmem:[#allocation2 + $0x89] sm:$0xff] }
 0x161   : > { %v6493_v29 = vpop.eup %6492  ;;  %1114 = vst.msk [vmem:[#allocation2 + $0x19] sm:$0xff] %vm472_vm0, %v1031_v45  ;;  %v1013_v55 = vadd.f32 %v7329_v36, %v970_v49  ;;  %v911_v17 = vmul.f32 %v6491_v14, %v7063_v56  ;;  %v842_v5 = vadd.f32 1e-05, %v806_v6  ;;  %5957 = vmatmul.mubr.msk.f32.vlgmr.msra.gmra.mxu1 %vm472_vm0, %v1424_v18  ;;  %v1425_v19 = vld [vmem:[#allocation2 + $0x91] sm:$0xff]  ;;  %6031 = vmatpush3.msk.msra.mxu0 %vm1537_vm1, %v7257_v21 }
 0x162   : > { %1131 = vst.msk [vmem:[#allocation2 + $0xa1] sm:$0xff] %vm472_vm0, %v1048_v13  ;;  %v996_v62 = vadd.f32 %v7329_v36, %v953_v24  ;;  %v928_v39 = vmul.f32 %v6493_v29, %v7078_v22  ;;  %v861_v41 = vadd.f32 1e-05, %v825_v27  ;;  %v770_v12 = vpop.xlane.xlu1 %769  ;;  %5959 = vmatprep.mubr.msk.f32.mxu1 %vm472_vm0, %v1425_v19  ;;  %v725_v1 = vpop.xlane.xlu0 %724  ;;  %v7405_v56 = vld [vmem:[%s9194_s6 + $0x90] sm:$0xff]  ;;  %5981 = vmatpush3.msk.msra.mxu1 %vm1537_vm1, %v7244_v16  ;;  %v471_v29 = vld [vmem:[%s7415_s19 + $0x8] sm:$0xff] }
 0x163   : > { %v1049_v21 = vmax.f32 %v1013_v55, 0.0  ;;  %v954_v8 = vmul.f32 %v7320_v11, %v911_v17  ;;  %6506 = vrsqrt.f32 %v842_v5  ;;  %v824_v54 = vmul.f32 0.25, %v770_v12 }
 0x164   : > { %v6495_v7 = vpop.eup %6494  ;;  %v1032_v22 = vmax.f32 %v996_v62, 0.0  ;;  %v971_v3 = vmul.f32 %v7320_v11, %v928_v39  ;;  %6508 = vrsqrt.f32 %v861_v41  ;;  %v809_v37 = vmul.f32 0.25, %v725_v1  ;;  %6453 = vset.pattern.permute.xlu1 %v9197_v0  ;;  %v1426_v33 = vld [vmem:[#allocation2 + $0x99] sm:$0xff] }
 0x165   : > { %v6497_v16 = vpop.eup %6496  ;;  %1132 = vst.msk [vmem:[#allocation2 + $0xa9] sm:$0xff] %vm472_vm0, %v1049_v21  ;;  %v997_v40 = vadd.f32 %v7329_v36, %v954_v8  ;;  %v929_v10 = vmul.f32 %v6495_v7, %v7075_v20  ;;  %v860_v51 = vadd.f32 1e-05, %v824_v54  ;;  %1306 = vperm.xlu1 %6453, %v7405_v56   ;;  %v1409_v45 = vld [vmem:[#allocation2 + $0x11] sm:$0xff]  ;;  %5960 = vmatmul.mubr.msk.f32.gmra.mxu1 %vm472_vm0, %v1426_v33 }
 0x166   : > { %1115 = vst.msk [vmem:[#allocation2 + $0x21] sm:$0xff] %vm472_vm0, %v1032_v22  ;;  %v1014_v49 = vadd.f32 %v7329_v36, %v971_v3  ;;  %v912_v6 = vmul.f32 %v6497_v16, %v7090_v26  ;;  %v845_v43 = vadd.f32 1e-05, %v809_v37  ;;  %5935 = vmatprep.mubr.msk.f32.mxu0 %vm472_vm0, %v1409_v45  ;;  %v722_v14 = vpop.xlane.xlu1 %721  ;;  %v779_v13 = vpop.xlane.xlu0 %778  ;;  %v7429_v20 = vld [vmem:[%s9194_s6 + $0x98] sm:$0xff]  ;;  %v578_v3 = vsel %vm472_vm0, %v471_v29, 0.0 }
 0x167   : > { %v1033_v24 = vmax.f32 %v997_v40, 0.0  ;;  %v972_v27 = vmul.f32 %v7320_v11, %v929_v10  ;;  %6510 = vrsqrt.f32 %v860_v51  ;;  %v808_v18 = vmul.f32 0.25, %v722_v14 }
 0x168   : > { %v6499_v55 = vpop.eup %6498  ;;  %v1050_v17 = vmax.f32 %v1014_v49, 0.0  ;;  %v955_v26 = vmul.f32 %v7320_v11, %v912_v6  ;;  %6512 = vrsqrt.f32 %v845_v43  ;;  %v827_v5 = vmul.f32 0.25, %v779_v13  ;;  %v1410_v19 = vld [vmem:[#allocation2 + $0x19] sm:$0xff] }
 0x169   : > { %v6501_v62 = vpop.eup %6500  ;;  %1116 = vst.msk [vmem:[#allocation2 + $0x29] sm:$0xff] %vm472_vm0, %v1033_v24  ;;  %v1015_v39 = vadd.f32 %v7329_v36, %v972_v27  ;;  %v913_v41 = vmul.f32 %v6499_v55, %v7087_v2  ;;  %v844_v12 = vadd.f32 1e-05, %v808_v18  ;;  %1311 = vperm.xlu1 %6453, %v7429_v20   ;;  %5936 = vmatmul.mubr.msk.f32.gmra.mxu0 %vm472_vm0, %v1410_v19  ;;  %v1427_v1 = vld [vmem:[#allocation2 + $0xa1] sm:$0xff] }
 0x16a   : > { %1133 = vst.msk [vmem:[#allocation2 + $0xb1] sm:$0xff] %vm472_vm0, %v1050_v17  ;;  %v998_v21 = vadd.f32 %v7329_v36, %v955_v26  ;;  %v931_v8 = vmul.f32 %v6501_v62, %v7099_v59  ;;  %v863_v54 = vadd.f32 1e-05, %v827_v5  ;;  %5962 = vmatprep.mubr.msk.f32.mxu1 %vm472_vm0, %v1427_v1  ;;  %v776_v7 = vpop.xlane.xlu1 %775  ;;  %v731_v22 = vpop.xlane.xlu0 %730 }
 0x16b   : > { %v1051_v2 = vmax.f32 %v1015_v39, 0.0  ;;  %v956_v37 = vmul.f32 %v7320_v11, %v913_v41  ;;  %6514 = vrsqrt.f32 %v844_v12  ;;  %v826_v33 = vmul.f32 0.25, %v776_v7 }
 0x16c   : > { %v6503_v16 = vpop.eup %6502  ;;  %v1034_v40 = vmax.f32 %v998_v21, 0.0  ;;  %v974_v10 = vmul.f32 %v7320_v11, %v931_v8  ;;  %6516 = vrsqrt.f32 %v863_v54  ;;  %v811_v51 = vmul.f32 0.25, %v731_v22  ;;  %v1428_v45 = vld [vmem:[#allocation2 + $0xa9] sm:$0xff] }
 0x16d   : > { %v6505_v59 = vpop.eup %6504  ;;  %1134 = vst.msk [vmem:[#allocation2 + $0xb9] sm:$0xff] %vm472_vm0, %v1051_v2  ;;  %v999_v49 = vadd.f32 %v7329_v36, %v956_v37  ;;  %v930_v6 = vmul.f32 %v6503_v16, %v7102_v30  ;;  %v862_v43 = vadd.f32 1e-05, %v826_v33  ;;  %6454 = vset.pattern.permute.xlu1 %v9199_v15  ;;  %v1411_v14 = vld [vmem:[#allocation2 + $0x21] sm:$0xff]  ;;  %5963 = vmatmul.mubr.msk.f32.gmra.mxu1 %vm472_vm0, %v1428_v45 }
 0x16e   : > { %1117 = vst.msk [vmem:[#allocation2 + $0x31] sm:$0xff] %vm472_vm0, %v1034_v40  ;;  %v1017_v13 = vadd.f32 %v7329_v36, %v974_v10  ;;  %v915_v24 = vmul.f32 %v6505_v59, %v7111_v23  ;;  %v847_v27 = vadd.f32 1e-05, %v811_v51  ;;  %5938 = vmatprep.mubr.msk.f32.mxu0 %vm472_vm0, %v1411_v14  ;;  %v728_v18 = vpop.xlane.xlu1 %727  ;;  %2195 = vperm.xlu1 %6454, %v7405_v56   ;;  %v785_v29 = vpop.xlane.xlu0 %784 }
 0x16f   : > { %v1035_v30 = vmax.f32 %v999_v49, 0.0  ;;  %v973_v55 = vmul.f32 %v7320_v11, %v930_v6  ;;  %6518 = vrsqrt.f32 %v862_v43  ;;  %v810_v17 = vmul.f32 0.25, %v728_v18  ;;  %579 = vadd.xlane.f32.xlu0 %v578_v3 }
 0x170   : > { %v6507_v26 = vpop.eup %6506  ;;  %v1053_v5 = vmax.f32 %v1017_v13, 0.0  ;;  %v958_v19 = vmul.f32 %v7320_v11, %v915_v24  ;;  %6520 = vrsqrt.f32 %v847_v27  ;;  %v829_v62 = vmul.f32 0.25, %v785_v29  ;;  %v1412_v23 = vld [vmem:[#allocation2 + $0x29] sm:$0xff] }
 0x171   : > { %v6509_v39 = vpop.eup %6508  ;;  %1118 = vst.msk [vmem:[#allocation2 + $0x39] sm:$0xff] %vm472_vm0, %v1035_v30  ;;  %v1016_v41 = vadd.f32 %v7329_v36, %v973_v55  ;;  %v914_v56 = vmul.f32 %v6507_v26, %v7114_v34  ;;  %v846_v12 = vadd.f32 1e-05, %v810_v17  ;;  %5939 = vmatmul.mubr.msk.f32.gmra.mxu0 %vm472_vm0, %v1412_v23  ;;  %v1429_v1 = vld [vmem:[#allocation2 + $0xb1] sm:$0xff]  ;;  %v1171_v17 = vld [vmem:[%s9194_s6 + $0xa8] sm:$0xff] }
 0x172   : > { %1136 = vst.msk [vmem:[#allocation2 + $0xc9] sm:$0xff] %vm472_vm0, %v1053_v5  ;;  %v1001_v21 = vadd.f32 %v7329_v36, %v958_v19  ;;  %v933_v8 = vmul.f32 %v6509_v39, %v7123_v44  ;;  %v865_v54 = vadd.f32 1e-05, %v829_v62  ;;  %5965 = vmatprep.mubr.msk.f32.mxu1 %vm472_vm0, %v1429_v1  ;;  %v782_v7 = vpop.xlane.xlu1 %781  ;;  %2199 = vperm.xlu1 %6454, %v7429_v20   ;;  %v737_v22 = vpop.xlane.xlu0 %736 }
 0x173   : > { %v1052_v3 = vmax.f32 %v1016_v41, 0.0  ;;  %v957_v34 = vmul.f32 %v7320_v11, %v914_v56  ;;  %6522 = vrsqrt.f32 %v846_v12  ;;  %v828_v2 = vmul.f32 0.25, %v782_v7 }
 0x174   : > { %v6511_v37 = vpop.eup %6510  ;;  %v1037_v33 = vmax.f32 %v1001_v21, 0.0  ;;  %v976_v16 = vmul.f32 %v7320_v11, %v933_v8  ;;  %6524 = vrsqrt.f32 %v865_v54  ;;  %v813_v40 = vmul.f32 0.25, %v737_v22  ;;  %v1430_v10 = vld [vmem:[#allocation2 + $0xb9] sm:$0xff] }
 0x175   : > { %v6513_v44 = vpop.eup %6512  ;;  %1135 = vst.msk [vmem:[#allocation2 + $0xc1] sm:$0xff] %vm472_vm0, %v1052_v3  ;;  %v1000_v51 = vadd.f32 %v7329_v36, %v957_v34  ;;  %v932_v20 = vmul.f32 %v6511_v37, %v7126_v38  ;;  %v864_v45 = vadd.f32 1e-05, %v828_v2  ;;  %v1413_v59 = vld [vmem:[#allocation2 + $0x31] sm:$0xff]  ;;  %5966 = vmatmul.mubr.msk.f32.gmra.mxu1 %vm472_vm0, %v1430_v10 }
 0x176   : > { %1120 = vst.msk [vmem:[#allocation2 + $0x49] sm:$0xff] %vm472_vm0, %v1037_v33  ;;  %v1019_v49 = vadd.f32 %v7329_v36, %v976_v16  ;;  %v917_v6 = vmul.f32 %v6513_v44, %v7135_v60  ;;  %v849_v43 = vadd.f32 1e-05, %v813_v40  ;;  %5941 = vmatprep.mubr.msk.f32.mxu0 %vm472_vm0, %v1413_v59  ;;  %6455 = vset.pattern.permute.xlu1 %v9197_v0  ;;  %v734_v14 = vpop.xlane.xlu1 %733  ;;  %v788_v13 = vpop.xlane.xlu0 %787  ;;  %v7505_v16 = vld [vmem:[#allocation2 + $0x12] sm:$0xff] }
 0x177   : > { %v1036_v24 = vmax.f32 %v1000_v51, 0.0  ;;  %v975_v38 = vmul.f32 %v7320_v11, %v932_v20  ;;  %6526 = vrsqrt.f32 %v864_v45  ;;  %v812_v27 = vmul.f32 0.25, %v734_v14  ;;  %1316 = vperm.xlu1 %6455, %v7294_v48   ;;  %v7515_v51 = vld [vmem:[#allocation2 + $0x22] sm:$0xff]  ;;  %v7523_v59 = vld [vmem:[#allocation2 + $0x18] sm:$0xff] }
 0x178   : > { %v6515_v18 = vpop.eup %6514  ;;  %v1055_v29 = vmax.f32 %v1019_v49, 0.0  ;;  %v960_v30 = vmul.f32 %v7320_v11, %v917_v6  ;;  %6528 = vrsqrt.f32 %v849_v43  ;;  %v830_v60 = vmul.f32 0.25, %v788_v13  ;;  %v1414_v55 = vld [vmem:[#allocation2 + $0x39] sm:$0xff]  ;;  %v7525_v49 = vld [vmem:[#allocation2 + $0x28] sm:$0xff] }
 0x179   : > { %v6517_v26 = vpop.eup %6516  ;;  %1119 = vst.msk [vmem:[#allocation2 + $0x41] sm:$0xff] %vm472_vm0, %v1036_v24  ;;  %v1018_v5 = vadd.f32 %v7329_v36, %v975_v38  ;;  %v916_v19 = vmul.f32 %v6515_v18, %v7138_v42  ;;  %v848_v62 = vadd.f32 1e-05, %v812_v27  ;;  %5942 = vmatmul.mubr.msk.f32.gmra.mxu0 %vm472_vm0, %v1414_v55  ;;  %v1432_v3 = vld [vmem:[#allocation2 + $0xc9] sm:$0xff] }
 0x17a   : > { %1138 = vst.msk [vmem:[#allocation2 + $0xd9] sm:$0xff] %vm472_vm0, %v1055_v29  ;;  %v1003_v48 = vadd.f32 %v7329_v36, %v960_v30  ;;  %v935_v23 = vmul.f32 %v6517_v26, %v7147_v28  ;;  %v866_v39 = vadd.f32 1e-05, %v830_v60  ;;  %v574_v41 = vpop.xlane.xlu1 %573 }
 0x17b   : > { %v1054_v56 = vmax.f32 %v1018_v5, 0.0  ;;  %v959_v12 = vmul.f32 %v7320_v11, %v916_v19  ;;  %6530 = vrsqrt.f32 %v848_v62  ;;  %v615_v1 = vmul.f32 0.25, %v574_v41  ;;  %1321 = vperm.xlu1 %6455, %v1171_v17   ;;  %v7556_v19 = vld [vmem:[#allocation2 + $0x2a] sm:$0xff] }
 0x17c   : > { %v6519_v21 = vpop.eup %6518  ;;  %v1039_v8 = vmax.f32 %v1003_v48, 0.0  ;;  %v978_v42 = vmul.f32 %v7320_v11, %v935_v23  ;;  %6532 = vrsqrt.f32 %v866_v39  ;;  %v1431_v54 = vld [vmem:[#allocation2 + $0xc1] sm:$0xff]  ;;  %v7564_v41 = vld [vmem:[#allocation2 + $0x30] sm:$0xff] }
 0x17d   : > { %v6521_v7 = vpop.eup %6520  ;;  %1137 = vst.msk [vmem:[#allocation2 + $0xd1] sm:$0xff] %vm472_vm0, %v1054_v56  ;;  %v1002_v22 = vadd.f32 %v7329_v36, %v959_v12  ;;  %v934_v28 = vmul.f32 %v6519_v21, %v7150_v46  ;;  %5968 = vmatprep.mubr.msk.f32.mxu1 %vm472_vm0, %v1431_v54  ;;  %v7501_v37 = vsub.f32 %v7209_v52, %v615_v1  ;;  %v1416_v27 = vld [vmem:[#allocation2 + $0x49] sm:$0xff] }
 0x17e   : > { %1122 = vst.msk [vmem:[#allocation2 + $0x59] sm:$0xff] %vm472_vm0, %v1039_v8  ;;  %v1021_v34 = vadd.f32 %v7329_v36, %v978_v42  ;;  %v919_v2 = vmul.f32 %v6521_v7, %v7159_v47  ;;  %v7503_v33 = vpop.permute.xlu1 %2123  ;;  %5969 = vmatmul.mubr.msk.f32.gmra.mxu1 %vm472_vm0, %v1432_v3  ;;  %v7508_v40 = vpop.permute.xlu0 %1221 }
 0x17f   : > { %v1038_v46 = vmax.f32 %v1002_v22, 0.0  ;;  %v977_v10 = vmul.f32 %v7320_v11, %v934_v28  ;;  %v7513_v44 = vmul.f32 %v7505_v16, %v7503_v33  ;;  %6456 = vset.pattern.permute.xlu1 %v9199_v15  ;;  %v7521_v45 = vmul.f32 %v7515_v51, %v7503_v33 }
 0x180   : > { %v6523_v47 = vpop.eup %6522  ;;  %v1057_v52 = vmax.f32 %v1021_v34, 0.0  ;;  %v962_v20 = vmul.f32 %v7320_v11, %v919_v2  ;;  %2207 = vperm.xlu1 %6456, %v1171_v17   ;;  %v1415_v6 = vld [vmem:[#allocation2 + $0x41] sm:$0xff]  ;;  %v7532_v24 = vmul.f32 %v7523_v59, %v7508_v40  ;;  %v7536_v38 = vmul.f32 %v7525_v49, %v7508_v40 }
 0x181   : > { %9272 = vst [vmem:[#allocation6_spill] sm:$0xff] %v7521_v45  ;;  %v6525_v43 = vpop.eup %6524  ;;  %1121 = vst.msk [vmem:[#allocation2 + $0x51] sm:$0xff] %vm472_vm0, %v1038_v46  ;;  %v1020_v14 = vadd.f32 %v7329_v36, %v977_v10  ;;  %v918_v13 = vmul.f32 %v6523_v47, %v7162_v50  ;;  %5944 = vmatprep.mubr.msk.f32.mxu0 %vm472_vm0, %v1415_v6  ;;  %v7544_v50 = vld [vmem:[#allocation2 + $0x1a] sm:$0xff]  ;;  %v687_v60 = vmul.f32 %v7501_v37, %v7501_v37  ;;  %v7604_v6 = vld [vmem:[#allocation2 + $0x48] sm:$0xff] }
 0x182   : > { %9273 = vst [vmem:[#allocation7_spill] sm:$0xff] %v7536_v38  ;;  %1140 = vst.msk [vmem:[#allocation2 + $0xe9] sm:$0xff] %vm472_vm0, %v1057_v52  ;;  %v1005_v18 = vadd.f32 %v7329_v36, %v962_v20  ;;  %v937_v29 = vmul.f32 %v6525_v43, %v7178_v63  ;;  %v7542_v30 = vpop.permute.xlu1 %2127  ;;  %5945 = vmatmul.mubr.msk.f32.gmra.mxu0 %vm472_vm0, %v1416_v27  ;;  %v7549_v55 = vpop.permute.xlu0 %1236  ;;  %v7570_v8 = vld [vmem:[#allocation2 + $0x40] sm:$0xff]  ;;  %v7602_v20 = vld [vmem:[#allocation2 + $0x38] sm:$0xff] }
 0x183   : > { %v1056_v17 = vmax.f32 %v1020_v14, 0.0  ;;  %v961_v26 = vmul.f32 %v7320_v11, %v918_v13  ;;  %v7554_v5 = vmul.f32 %v7544_v50, %v7542_v30  ;;  %v7561_v23 = vmul.f32 %v7556_v19, %v7542_v30  ;;  %v1434_v28 = vld [vmem:[#allocation2 + $0xd9] sm:$0xff] }
 0x184   : > { %v6527_v63 = vpop.eup %6526  ;;  %v1041_v62 = vmax.f32 %v1005_v18, 0.0  ;;  %v980_v48 = vmul.f32 %v7320_v11, %v937_v29  ;;  %v789_v39 = vsel %vm472_vm0, %v687_v60, 0.0  ;;  %6457 = vset.pattern.permute.xlu1 %v9197_v0  ;;  %v1433_v56 = vld [vmem:[#allocation2 + $0xd1] sm:$0xff]  ;;  %v7574_v42 = vmul.f32 %v7564_v41, %v7549_v55 }
 0x185   : > { %9274 = vst [vmem:[#allocation8_spill] sm:$0xff] %v7561_v23  ;;  %v6529_v12 = vpop.eup %6528  ;;  %1139 = vst.msk [vmem:[#allocation2 + $0xe1] sm:$0xff] %vm472_vm0, %v1056_v17  ;;  %v1004_v1 = vadd.f32 %v7329_v36, %v961_v26  ;;  %v936_v21 = vmul.f32 %v6527_v63, %v7181_v4  ;;  %790 = vadd.xlane.f32.xlu0 %v789_v39  ;;  %v7581_v22 = vmul.f32 %v7570_v8, %v7549_v55  ;;  %v1418_v60 = vld [vmem:[#allocation2 + $0x59] sm:$0xff] }
 0x186   : > { %1124 = vst.msk [vmem:[#allocation2 + $0x69] sm:$0xff] %vm472_vm0, %v1041_v62  ;;  %v1023_v54 = vadd.f32 %v7329_v36, %v980_v48  ;;  %v921_v7 = vmul.f32 %v6529_v12, %v7190_v32  ;;  %1331 = vperm.xlu1 %6457, %v7301_v53   ;;  %5971 = vmatprep.mubr.msk.f32.mxu1 %vm472_vm0, %v1433_v56  ;;  %v7585_v4 = vpop.permute.xlu1 %2131  ;;  %v7587_v3 = vpop.permute.xlu0 %1241  ;;  %v7594_v32 = vld [vmem:[#allocation2 + $0x32] sm:$0xff] }
 0x187   : > { %9275 = vst [vmem:[#allocation9_spill] sm:$0xff] %v7581_v22  ;;  %v1040_v34 = vmax.f32 %v1004_v1, 0.0  ;;  %v979_v2 = vmul.f32 %v7320_v11, %v936_v21  ;;  %v7592_v46 = vmul.f32 %v7515_v51, %v7585_v4  ;;  %5972 = vmatmul.mubr.msk.f32.gmra.mxu1 %vm472_vm0, %v1434_v28  ;;  %v7600_v52 = vmul.f32 %v7594_v32, %v7585_v4 }
 0x188   : > { %v6531_v10 = vpop.eup %6530  ;;  %v1059_v53 = vmax.f32 %v1023_v54, 0.0  ;;  %v964_v47 = vmul.f32 %v7320_v11, %v921_v7  ;;  %v1417_v43 = vld [vmem:[#allocation2 + $0x51] sm:$0xff]  ;;  %v7611_v18 = vmul.f32 %v7602_v20, %v7587_v3  ;;  %v7615_v29 = vmul.f32 %v7604_v6, %v7587_v3 }
 0x189   : > { %9276 = vst [vmem:[#allocation10_spill] sm:$0xff] %v7600_v52  ;;  %v6533_v14 = vpop.eup %6532  ;;  %1123 = vst.msk [vmem:[#allocation2 + $0x61] sm:$0xff] %vm472_vm0, %v1040_v34  ;;  %v1022_v13 = vadd.f32 %v7329_v36, %v979_v2  ;;  %v920_v27 = vmul.f32 %v6531_v10, %v7193_v58  ;;  %5947 = vmatprep.mubr.msk.f32.mxu0 %vm472_vm0, %v1417_v43  ;;  %v7622_v58 = vld [vmem:[#allocation2 + $0x3a] sm:$0xff]  ;;  %v7642_v54 = vld [vmem:[#allocation2 + $0x50] sm:$0xff] }
 0x18a   : > { %9277 = vst [vmem:[#allocation11_spill] sm:$0xff] %v7615_v29  ;;  %1142 = vst.msk [vmem:[#allocation2 + $0xf9] sm:$0xff] %vm472_vm0, %v1059_v53  ;;  %v1007_v17 = vadd.f32 %v7329_v36, %v964_v47  ;;  %v938_v26 = vmul.f32 %v6533_v14, %v7202_v61  ;;  %6458 = vset.pattern.permute.xlu1 %v9199_v15  ;;  %v7624_v63 = vpop.permute.xlu1 %2143  ;;  %5948 = vmatmul.mubr.msk.f32.gmra.mxu0 %vm472_vm0, %v1418_v60  ;;  %v7627_v62 = vpop.permute.xlu0 %1246  ;;  %v7635_v61 = vld [vmem:[#allocation2 + $0x4a] sm:$0xff]  ;;  %v7667_v14 = vld [vmem:[#allocation2 + $0x58] sm:$0xff] }
 0x18b   : > { %v1058_v48 = vmax.f32 %v1022_v13, 0.0  ;;  %v963_v39 = vmul.f32 %v7320_v11, %v920_v27  ;;  %2211 = vperm.xlu1 %6458, %v7252_v9   ;;  %v7633_v56 = vmul.f32 %v7622_v58, %v7624_v63  ;;  %v7640_v21 = vmul.f32 %v7635_v61, %v7624_v63  ;;  %v7728_v45 = vld [vmem:[#allocation2 + $0x52] sm:$0xff] }
 0x18c   : > { %v1043_v12 = vmax.f32 %v1007_v17, 0.0  ;;  %v981_v1 = vmul.f32 %v7320_v11, %v938_v26  ;;  %v1435_v7 = vld [vmem:[#allocation2 + $0xe1] sm:$0xff]  ;;  %v7648_v28 = vmul.f32 %v7570_v8, %v7627_v62  ;;  %v7652_v34 = vmul.f32 %v7642_v54, %v7627_v62  ;;  %v1436_v11 = vld [vmem:[#allocation2 + $0xe9] sm:$0xff] }
 0x18d   : > { %9278 = vst [vmem:[#allocation12_spill] sm:$0xff] %v7633_v56  ;;  %9279 = vst [vmem:[#allocation13_spill] sm:$0xff] %v7640_v21  ;;  %v1006_v9 = vadd.f32 %v7329_v36, %v963_v39  ;;  %5974 = vmatprep.mubr.msk.f32.mxu1 %vm472_vm0, %v1435_v7  ;;  %v1175_v39 = vld [vmem:[%s9194_s6 + $0xc8] sm:$0xff]  ;;  %v1182_v7 = vld [vmem:[#allocation2] sm:$0xff] }
 0x18e   : > { %1141 = vst.msk [vmem:[#allocation2 + $0xf1] sm:$0xff] %vm472_vm0, %v1058_v48  ;;  %9280 = vst [vmem:[#allocation14_spill] sm:$0xff] %v7652_v34  ;;  %v1024_v2 = vadd.f32 %v7329_v36, %v981_v1  ;;  %v7657_v10 = vpop.permute.xlu1 %2151  ;;  %5975 = vmatmul.mubr.msk.f32.gmra.mxu1 %vm472_vm0, %v1436_v11  ;;  %v7660_v53 = vpop.permute.xlu0 %1251  ;;  %v1420_v48 = vld [vmem:[#allocation2 + $0x69] sm:$0xff] }
 0x18f   : > { %1126 = vst.msk [vmem:[#allocation2 + $0x79] sm:$0xff] %vm472_vm0, %v1043_v12  ;;  %v1042_v47 = vmax.f32 %v1006_v9, 0.0  ;;  %6459 = vset.pattern.permute.xlu1 %v9197_v0  ;;  %v7665_v43 = vmul.f32 %v7635_v61, %v7657_v10  ;;  %v7673_v36 = vmul.f32 %v7604_v6, %v7660_v53  ;;  %v7677_v60 = vmul.f32 %v7667_v14, %v7660_v53  ;;  %v1183_v21 = vld [vmem:[#allocation2 + $0x8] sm:$0xff] }
 0x190   : > { %v1060_v13 = vmax.f32 %v1024_v2, 0.0  ;;  %v7669_v27 = vld [vmem:[#allocation2 + $0x5a] sm:$0xff]  ;;  %1336 = vperm.xlu1 %6459, %v7307_v31   ;;  %v7705_v2 = vld [vmem:[#allocation2 + $0x68] sm:$0xff]  ;;  %v1374_v0 = vmul.f32 %v7273_v57, %v1182_v7 }
 0x191   : > { %9281 = vst [vmem:[#allocation15_spill] sm:$0xff] %v7665_v43  ;;  %9282 = vst [vmem:[#allocation16_spill] sm:$0xff] %v7677_v60  ;;  %v1419_v17 = vld [vmem:[#allocation2 + $0x61] sm:$0xff]  ;;  %v7683_v26 = vmul.f32 %v7669_v27, %v7657_v10 }
 0x192   : > { %1125 = vst.msk [vmem:[#allocation2 + $0x71] sm:$0xff] %vm472_vm0, %v1042_v47  ;;  %5950 = vmatprep.mubr.msk.f32.mxu0 %vm472_vm0, %v1419_v17  ;;  %1143 = vst.msk [vmem:[#allocation2 + $0x101] sm:$0xff] %vm472_vm0, %v1060_v13  ;;  %v7690_v12 = vpop.permute.xlu1 %1256  ;;  %v7692_v1 = vld [vmem:[#allocation2 + $0x60] sm:$0xff]  ;;  %v7695_v31 = vpop.permute.xlu0 %1261 }
 0x193   : > { %9283 = vst [vmem:[#allocation17_spill] sm:$0xff] %v7683_v26  ;;  %5951 = vmatmul.mubr.msk.f32.gmra.mxu0 %vm472_vm0, %v1420_v48  ;;  %v7699_v9 = vmul.f32 %v7642_v54, %v7690_v12  ;;  %v7703_v11 = vmul.f32 %v7692_v1, %v7690_v12  ;;  %v7709_v47 = vmul.f32 %v7667_v14, %v7695_v31  ;;  %v1438_v48 = vld [vmem:[#allocation2 + $0xf9] sm:$0xff]  ;;  %v7720_v26 = vld [vmem:[#allocation2 + $0x10] sm:$0xff]  ;;  %v2090_v7 = vld [vmem:[#allocation2 + $0x2] sm:$0xff] }
 0x194   : > { %v7713_v13 = vmul.f32 %v7705_v2, %v7695_v31  ;;  %1341 = vperm.xlu1 %6459, %v1175_v39   ;;  %v2250_v43 = vmul.f32 %v7503_v33, %v2090_v7 }
 0x195   : > { %9284 = vst [vmem:[#allocation18_spill] sm:$0xff] %v7703_v11  ;;  %v1437_v17 = vld [vmem:[#allocation2 + $0xf1] sm:$0xff]  ;;  %v9286_v11 = vmov 1  }
 0x196   : > { %9285 = vst [vmem:[#allocation19_spill] sm:$0xff] %v7713_v13  ;;  %5977 = vmatprep.mubr.msk.f32.mxu1 %vm472_vm0, %v1437_v17  ;;  %v7718_v15 = vpop.permute.xlu0 %1266  ;;  %v7730_v13 = vld [vmem:[#allocation2 + $0x62] sm:$0xff]  ;;  %v1375_v17 = vmul.f32 %v7508_v40, %v1183_v21  ;;  %v7754_v40 = vld [vmem:[#allocation2 + $0x79] sm:$0xff]  ;;  %v1376_v21 = vmul.f32 %v7277_v35, %v7720_v26 }
 0x197   : > { %5978 = vmatmul.mubr.msk.f32.gmra.mxu1 %vm472_vm0, %v1438_v48  ;;  %v7724_v52 = vmul.f32 %v7692_v1, %v7718_v15  ;;  %v7726_v23 = vpop.permute.xlu1 %2155 }
 0x198   : > { %5982 = vmatprep.mubr.msk.f32.mxu1 %vm472_vm0, %v1374_v0  ;;  %6460 = vset.pattern.permute.xlu1 %v9286_v11  ;;  %v7739_v60 = vmul.f32 %v7728_v45, %v7726_v23  ;;  %v7743_v34 = vmul.f32 %v7730_v13, %v7726_v23 }
 0x199   : > { %v7734_v48 = vld [vmem:[#allocation2 + $0x70] sm:$0xff]  ;;  %2223 = vperm.xlu1 %6460, %v1175_v39  }
 0x19a   : > { %9287 = vst [vmem:[#allocation20_spill] sm:$0xff] %v7739_v60  ;;  %9288 = vst [vmem:[#allocation21_spill] sm:$0xff] %v7743_v34  ;;  %v7745_v29 = vld [vmem:[#allocation2 + $0x71] sm:$0xff]  ;;  %v7750_v0 = vmul.f32 %v7734_v48, %v7718_v15  ;;  %v7761_v34 = vpop.permute.xlu0 %1326 }
 0x19b   : > { %5953 = vmatprep.mubr.msk.f32.mxu0 %vm472_vm0, %v7745_v29  ;;  %5983 = vmatmul.mubr.msk.f32.vlgmr.msra.gmra.mxu1 %vm472_vm0, %v1375_v17  ;;  %v7763_v33 = vpop.permute.xlu1 %2159  ;;  %v7765_v7 = vld [vmem:[#allocation2 + $0x6a] sm:$0xff]  ;;  %v1377_v17 = vmul.f32 %v7523_v59, %v7289_v25  ;;  %v1379_v59 = vmul.f32 %v7525_v49, %v7587_v3  ;;  %v1382_v3 = vmul.f32 %v7570_v8, %v7690_v12 }
 0x19c   : > { %9289 = vst [vmem:[#allocation22_spill] sm:$0xff] %v7750_v0  ;;  %5954 = vmatmul.mubr.msk.f32.gmra.mxu0 %vm472_vm0, %v7754_v40  ;;  %5985 = vmatprep.mubr.msk.f32.mxu1 %vm472_vm0, %v1376_v21  ;;  %v2091_v39 = vld [vmem:[#allocation2 + $0xa] sm:$0xff]  ;;  %v1186_v0 = vld [vmem:[#allocation2 + $0x20] sm:$0xff]  ;;  %v7771_v60 = vmul.f32 %v7669_v27, %v7763_v33  ;;  %v7775_v22 = vmul.f32 %v7765_v7, %v7763_v33  ;;  %v9292_v21 = vmov 0  }
 0x19d   : > { %6032 = vmatprep.mubr.msk.f32.mxu0 %vm472_vm0, %v2250_v43  ;;  %v2251_v56 = vmul.f32 %v7542_v30, %v2091_v39  ;;  %v1378_v38 = vmul.f32 %v7549_v55, %v1186_v0  ;;  %6461 = vset.pattern.permute.xlu1 %v9292_v21  ;;  %v2252_v43 = vmul.f32 %v7505_v16, %v7585_v4  ;;  %v7795_v16 = vld [vmem:[#allocation2 + $0x78] sm:$0xff]  ;;  %v6541_v49 = vld [vmem:[%s9194_s6 + $0xd0] sm:$0xff] }
 0x19e   : > { %9290 = vst [vmem:[#allocation23_spill] sm:$0xff] %v7771_v60  ;;  %9291 = vst [vmem:[#allocation24_spill] sm:$0xff] %v7775_v22  ;;  %v6540_v60 = vld [vmem:[%s9194_s6 + $0xd8] sm:$0xff]  ;;  %v7788_v22 = vpop.permute.xlu0 %1346  ;;  %v1380_v55 = vmul.f32 %v7564_v41, %v7627_v62  ;;  %v1381_v41 = vmul.f32 %v7602_v20, %v7660_v53  ;;  %v1383_v8 = vmul.f32 %v7604_v6, %v7695_v31  ;;  %v6542_v53 = vld [vmem:[%s9194_s6 + $0xe0] sm:$0xff] }
 0x19f   : > { %1351 = vperm.xlu1 %6461, %v6540_v60   ;;  %5986 = vmatmul.mubr.msk.f32.gmra.mxu1 %vm472_vm0, %v1377_v17  ;;  %v1179_v6 = vld [vmem:[%s9194_s6 + $0xe8] sm:$0xff] }
 0x1a0   : > { %6033 = vmatmul.mubr.msk.f32.vlgmr.msra.gmra.mxu0 %vm472_vm0, %v2251_v56  ;;  %5988 = vmatprep.mubr.msk.f32.mxu1 %vm472_vm0, %v1378_v38  ;;  %v1272_v30 = vpop.permute.xlu1 %1271  ;;  %v7819_v56 = vld [vmem:[#allocation2 + $0x72] sm:$0xff] }
 0x1a1   : > { %6035 = vmatprep.mubr.msk.f32.mxu0 %vm472_vm0, %v2252_v43  ;;  %v7800_v4 = vmul.f32 %v7705_v2, %v1272_v30  ;;  %v7803_v60 = vmul.f32 %v7795_v16, %v1272_v30 }
 0x1a2   : > { %v7807_v38 = vpop.permute.xlu0 %1366 }
 0x1a3   : > { %9293 = vst [vmem:[#allocation25_spill] sm:$0xff] %v7803_v60  ;;  %6462 = vset.pattern.permute.xlu1 %v9286_v11  ;;  %5989 = vmatmul.mubr.msk.f32.gmra.mxu1 %vm472_vm0, %v1379_v59  ;;  %9294 = vst [vmem:[#allocation26_spill] sm:$0xff] %v7807_v38  ;;  %v1384_v59 = vmul.f32 %v7642_v54, %v7718_v15  ;;  %v1385_v54 = vmul.f32 %v7667_v14, %v1272_v30 }
 0x1a4   : > { %2227 = vperm.xlu1 %6462, %v6541_v49   ;;  %5991 = vmatprep.mubr.msk.f32.mxu1 %vm472_vm0, %v1380_v55  ;;  %v7846_v49 = vld [vmem:[#allocation2 + $0x7a] sm:$0xff] }
 0x1a5   : > { %v7817_v62 = vpop.permute.xlu1 %2163 }
 0x1a6   : > { %v7823_v0 = vmul.f32 %v7730_v13, %v7817_v62  ;;  %v7827_v39 = vmul.f32 %v7819_v56, %v7817_v62 }
 0x1a7   : > { %5992 = vmatmul.mubr.msk.f32.gmra.mxu1 %vm472_vm0, %v1381_v41  ;;  %v2136_v20 = vpop.permute.xlu0 %2135  ;;  %v2098_v41 = vld [vmem:[#allocation2 + $0x42] sm:$0xff] }
 0x1a8   : > { %9295 = vst [vmem:[#allocation27_spill] sm:$0xff] %v7827_v39  ;;  %6463 = vset.pattern.permute.xlu1 %v9292_v21  ;;  %5994 = vmatprep.mubr.msk.f32.mxu1 %vm472_vm0, %v1382_v3  ;;  %v2253_v12 = vmul.f32 %v7544_v50, %v2136_v20  ;;  %v7839_v17 = vmul.f32 %v7556_v19, %v2136_v20  ;;  %v7869_v39 = vld [vmem:[#allocation2 + $0x80] sm:$0xff] }
 0x1a9   : > { %1356 = vperm.xlu1 %6463, %v6542_v53   ;;  %v7842_v43 = vmul.f32 %v7622_v58, %v2136_v20  ;;  %v2168_v55 = vpop.permute.xlu1 %2167 }
 0x1aa   : > { %v7852_v31 = vmul.f32 %v7765_v7, %v2168_v55  ;;  %v7855_v50 = vmul.f32 %v7846_v49, %v2168_v55  ;;  %6036 = vmatmul.mubr.msk.f32.gmra.mxu0 %vm472_vm0, %v2253_v12 }
 0x1ab   : > { %9296 = vst [vmem:[#allocation28_spill] sm:$0xff] %v7842_v43  ;;  %5995 = vmatmul.mubr.msk.f32.gmra.mxu1 %vm472_vm0, %v1383_v8  ;;  %v2140_v15 = vpop.permute.xlu0 %2139 }
 0x1ac   : > { %9297 = vst [vmem:[#allocation29_spill] sm:$0xff] %v7852_v31  ;;  %9298 = vst [vmem:[#allocation30_spill] sm:$0xff] %v7855_v50  ;;  %5997 = vmatprep.mubr.msk.f32.mxu1 %vm472_vm0, %v1384_v59  ;;  %v2254_v3 = vmul.f32 %v7515_v51, %v2140_v15  ;;  %v7863_v20 = vmul.f32 %v7594_v32, %v2140_v15  ;;  %v7865_v53 = vmul.f32 %v2140_v15, %v2098_v41 }
 0x1ad   : > { %1361 = vperm.xlu1 %6463, %v1179_v6   ;;  %v2255_v50 = vmul.f32 %v7556_v19, %v7624_v63  ;;  %v2258_v15 = vmul.f32 %v7726_v23, %v2098_v41 }
 0x1ae   : > { %9299 = vst [vmem:[#allocation31_spill] sm:$0xff] %v7865_v53  ;;  %v1277_v8 = vpop.permute.xlu1 %1276  ;;  %6038 = vmatprep.mubr.msk.f32.mxu0 %vm472_vm0, %v2254_v3 }
 0x1af   : > { %5998 = vmatmul.mubr.msk.f32.gmra.mxu1 %vm472_vm0, %v1385_v54  ;;  %v1386_v14 = vmul.f32 %v7692_v1, %v1277_v8  ;;  %v7875_v30 = vmul.f32 %v7734_v48, %v1277_v8  ;;  %v7878_v51 = vmul.f32 %v7869_v39, %v1277_v8  ;;  %6039 = vmatmul.mubr.msk.f32.gmra.mxu0 %vm472_vm0, %v2255_v50  ;;  %v2148_v12 = vpop.permute.xlu0 %2147  ;;  %v7892_v54 = vld [vmem:[#allocation2 + $0x88] sm:$0xff] }
 0x1b0   : > { %v2256_v19 = vmul.f32 %v7594_v32, %v2148_v12  ;;  %v7883_v63 = vmul.f32 %v2148_v12, %v2098_v41  ;;  %v7886_v59 = vmul.f32 %v7728_v45, %v2148_v12  ;;  %v2257_v1 = vmul.f32 %v7622_v58, %v7657_v10  ;;  %v7903_v58 = vld [vmem:[#allocation2 + $0x82] sm:$0xff]  ;;  %v7905_v10 = vld [vmem:[#allocation2 + $0x92] sm:$0xff] }
 0x1b1   : > { %9300 = vst [vmem:[#allocation32_spill] sm:$0xff] %v7878_v51  ;;  %6464 = vset.pattern.permute.xlu1 %v9286_v11  ;;  %6000 = vmatprep.mubr.msk.f32.mxu1 %vm472_vm0, %v1386_v14  ;;  %v5418_v14 = vld [vmem:[%s9193_s5 + $0xc] sm:$0xf]  ;;  %v2260_v12 = vmul.f32 %v7728_v45, %v7817_v62  ;;  %v2261_v45 = vmul.f32 %v7669_v27, %v2168_v55  ;;  %v6544_v62 = vld [vmem:[%s9194_s6 + $0xf0] sm:$0xff] }
 0x1b2   : > { %9301 = vst [vmem:[#allocation33_spill] sm:$0xff] %v7886_v59  ;;  %2239 = vperm.xlu1 %6464, %v1179_v6   ;;  %v1282_v50 = vpop.permute.xlu1 %1281  ;;  %6041 = vmatprep.mubr.msk.f32.mxu0 %vm472_vm0, %v2256_v19  ;;  %v6543_v19 = vld [vmem:[%s9194_s6 + $0xf8] sm:$0xff]  ;;  %v5452_v27 = vld [vmem:[%s9193_s5 + $0x10] sm:$0xf]  ;;  %v7999_v59 = vld [vmem:[%s7415_s19] sm:$0xff] }
 0x1b3   : > { %v1387_v32 = vmul.f32 %v7705_v2, %v1282_v50  ;;  %v7897_v3 = vmul.f32 %v7795_v16, %v1282_v50  ;;  %v7900_v8 = vmul.f32 %v7892_v54, %v1282_v50  ;;  %6042 = vmatmul.mubr.msk.f32.gmra.mxu0 %vm472_vm0, %v2257_v1  ;;  %v2180_v23 = vpop.permute.xlu0 %2179  ;;  %v2259_v2 = vmul.f32 %v7635_v61, %v7763_v33  ;;  %v4699_v50 = vld [vmem:[#allocation2 + $0x8a] sm:$0xff] }
 0x1b4   : > { %v7908_v6 = vmul.f32 %v7903_v58, %v2180_v23  ;;  %v7911_v41 = vmul.f32 %v7905_v10, %v2180_v23  ;;  %6044 = vmatprep.mubr.msk.f32.mxu0 %vm472_vm0, %v2258_v15  ;;  %6080 = vmatprep.subr.msk.mxu1 %vm1537_vm1, %v5418_v14 }
 0x1b5   : > { %9302 = vst [vmem:[#allocation34_spill] sm:$0xff] %v7900_v8  ;;  %6001 = vmatmul.mubr.msk.f32.gmra.mxu1 %vm472_vm0, %v1387_v32  ;;  %6130 = vmatprep.subr.msk.mxu0 %vm1537_vm1, %v5452_v27 }
 0x1b6   : > { %9303 = vst [vmem:[#allocation35_spill] sm:$0xff] %v7908_v6  ;;  %9304 = vst [vmem:[#allocation36_spill] sm:$0xff] %v7911_v41  ;;  %6466 = vset.pattern.permute.xlu1 %v9292_v21  ;;  %6081 = vmatpush3.msk.msra.mxu1 %vm1537_vm1, %v5418_v14  ;;  %v3891_v41 = vld [vmem:[#allocation2 + $0xa8] sm:$0xff] }
 0x1b7   : > { %1371 = vperm.xlu1 %6466, %v6543_v19   ;;  %v2172_v1 = vpop.permute.xlu1 %2171  ;;  %6045 = vmatmul.mubr.msk.f32.gmra.mxu0 %vm472_vm0, %v2259_v2 }
 0x1b8   : > { %v7930_v61 = vmul.f32 %v7819_v56, %v2172_v1  ;;  %v7933_v33 = vmul.f32 %v7903_v58, %v2172_v1  ;;  %6047 = vmatprep.mubr.msk.f32.mxu0 %vm472_vm0, %v2260_v12  ;;  %v2262_v21 = vmul.f32 %v7730_v13, %v2172_v1  ;;  %6131 = vmatpush3.msk.msra.mxu0 %vm1537_vm1, %v5452_v27 }
 0x1ba   : > { %9305 = vst [vmem:[#allocation37_spill] sm:$0xff] %v7930_v61  ;;  %9306 = vst [vmem:[#allocation38_spill] sm:$0xff] %v7933_v33  ;;  %v8227_v61 = vld [vmem:[#allocation2 + $0xfa] sm:$0xff] }
 0x1bb   : > { %6467 = vset.pattern.permute.xlu1 %v9286_v11  ;;  %v2176_v15 = vpop.permute.xlu1 %2175  ;;  %6048 = vmatmul.mubr.msk.f32.gmra.mxu0 %vm472_vm0, %v2261_v45  ;;  %v2264_v11 = vmul.f32 %v7819_v56, %v2180_v23  ;;  %v3889_v45 = vld [vmem:[#allocation2 + $0x98] sm:$0xff] }
 0x1bc   : > { %2243 = vperm.xlu1 %6467, %v6544_v62   ;;  %v2263_v32 = vmul.f32 %v7765_v7, %v2176_v15  ;;  %v7945_v2 = vmul.f32 %v7846_v49, %v2176_v15  ;;  %v7947_v14 = vmul.f32 %v4699_v50, %v2176_v15  ;;  %6050 = vmatprep.mubr.msk.f32.mxu0 %vm472_vm0, %v2262_v21  ;;  %v3888_v7 = vld [vmem:[#allocation2 + $0x90] sm:$0xff] }
 0x1be   : > { %9307 = vst [vmem:[#allocation39_spill] sm:$0xff] %v7945_v2  ;;  %9308 = vst [vmem:[#allocation40_spill] sm:$0xff] %v7947_v14 }
 0x1bf   : > { %6051 = vmatmul.mubr.msk.f32.gmra.mxu0 %vm472_vm0, %v2263_v32 }
 0x1c0   : > { %v1287_v13 = vpop.permute.xlu1 %1286  ;;  %6053 = vmatprep.mubr.msk.f32.mxu0 %vm472_vm0, %v2264_v11 }
 0x1c1   : > { %v1388_v55 = vmul.f32 %v7734_v48, %v1287_v13  ;;  %v7960_v12 = vmul.f32 %v7869_v39, %v1287_v13  ;;  %v7962_v19 = vmul.f32 %v3888_v7, %v1287_v13  ;;  %v4701_v48 = vld [vmem:[#allocation2 + $0x9a] sm:$0xff] }
 0x1c2   : > { %v3890_v13 = vld [vmem:[#allocation2 + $0xa0] sm:$0xff] }
 0x1c3   : > { %9309 = vst [vmem:[#allocation41_spill] sm:$0xff] %v7962_v19  ;;  %6003 = vmatprep.mubr.msk.f32.mxu1 %vm472_vm0, %v1388_v55 }
 0x1c4   : > { %v1292_v1 = vpop.permute.xlu1 %1291 }
 0x1c5   : > { %v1389_v56 = vmul.f32 %v7795_v16, %v1292_v1  ;;  %v7967_v23 = vmul.f32 %v7892_v54, %v1292_v1  ;;  %v7969_v21 = vmul.f32 %v3889_v45, %v1292_v1 }
 0x1c7   : > { %9310 = vst [vmem:[#allocation42_spill] sm:$0xff] %v7969_v21  ;;  %6004 = vmatmul.mubr.msk.f32.gmra.mxu1 %vm472_vm0, %v1389_v56 }
 0x1c9   : > { %v2184_v62 = vpop.permute.xlu1 %2183 }
 0x1ca   : > { %v2265_v15 = vmul.f32 %v7846_v49, %v2184_v62  ;;  %v7973_v32 = vmul.f32 %v4699_v50, %v2184_v62  ;;  %v7975_v27 = vmul.f32 %v4701_v48, %v2184_v62 }
 0x1cc   : > { %9311 = vst [vmem:[#allocation43_spill] sm:$0xff] %v7973_v32  ;;  %9312 = vst [vmem:[#allocation44_spill] sm:$0xff] %v7975_v27  ;;  %6054 = vmatmul.mubr.msk.f32.gmra.mxu0 %vm472_vm0, %v2265_v15  ;;  %v7990_v15 = vpop.permute.xlu0 %2203  ;;  %v8079_v32 = vld [vmem:[%s9193_s5 + $0x18] sm:$0xf] }
 0x1cd   : > { %9315 = vst [vmem:[#allocation47_spill] sm:$0xff] %v7990_v15  ;;  %6230 = vmatprep.subr.msk.mxu0 %vm1537_vm1, %v8079_v32 }
 0x1ce   : > { %v1297_v11 = vpop.permute.xlu1 %1296 }
 0x1cf   : > { %v1390_v16 = vmul.f32 %v7869_v39, %v1297_v11  ;;  %v7979_v55 = vmul.f32 %v3888_v7, %v1297_v11  ;;  %v7981_v1 = vmul.f32 %v3890_v13, %v1297_v11  ;;  %v2110_v39 = vld [vmem:[#allocation2 + $0xa2] sm:$0xff] }
 0x1d0   : > { %v8002_v53 = vpop.permute.xlu0 %2215  ;;  %v2270_v8 = vmul.f32 %v7990_v15, %v2110_v39  ;;  %v6545_v15 = vld [vmem:[%s7415_s19 + $0x8] sm:$0xff] }
 0x1d1   : > { %9313 = vst [vmem:[#allocation45_spill] sm:$0xff] %v7981_v1  ;;  %6006 = vmatprep.mubr.msk.f32.mxu1 %vm472_vm0, %v1390_v16  ;;  %9318 = vst [vmem:[#allocation50_spill] sm:$0xff] %v8002_v53 }
 0x1d2   : > { %v1302_v56 = vpop.permute.xlu1 %1301 }
 0x1d3   : > { %v1391_v49 = vmul.f32 %v7892_v54, %v1302_v56  ;;  %v7985_v14 = vmul.f32 %v3889_v45, %v1302_v56  ;;  %v7987_v62 = vmul.f32 %v3891_v41, %v1302_v56  ;;  %v4703_v56 = vld [vmem:[#allocation2 + $0xaa] sm:$0xff] }
 0x1d4   : > { %v8017_v1 = vpop.permute.xlu0 %2219 }
 0x1d5   : > { %9314 = vst [vmem:[#allocation46_spill] sm:$0xff] %v7987_v62  ;;  %6007 = vmatmul.mubr.msk.f32.gmra.mxu1 %vm472_vm0, %v1391_v49  ;;  %9322 = vst [vmem:[#allocation54_spill] sm:$0xff] %v8017_v1 }
 0x1d7   : > { %v2188_v27 = vpop.permute.xlu1 %2187 }
 0x1d8   : > { %v2266_v33 = vmul.f32 %v7903_v58, %v2188_v27  ;;  %v7994_v11 = vmul.f32 %v7905_v10, %v2188_v27  ;;  %v7996_v16 = vmul.f32 %v2188_v27, %v2110_v39  ;;  %v575_v58 = vsel %vm472_vm0, %v7999_v59, 0.0 }
 0x1da   : > { %9316 = vst [vmem:[#allocation48_spill] sm:$0xff] %v7994_v11  ;;  %9317 = vst [vmem:[#allocation49_spill] sm:$0xff] %v7996_v16  ;;  %6056 = vmatprep.mubr.msk.f32.mxu0 %vm472_vm0, %v2266_v33 }
 0x1db   : > { %v2192_v54 = vpop.permute.xlu1 %2191 }
 0x1dc   : > { %v2267_v49 = vmul.f32 %v4699_v50, %v2192_v54  ;;  %v8004_v43 = vmul.f32 %v4701_v48, %v2192_v54  ;;  %v8006_v62 = vmul.f32 %v4703_v56, %v2192_v54  ;;  %v3893_v54 = vld [vmem:[#allocation2 + $0xb8] sm:$0xff] }
 0x1de   : > { %9319 = vst [vmem:[#allocation51_spill] sm:$0xff] %v8004_v43  ;;  %9320 = vst [vmem:[#allocation52_spill] sm:$0xff] %v8006_v62  ;;  %6057 = vmatmul.mubr.msk.f32.gmra.mxu0 %vm472_vm0, %v2267_v49  ;;  %v8025_v49 = vpop.permute.xlu0 %2231 }
 0x1df   : > { %9324 = vst [vmem:[#allocation56_spill] sm:$0xff] %v8025_v49 }
 0x1e0   : > { %576 = vadd.xlane.f32.xlu1 %v575_v58  ;;  %v8011_v27 = vpop.permute.xlu1 %1306 }
 0x1e1   : > { %9321 = vst [vmem:[#allocation53_spill] sm:$0xff] %v8011_v27  ;;  %v1392_v16 = vmul.f32 %v3888_v7, %v8011_v27  ;;  %v8015_v33 = vmul.f32 %v3890_v13, %v8011_v27 }
 0x1e2   : > { %v8035_v19 = vpop.permute.xlu0 %2235 }
 0x1e3   : > { %6009 = vmatprep.mubr.msk.f32.mxu1 %vm472_vm0, %v1392_v16  ;;  %v2113_v16 = vld [vmem:[#allocation2 + $0xba] sm:$0xff]  ;;  %9327 = vst [vmem:[#allocation59_spill] sm:$0xff] %v8035_v19 }
 0x1e4   : > { %v1312_v50 = vpop.permute.xlu1 %1311 }
 0x1e5   : > { %v1393_v62 = vmul.f32 %v3889_v45, %v1312_v50  ;;  %v8020_v21 = vmul.f32 %v3891_v41, %v1312_v50  ;;  %v8022_v43 = vmul.f32 %v3893_v54, %v1312_v50 }
 0x1e7   : > { %9323 = vst [vmem:[#allocation55_spill] sm:$0xff] %v8022_v43  ;;  %6010 = vmatmul.mubr.msk.f32.gmra.mxu1 %vm472_vm0, %v1393_v62 }
 0x1e9   : > { %v8027_v58 = vpop.permute.xlu1 %2195 }
 0x1ea   : > { %9325 = vst [vmem:[#allocation57_spill] sm:$0xff] %v8027_v58  ;;  %v2268_v7 = vmul.f32 %v7905_v10, %v8027_v58  ;;  %v8032_v27 = vmul.f32 %v8027_v58, %v2110_v39  ;;  %v8055_v39 = vld [vmem:[#allocation2 + $0xb0] sm:$0xff] }
 0x1ec   : > { %9326 = vst [vmem:[#allocation58_spill] sm:$0xff] %v8032_v27  ;;  %6059 = vmatprep.mubr.msk.f32.mxu0 %vm472_vm0, %v2268_v7  ;;  %v8047_v7 = vpop.permute.xlu0 %2247  ;;  %v3895_v27 = vld [vmem:[#allocation2 + $0xc8] sm:$0xff] }
 0x1ed   : > { %v2200_v45 = vpop.permute.xlu1 %2199  ;;  %9330 = vst [vmem:[#allocation62_spill] sm:$0xff] %v8047_v7 }
 0x1ee   : > { %v2269_v50 = vmul.f32 %v4701_v48, %v2200_v45  ;;  %v8037_v43 = vmul.f32 %v4703_v56, %v2200_v45  ;;  %v8039_v62 = vmul.f32 %v2200_v45, %v2113_v16  ;;  %v8053_v45 = vld [vmem:[%s9193_s5 + $0x14] sm:$0xf] }
 0x1ef   : > { %6180 = vmatprep.subr.msk.mxu1 %vm1537_vm1, %v8053_v45 }
 0x1f0   : > { %9328 = vst [vmem:[#allocation60_spill] sm:$0xff] %v8037_v43  ;;  %9329 = vst [vmem:[#allocation61_spill] sm:$0xff] %v8039_v62  ;;  %6060 = vmatmul.mubr.msk.f32.gmra.mxu0 %vm472_vm0, %v2269_v50 }
 0x1f1   : > { %6062 = vmatprep.mubr.msk.f32.mxu0 %vm472_vm0, %v2270_v8 }
 0x1f2   : > { %v8044_v10 = vpop.permute.xlu1 %1316 }
 0x1f3   : > { %v1394_v58 = vmul.f32 %v3890_v13, %v8044_v10  ;;  %v1396_v13 = vmul.f32 %v7761_v34, %v8055_v39 }
 0x1f5   : > { %6012 = vmatprep.mubr.msk.f32.mxu1 %vm472_vm0, %v1394_v58 }
 0x1f6   : > { %v1322_v48 = vpop.permute.xlu1 %1321 }
 0x1f7   : > { %v1395_v50 = vmul.f32 %v3891_v41, %v1322_v48  ;;  %v8057_v8 = vmul.f32 %v3893_v54, %v1322_v48  ;;  %v8059_v62 = vmul.f32 %v3895_v27, %v1322_v48 }
 0x1f8   : > { %v580_v58 = vpop.xlane.xlu0 %579 }
 0x1f9   : > { %9331 = vst [vmem:[#allocation63_spill] sm:$0xff] %v8059_v62  ;;  %v617_v43 = vmul.f32 0.25, %v580_v58  ;;  %6013 = vmatmul.mubr.msk.f32.gmra.mxu1 %vm472_vm0, %v1395_v50 }
 0x1fa   : > { %6015 = vmatprep.mubr.msk.f32.mxu1 %vm472_vm0, %v1396_v13 }
 0x1fb   : > { %v8068_v11 = vsub.f32 %v6545_v15, %v617_v43  ;;  %v8070_v41 = vpop.permute.xlu1 %2207 }
 0x1fc   : > { %9333 = vst [vmem:[#allocation65_spill] sm:$0xff] %v8070_v41  ;;  %v2271_v48 = vmul.f32 %v4703_v56, %v8070_v41  ;;  %v8074_v62 = vmul.f32 %v8070_v41, %v2113_v16  ;;  %v3897_v56 = vld [vmem:[#allocation2 + $0xd8] sm:$0xff] }
 0x1fd   : > { %9332 = vst [vmem:[#allocation64_spill] sm:$0xff] %v8068_v11  ;;  %v689_v50 = vmul.f32 %v8068_v11, %v8068_v11 }
 0x1fe   : > { %9334 = vst [vmem:[#allocation66_spill] sm:$0xff] %v8074_v62  ;;  %6063 = vmatmul.mubr.msk.f32.gmra.mxu0 %vm472_vm0, %v2271_v48  ;;  %v8092_v62 = vld [vmem:[#allocation2 + $0xb2] sm:$0xff]  ;;  %v8098_v48 = vld [vmem:[#allocation2 + $0xc2] sm:$0xff] }
 0x1ff   : > { %v795_v43 = vsel %vm472_vm0, %v689_v50, 0.0  ;;  %9336 = vst [vmem:[#allocation68_spill] sm:$0xff] %v8092_v62  ;;  %9338 = vst [vmem:[#allocation70_spill] sm:$0xff] %v8098_v48  ;;  %v2273_v50 = vmul.f32 %v8002_v53, %v2113_v16 }
 0x200   : > { %796 = vadd.xlane.f32.xlu0 %v795_v43  ;;  %v8105_v43 = vld [vmem:[#allocation2 + $0xc0] sm:$0xff] }
 0x201   : > { %v1332_v15 = vpop.permute.xlu1 %1331 }
 0x202   : > { %v1397_v13 = vmul.f32 %v3893_v54, %v1332_v15  ;;  %v8087_v58 = vmul.f32 %v3895_v27, %v1332_v15  ;;  %v8089_v41 = vmul.f32 %v3897_v56, %v1332_v15  ;;  %v2274_v54 = vmul.f32 %v8098_v48, %v8017_v1  ;;  %v8114_v48 = vld [vmem:[#allocation2 + $0xd0] sm:$0xff] }
 0x204   : > { %9335 = vst [vmem:[#allocation67_spill] sm:$0xff] %v8089_v41  ;;  %6016 = vmatmul.mubr.msk.f32.gmra.mxu1 %vm472_vm0, %v1397_v13  ;;  %v9339_v13 = vmov 0.0  }
 0x205   : > { %1107 = vst.msk [vmem:[#allocation2 + $0x120] sm:$0x3] %vm1106_vm2, %v9339_v13 }
 0x206   : > { %v8094_v11 = vpop.permute.xlu1 %2211 }
 0x207   : > { %9337 = vst [vmem:[#allocation69_spill] sm:$0xff] %v8094_v11  ;;  %v2272_v51 = vmul.f32 %v8092_v62, %v8094_v11 }
 0x209   : > { %6065 = vmatprep.mubr.msk.f32.mxu0 %vm472_vm0, %v2272_v51  ;;  %v3899_v51 = vld [vmem:[#allocation2 + $0xe8] sm:$0xff] }
 0x20a   : > { %6066 = vmatmul.mubr.msk.f32.gmra.mxu0 %vm472_vm0, %v2273_v50 }
 0x20b   : > { %v8107_v15 = vpop.permute.xlu1 %1336  ;;  %6068 = vmatprep.mubr.msk.f32.mxu0 %vm472_vm0, %v2274_v54  ;;  %v1400_v54 = vmul.f32 %v8114_v48, %v7788_v22 }
 0x20c   : > { %v1398_v41 = vmul.f32 %v8105_v43, %v8107_v15 }
 0x20e   : > { %v791_v16 = vpop.xlane.xlu0 %790  ;;  %6018 = vmatprep.mubr.msk.f32.mxu1 %vm472_vm0, %v1398_v41  ;;  %v8124_v41 = vld [vmem:[#allocation2 + $0xca] sm:$0xff] }
 0x20f   : > { %v831_v1 = vmul.f32 0.25, %v791_v16  ;;  %v1342_v53 = vpop.permute.xlu1 %1341  ;;  %9341 = vst [vmem:[#allocation72_spill] sm:$0xff] %v8124_v41 }
 0x210   : > { %v1399_v50 = vmul.f32 %v3895_v27, %v1342_v53  ;;  %v8116_v11 = vmul.f32 %v3897_v56, %v1342_v53  ;;  %v8118_v62 = vmul.f32 %v3899_v51, %v1342_v53 }
 0x211   : > { %v867_v13 = vadd.f32 1e-05, %v831_v1 }
 0x212   : > { %9340 = vst [vmem:[#allocation71_spill] sm:$0xff] %v8118_v62  ;;  %6019 = vmatmul.mubr.msk.f32.gmra.mxu1 %vm472_vm0, %v1399_v50  ;;  %v8131_v62 = vld [vmem:[#allocation2 + $0xf8] sm:$0xff] }
 0x213   : > { %6534 = vrsqrt.f32 %v867_v13  ;;  %6021 = vmatprep.mubr.msk.f32.mxu1 %vm472_vm0, %v1400_v54  ;;  %v8139_v50 = vld [vmem:[#allocation2 + $0xd2] sm:$0xff]  ;;  %v8143_v13 = vld [vmem:[#allocation2 + $0xda] sm:$0xff] }
 0x214   : > { %v8126_v16 = vpop.permute.xlu1 %2223  ;;  %9344 = vst [vmem:[#allocation75_spill] sm:$0xff] %v8139_v50  ;;  %9346 = vst [vmem:[#allocation77_spill] sm:$0xff] %v8143_v13 }
 0x215   : > { %9342 = vst [vmem:[#allocation73_spill] sm:$0xff] %v8126_v16  ;;  %v2275_v27 = vmul.f32 %v8124_v41, %v8126_v16  ;;  %v8147_v41 = vld [vmem:[#allocation2 + $0xe2] sm:$0xff] }
 0x216   : > { %9347 = vst [vmem:[#allocation78_spill] sm:$0xff] %v8147_v41 }
 0x217   : > { %6069 = vmatmul.mubr.msk.f32.gmra.mxu0 %vm472_vm0, %v2275_v27 }
 0x21a   : > { %v1352_v53 = vpop.permute.xlu1 %1351 }
 0x21b   : > { %v1401_v60 = vmul.f32 %v3897_v56, %v1352_v53  ;;  %v8133_v6 = vmul.f32 %v3899_v51, %v1352_v53  ;;  %v8136_v1 = vmul.f32 %v8131_v62, %v1352_v53  ;;  %v2277_v56 = vmul.f32 %v8143_v13, %v8025_v49 }
 0x21c   : > { %v2278_v53 = vmul.f32 %v8147_v41, %v8035_v19 }
 0x21d   : > { %9343 = vst [vmem:[#allocation74_spill] sm:$0xff] %v8136_v1  ;;  %6022 = vmatmul.mubr.msk.f32.gmra.mxu1 %vm472_vm0, %v1401_v60  ;;  %v8156_v1 = vld [vmem:[#allocation2 + $0xe0] sm:$0xff] }
 0x21f   : > { %v8141_v54 = vpop.permute.xlu1 %2227 }
 0x220   : > { %9345 = vst [vmem:[#allocation76_spill] sm:$0xff] %v8141_v54  ;;  %v2276_v27 = vmul.f32 %v8139_v50, %v8141_v54  ;;  %v6535_v16 = vpop.eup %6534  ;;  %v8161_v54 = vld [vmem:[%s9191_s3] ss:$0 sm:$0xff]  ;;  %v8197_v13 = vpop.f32.mrf.mxu0 }
 0x221   : > { %v939_v60 = vmul.f32 %v6535_v16, %v7501_v37  ;;  %9348 = vst [vmem:[#allocation79_spill] sm:$0xff] %v8161_v54  ;;  %v8172_v16 = vld [vmem:[%s9192_s4] ss:$0 sm:$0xff]  ;;  %v8184_v41 = vpop.f32.mrf.mxu1 }
 0x222   : > { %6071 = vmatprep.mubr.msk.f32.mxu0 %vm472_vm0, %v2276_v27  ;;  %9349 = vst [vmem:[#allocation80_spill] sm:$0xff] %v8172_v16  ;;  %9350 = vst [vmem:[#allocation81_spill] sm:$0xff] %v8184_v41 }
 0x223   : > { %6072 = vmatmul.mubr.msk.f32.gmra.mxu0 %vm472_vm0, %v2277_v56  ;;  %v982_v50 = vmul.f32 %v8161_v54, %v939_v60  ;;  %v8178_v60 = vld [vmem:[#allocation2 + $0xf0] sm:$0xff] }
 0x224   : > { %v8164_v2 = vpop.permute.xlu1 %1356  ;;  %6074 = vmatprep.mubr.msk.f32.mxu0 %vm472_vm0, %v2278_v53  ;;  %v1404_v53 = vmul.f32 %v8178_v60, %v7807_v38 }
 0x225   : > { %v1402_v37 = vmul.f32 %v8156_v1, %v8164_v2  ;;  %v1025_v27 = vadd.f32 %v8172_v16, %v982_v50  ;;  %v8188_v50 = vld [vmem:[#allocation2 + $0xea] sm:$0xff] }
 0x226   : > { %9351 = vst [vmem:[#allocation82_spill] sm:$0xff] %v8188_v50 }
 0x227   : > { %6024 = vmatprep.mubr.msk.f32.mxu1 %vm472_vm0, %v1402_v37  ;;  %v1061_v56 = vmax.f32 %v1025_v27, 0.0  ;;  %v8192_v27 = vpop.f32.mrf.mxu1 }
 0x228   : > { %v8176_v19 = vpop.permute.xlu1 %1361  ;;  %9353 = vst [vmem:[#allocation84_spill] sm:$0xff] %v8192_v27 }
 0x229   : > { %v1403_v49 = vmul.f32 %v3899_v51, %v8176_v19  ;;  %1144 = vst.msk [vmem:[#allocation2 + $0x109] sm:$0xff] %vm472_vm0, %v1061_v56  ;;  %v8201_v16 = vpop.f32.mrf.mxu1 }
 0x22a   : > { %9354 = vst [vmem:[#allocation85_spill] sm:$0xff] %v8201_v16  ;;  %v8221_v16 = vld [vmem:[#allocation2 + $0xf2] sm:$0xff] }
 0x22b   : > { %6025 = vmatmul.mubr.msk.f32.gmra.mxu1 %vm472_vm0, %v1403_v49  ;;  %v8218_v54 = vpop.f32.mrf.mxu1  ;;  %9359 = vst [vmem:[#allocation90_spill] sm:$0xff] %v8221_v16 }
 0x22c   : > { %6027 = vmatprep.mubr.msk.f32.mxu1 %vm472_vm0, %v1404_v53  ;;  %9358 = vst [vmem:[#allocation89_spill] sm:$0xff] %v8218_v54  ;;  %v2281_v54 = vmul.f32 %v8227_v61, %v8047_v7 }
 0x22d   : > { %v8190_v37 = vpop.permute.xlu1 %2239  ;;  %v8235_v31 = vpop.f32.mrf.mxu1 }
 0x22e   : > { %9352 = vst [vmem:[#allocation83_spill] sm:$0xff] %v8190_v37  ;;  %v2279_v51 = vmul.f32 %v8188_v50, %v8190_v37  ;;  %v2672_v37 = vmul.f32 %v7273_v57, %v7720_v26  ;;  %v8213_v50 = vpop.f32.mrf.mxu0  ;;  %9361 = vst [vmem:[#allocation92_spill] sm:$0xff] %v8235_v31 }
 0x22f   : > { %9357 = vst [vmem:[#allocation88_spill] sm:$0xff] %v8213_v50  ;;  %v2643_v50 = vld [vmem:[#allocation2 + $0x28] sm:$0xff]  ;;  %v8248_v7 = vpop.f32.mrf.mxu1 }
 0x230   : > { %6075 = vmatmul.mubr.msk.f32.gmra.mxu0 %vm472_vm0, %v2279_v51  ;;  %v8199_v56 = vld [vmem:[#allocation2 + $0x108] sm:$0xff]  ;;  %v8216_v51 = vld [vmem:[#allocation2 + $0x20] sm:$0xff] }
 0x231   : > { %v8205_v49 = vmul.f32 %v8199_v56, %v8176_v19 }
 0x232   : > { %v8207_v53 = vpop.permute.xlu1 %1371 }
 0x233   : > { %9355 = vst [vmem:[#allocation86_spill] sm:$0xff] %v8205_v49  ;;  %9356 = vst [vmem:[#allocation87_spill] sm:$0xff] %v8207_v53  ;;  %v1405_v27 = vmul.f32 %v8131_v62, %v8207_v53  ;;  %v8223_v49 = vpop.f32.mrf.mxu0 }
 0x235   : > { %6028 = vmatmul.mubr.msk.f32.gmra.mxu1 %vm472_vm0, %v1405_v27  ;;  %v2674_v27 = vmul.f32 %v8216_v51, %v7277_v35 }
 0x236   : > { %6082 = vmatprep.mubr.msk.f32.mxu1 %vm472_vm0, %v2672_v37  ;;  %v8241_v37 = vpop.f32.mrf.mxu0 }
 0x237   : > { %v8225_v41 = vpop.permute.xlu1 %2243 }
 0x238   : > { %9360 = vst [vmem:[#allocation91_spill] sm:$0xff] %v8225_v41  ;;  %v2280_v26 = vmul.f32 %v8221_v16, %v8225_v41  ;;  %v3062_v41 = vld [vmem:[#allocation2 + $0x11] sm:$0xff]  ;;  %v2675_v16 = vmul.f32 %v2643_v50, %v7289_v25  ;;  %v8250_v31 = vpop.f32.mrf.mxu0 }
 0x239   : > { %6083 = vmatmul.mubr.msk.f32.vlgmr.msra.gmra.mxu1 %vm472_vm0, %v7532_v24  ;;  %v3063_v24 = vld [vmem:[#allocation2 + $0x19] sm:$0xff]  ;;  %v8278_v50 = vld [vmem:[#allocation2 + $0x31] sm:$0xff] }
 0x23a   : > { %6077 = vmatprep.mubr.msk.f32.mxu0 %vm472_vm0, %v2280_v26  ;;  %6085 = vmatprep.mubr.msk.f32.mxu1 %vm472_vm0, %v2674_v27  ;;  %v8255_v26 = vpop.f32.mrf.mxu1  ;;  %9365 = vst [vmem:[#allocation96_spill] sm:$0xff] %v8278_v50  ;;  %v8294_v27 = vld [vmem:[#allocation2 + $0x41] sm:$0xff] }
 0x23b   : > { %6078 = vmatmul.mubr.msk.f32.gmra.mxu0 %vm472_vm0, %v2281_v54  ;;  %6181 = vmatpush3.msk.msra.mxu1 %vm1537_vm1, %v8053_v45  ;;  %v8258_v54 = vld [vmem:[#allocation2 + $0x21] sm:$0xff]  ;;  %v8264_v45 = vpop.f32.mrf.mxu0  ;;  %9368 = vst [vmem:[#allocation99_spill] sm:$0xff] %v8294_v27 }
 0x23c   : > { %6132 = vmatprep.mubr.msk.f32.mxu0 %vm472_vm0, %v3062_v41  ;;  %9362 = vst [vmem:[#allocation93_spill] sm:$0xff] %v8258_v54  ;;  %9363 = vst [vmem:[#allocation94_spill] sm:$0xff] %v8264_v45  ;;  %v8272_v41 = vpop.f32.mrf.mxu1 }
 0x23d   : > { %6086 = vmatmul.mubr.msk.f32.gmra.mxu1 %vm472_vm0, %v2675_v16  ;;  %v8274_v16 = vpop.f32.mrf.mxu0 }
 0x23e   : > { %6088 = vmatprep.mubr.msk.f32.mxu1 %vm472_vm0, %v7574_v42  ;;  %v8270_v42 = vld [vmem:[#allocation2 + $0x29] sm:$0xff] }
 0x23f   : > { %6133 = vmatmul.mubr.msk.f32.vlgmr.msra.gmra.mxu0 %vm472_vm0, %v3063_v24  ;;  %9364 = vst [vmem:[#allocation95_spill] sm:$0xff] %v8270_v42 }
 0x240   : > { %6135 = vmatprep.mubr.msk.f32.mxu0 %vm472_vm0, %v8258_v54  ;;  %6231 = vmatpush3.msk.msra.mxu0 %vm1537_vm1, %v8079_v32  ;;  %v8282_v32 = vpop.f32.mrf.mxu1  ;;  %v8378_v54 = vld [vmem:[#allocation2 + $0x91] sm:$0xff] }
 0x241   : > { %6089 = vmatmul.mubr.msk.f32.gmra.mxu1 %vm472_vm0, %v7611_v18  ;;  %v8288_v18 = vld [vmem:[#allocation2 + $0x39] sm:$0xff]  ;;  %9379 = vst [vmem:[#allocation110_spill] sm:$0xff] %v8378_v54 }
 0x242   : > { %6091 = vmatprep.mubr.msk.f32.mxu1 %vm472_vm0, %v7648_v28  ;;  %9366 = vst [vmem:[#allocation97_spill] sm:$0xff] %v8288_v18  ;;  %v8290_v28 = vpop.f32.mrf.mxu0  ;;  %v8298_v24 = vpop.f32.mrf.mxu1 }
 0x243   : > { %6136 = vmatmul.mubr.msk.f32.gmra.mxu0 %vm472_vm0, %v8270_v42  ;;  %9367 = vst [vmem:[#allocation98_spill] sm:$0xff] %v8290_v28 }
 0x244   : > { %6138 = vmatprep.mubr.msk.f32.mxu0 %vm472_vm0, %v8278_v50  ;;  %v8300_v50 = vpop.f32.mrf.mxu0 }
 0x245   : > { %6092 = vmatmul.mubr.msk.f32.gmra.mxu1 %vm472_vm0, %v7673_v36  ;;  %v8306_v36 = vld [vmem:[#allocation2 + $0x49] sm:$0xff] }
 0x246   : > { %6094 = vmatprep.mubr.msk.f32.mxu1 %vm472_vm0, %v7699_v9  ;;  %9369 = vst [vmem:[#allocation100_spill] sm:$0xff] %v8306_v36 }
 0x247   : > { %6139 = vmatmul.mubr.msk.f32.gmra.mxu0 %vm472_vm0, %v8288_v18  ;;  %v8308_v9 = vpop.f32.mrf.mxu1  ;;  %v8312_v18 = vld [vmem:[#allocation2 + $0x51] sm:$0xff] }
 0x248   : > { %6141 = vmatprep.mubr.msk.f32.mxu0 %vm472_vm0, %v8294_v27  ;;  %9370 = vst [vmem:[#allocation101_spill] sm:$0xff] %v8312_v18  ;;  %v8316_v27 = vpop.f32.mrf.mxu0 }
 0x249   : > { %6095 = vmatmul.mubr.msk.f32.gmra.mxu1 %vm472_vm0, %v7709_v47  ;;  %9371 = vst [vmem:[#allocation102_spill] sm:$0xff] %v8316_v27  ;;  %v8324_v47 = vpop.f32.mrf.mxu1  ;;  %v8396_v27 = vld [vmem:[#allocation2 + $0xa1] sm:$0xff] }
 0x24a   : > { %6097 = vmatprep.mubr.msk.f32.mxu1 %vm472_vm0, %v7724_v52  ;;  %v8322_v52 = vld [vmem:[#allocation2 + $0x59] sm:$0xff]  ;;  %v8326_v42 = vpop.f32.mrf.mxu0  ;;  %9382 = vst [vmem:[#allocation113_spill] sm:$0xff] %v8396_v27 }
 0x24b   : > { %6142 = vmatmul.mubr.msk.f32.gmra.mxu0 %vm472_vm0, %v8306_v36  ;;  %9372 = vst [vmem:[#allocation103_spill] sm:$0xff] %v8322_v52  ;;  %v8330_v36 = vld [vmem:[#allocation2 + $0x61] sm:$0xff] }
 0x24c   : > { %6144 = vmatprep.mubr.msk.f32.mxu0 %vm472_vm0, %v8312_v18  ;;  %9373 = vst [vmem:[#allocation104_spill] sm:$0xff] %v8330_v36 }
 0x24d   : > { %6098 = vmatmul.mubr.msk.f32.gmra.mxu1 %vm472_vm0, %v7800_v4  ;;  %v8340_v4 = vld [vmem:[#allocation2 + $0x69] sm:$0xff] }
 0x24e   : > { %6100 = vmatprep.mubr.msk.f32.mxu1 %vm472_vm0, %v7875_v30  ;;  %v8334_v18 = vpop.f32.mrf.mxu1  ;;  %9374 = vst [vmem:[#allocation105_spill] sm:$0xff] %v8340_v4  ;;  %v8342_v30 = vpop.f32.mrf.mxu0 }
 0x24f   : > { %6145 = vmatmul.mubr.msk.f32.gmra.mxu0 %vm472_vm0, %v8322_v52  ;;  %9375 = vst [vmem:[#allocation106_spill] sm:$0xff] %v8342_v30 }
 0x250   : > { %6147 = vmatprep.mubr.msk.f32.mxu0 %vm472_vm0, %v8330_v36  ;;  %v8348_v52 = vpop.f32.mrf.mxu1 }
 0x251   : > { %6101 = vmatmul.mubr.msk.f32.gmra.mxu1 %vm472_vm0, %v7897_v3 }
 0x252   : > { %6103 = vmatprep.mubr.msk.f32.mxu1 %vm472_vm0, %v7960_v12  ;;  %v8360_v12 = vld [vmem:[#allocation2 + $0x81] sm:$0xff] }
 0x253   : > { %6148 = vmatmul.mubr.msk.f32.gmra.mxu0 %vm472_vm0, %v8340_v4  ;;  %v8350_v36 = vpop.f32.mrf.mxu0  ;;  %9376 = vst [vmem:[#allocation107_spill] sm:$0xff] %v8360_v12 }
 0x254   : > { %6150 = vmatprep.mubr.msk.f32.mxu0 %vm472_vm0, %v7745_v29 }
 0x255   : > { %6104 = vmatmul.mubr.msk.f32.gmra.mxu1 %vm472_vm0, %v7967_v23  ;;  %v8364_v29 = vpop.f32.mrf.mxu0  ;;  %v8372_v23 = vld [vmem:[#allocation2 + $0x89] sm:$0xff] }
 0x256   : > { %6106 = vmatprep.mubr.msk.f32.mxu1 %vm472_vm0, %v7979_v55  ;;  %9377 = vst [vmem:[#allocation108_spill] sm:$0xff] %v8364_v29  ;;  %9378 = vst [vmem:[#allocation109_spill] sm:$0xff] %v8372_v23 }
 0x257   : > { %6151 = vmatmul.mubr.msk.f32.gmra.mxu0 %vm472_vm0, %v7754_v40  ;;  %v8358_v3 = vpop.f32.mrf.mxu1 }
 0x258   : > { %6153 = vmatprep.mubr.msk.f32.mxu0 %vm472_vm0, %v8360_v12  ;;  %v2692_v12 = vmul.f32 %v8044_v10, %v8055_v39 }
 0x259   : > { %6107 = vmatmul.mubr.msk.f32.gmra.mxu1 %vm472_vm0, %v7985_v14  ;;  %v8368_v4 = vpop.f32.mrf.mxu1 }
 0x25a   : > { %6109 = vmatprep.mubr.msk.f32.mxu1 %vm472_vm0, %v8015_v33 }
 0x25b   : > { %6154 = vmatmul.mubr.msk.f32.gmra.mxu0 %vm472_vm0, %v8372_v23  ;;  %v5984_v55 = vpop.f32.mrf.mxu1  ;;  %v8392_v23 = vld [vmem:[#allocation2 + $0x99] sm:$0xff] }
 0x25c   : > { %v8376_v40 = vpop.f32.mrf.mxu0  ;;  %v1937_v14 = vadd.f32 %v5984_v55, %v8197_v13  ;;  %6156 = vmatprep.mubr.msk.f32.mxu0 %vm472_vm0, %v8378_v54  ;;  %9381 = vst [vmem:[#allocation112_spill] sm:$0xff] %v8392_v23  ;;  %v2694_v13 = vmul.f32 %v8105_v43, %v7761_v34 }
 0x25d   : > { %6110 = vmatmul.mubr.msk.f32.gmra.mxu1 %vm472_vm0, %v8020_v21  ;;  %v8389_v29 = vpop.f32.mrf.mxu1 }
 0x25e   : > { %v8387_v33 = vpop.f32.mrf.mxu0  ;;  %6112 = vmatprep.mubr.msk.f32.mxu1 %vm472_vm0, %v2692_v12 }
 0x25f   : > { %9380 = vst [vmem:[#allocation111_spill] sm:$0xff] %v8387_v33  ;;  %6157 = vmatmul.mubr.msk.f32.gmra.mxu0 %vm472_vm0, %v8392_v23  ;;  %v5987_v30 = vpop.f32.mrf.mxu1  ;;  %v8410_v23 = vld [vmem:[#allocation2 + $0xa9] sm:$0xff] }
 0x260   : > { %v1947_v55 = vadd.f32 %v5987_v30, %v8223_v49  ;;  %v6034_v21 = vpop.f32.mrf.mxu0  ;;  %6159 = vmatprep.mubr.msk.f32.mxu0 %vm472_vm0, %v8396_v27  ;;  %9384 = vst [vmem:[#allocation115_spill] sm:$0xff] %v8410_v23  ;;  %v8414_v49 = vld [vmem:[#allocation2 + $0xb1] sm:$0xff]  ;;  %v2696_v30 = vmul.f32 %v8114_v48, %v8107_v15 }
 0x261   : > { %v8403_v54 = vadd.f32 %v6034_v21, %v1937_v14  ;;  %6113 = vmatmul.mubr.msk.f32.gmra.mxu1 %vm472_vm0, %v8057_v8  ;;  %v8407_v12 = vpop.f32.mrf.mxu1  ;;  %9385 = vst [vmem:[#allocation116_spill] sm:$0xff] %v8414_v49  ;;  %v8424_v8 = vld [vmem:[%s9193_s5 + $0x1c] sm:$0xf] }
 0x262   : > { %9383 = vst [vmem:[#allocation114_spill] sm:$0xff] %v8407_v12  ;;  %6115 = vmatprep.mubr.msk.f32.mxu1 %vm472_vm0, %v2694_v13  ;;  %6280 = vmatprep.subr.msk.mxu1 %vm1537_vm1, %v8424_v8  ;;  %v8433_v21 = vld [vmem:[#allocation2 + $0xb9] sm:$0xff] }
 0x263   : > { %6160 = vmatmul.mubr.msk.f32.gmra.mxu0 %vm472_vm0, %v8410_v23  ;;  %v5990_v33 = vpop.f32.mrf.mxu1  ;;  %9387 = vst [vmem:[#allocation118_spill] sm:$0xff] %v8433_v21 }
 0x264   : > { %v1957_v14 = vadd.f32 %v5990_v33, %v8250_v31  ;;  %6162 = vmatprep.mubr.msk.f32.mxu0 %vm472_vm0, %v8414_v49  ;;  %v8438_v31 = vld [vmem:[%s9193_s5 + $0x20] sm:$0xf] }
 0x265   : > { %6116 = vmatmul.mubr.msk.f32.gmra.mxu1 %vm472_vm0, %v8087_v58  ;;  %v8428_v13 = vpop.f32.mrf.mxu1  ;;  %v8442_v49 = vld [vmem:[#allocation2 + $0xc1] sm:$0xff]  ;;  %6330 = vmatprep.subr.msk.mxu0 %vm1537_vm1, %v8438_v31  ;;  %v2698_v58 = vmul.f32 %v8156_v1, %v7788_v22 }
 0x266   : > { %9386 = vst [vmem:[#allocation117_spill] sm:$0xff] %v8428_v13  ;;  %6118 = vmatprep.mubr.msk.f32.mxu1 %vm472_vm0, %v2696_v30  ;;  %9388 = vst [vmem:[#allocation119_spill] sm:$0xff] %v8442_v49  ;;  %v8448_v30 = vpop.f32.mrf.mxu0  ;;  %v8458_v13 = vld [vmem:[#allocation2 + $0xc9] sm:$0xff] }
 0x267   : > { %6163 = vmatmul.mubr.msk.f32.gmra.mxu0 %vm472_vm0, %v8433_v21  ;;  %v5993_v33 = vpop.f32.mrf.mxu1  ;;  %9390 = vst [vmem:[#allocation121_spill] sm:$0xff] %v8458_v13 }
 0x268   : > { %v1967_v23 = vadd.f32 %v5993_v33, %v8274_v16  ;;  %6165 = vmatprep.mubr.msk.f32.mxu0 %vm472_vm0, %v8442_v49  ;;  %v8462_v16 = vld [vmem:[#allocation2 + $0xd1] sm:$0xff]  ;;  %v2700_v33 = vmul.f32 %v8178_v60, %v8164_v2 }
 0x269   : > { %v577_v27 = vpop.xlane.xlu1 %576  ;;  %6119 = vmatmul.mubr.msk.f32.gmra.mxu1 %vm472_vm0, %v8116_v11  ;;  %v8455_v21 = vpop.f32.mrf.mxu1  ;;  %9391 = vst [vmem:[#allocation122_spill] sm:$0xff] %v8462_v16 }
 0x26a   : > { %9389 = vst [vmem:[#allocation120_spill] sm:$0xff] %v8455_v21  ;;  %v616_v28 = vmul.f32 0.25, %v577_v27  ;;  %6121 = vmatprep.mubr.msk.f32.mxu1 %vm472_vm0, %v2698_v58  ;;  %v6037_v12 = vpop.f32.mrf.mxu0  ;;  %v8481_v21 = vld [vmem:[#allocation2 + $0xd9] sm:$0xff] }
 0x26b   : > { %6166 = vmatmul.mubr.msk.f32.gmra.mxu0 %vm472_vm0, %v8458_v13  ;;  %v5996_v45 = vpop.f32.mrf.mxu1  ;;  %v8470_v27 = vadd.f32 %v6037_v12, %v1947_v55  ;;  %9393 = vst [vmem:[#allocation124_spill] sm:$0xff] %v8481_v21 }
 0x26c   : > { %v8467_v49 = vsub.f32 %v7999_v59, %v616_v28  ;;  %v1977_v11 = vadd.f32 %v5996_v45, %v8300_v50  ;;  %6168 = vmatprep.mubr.msk.f32.mxu0 %vm472_vm0, %v8462_v16  ;;  %v8478_v13 = vpop.f32.mrf.mxu0  ;;  %v8485_v45 = vld [vmem:[#allocation2 + $0x100] sm:$0xff]  ;;  %v2701_v50 = vmul.f32 %v8131_v62, %v8176_v19  ;;  %v8505_v62 = vld [vmem:[#allocation2 + $0xe9] sm:$0xff] }
 0x26d   : > { %6122 = vmatmul.mubr.msk.f32.gmra.mxu1 %vm472_vm0, %v8133_v6  ;;  %v8476_v58 = vpop.f32.mrf.mxu1  ;;  %v8491_v28 = vld [vmem:[#allocation2 + $0xe1] sm:$0xff]  ;;  %v2702_v55 = vmul.f32 %v8485_v45, %v7807_v38  ;;  %9395 = vst [vmem:[#allocation126_spill] sm:$0xff] %v8505_v62 }
 0x26e   : > { %9392 = vst [vmem:[#allocation123_spill] sm:$0xff] %v8467_v49  ;;  %6124 = vmatprep.mubr.msk.f32.mxu1 %vm472_vm0, %v2700_v33  ;;  %v688_v59 = vmul.f32 %v8467_v49, %v8467_v49  ;;  %9394 = vst [vmem:[#allocation125_spill] sm:$0xff] %v8491_v28 }
 0x26f   : > { %6169 = vmatmul.mubr.msk.f32.gmra.mxu0 %vm472_vm0, %v8481_v21  ;;  %v5999_v6 = vpop.f32.mrf.mxu1  ;;  %v6040_v16 = vpop.f32.mrf.mxu0 }
 0x270   : > { %v1987_v12 = vadd.f32 %v5999_v6, %v8326_v42  ;;  %6171 = vmatprep.mubr.msk.f32.mxu0 %vm472_vm0, %v8491_v28  ;;  %v792_v33 = vsel %vm472_vm0, %v688_v59, 0.0  ;;  %v8499_v49 = vadd.f32 %v6040_v16, %v1957_v14  ;;  %v2703_v42 = vmul.f32 %v8199_v56, %v8207_v53  ;;  %v8511_v6 = vld [vmem:[#allocation2 + $0xf1] sm:$0xff]  ;;  %v9433_v28 = vld [vmem:[#allocation46_spill] sm:$0xff] }
 0x271   : > { %793 = vadd.xlane.f32.xlu1 %v792_v33  ;;  %6125 = vmatmul.mubr.msk.f32.gmra.mxu1 %vm472_vm0, %v2701_v50  ;;  %v8503_v19 = vpop.f32.mrf.mxu0  ;;  %9396 = vst [vmem:[#allocation127_spill] sm:$0xff] %v8511_v6  ;;  %v8513_v59 = vpop.f32.mrf.mxu1 }
 0x272   : > { %6127 = vmatprep.mubr.msk.f32.mxu1 %vm472_vm0, %v2702_v55  ;;  %v8524_v55 = vld [vmem:[#allocation2 + $0xf9] sm:$0xff] }
 0x273   : > { %6172 = vmatmul.mubr.msk.f32.gmra.mxu0 %vm472_vm0, %v8505_v62  ;;  %v6043_v14 = vpop.f32.mrf.mxu0  ;;  %9397 = vst [vmem:[#allocation128_spill] sm:$0xff] %v8524_v55  ;;  %v8529_v62 = vld [vmem:[#allocation2 + $0x101] sm:$0xff] }
 0x274   : > { %6174 = vmatprep.mubr.msk.f32.mxu0 %vm472_vm0, %v8511_v6  ;;  %v8517_v16 = vadd.f32 %v6043_v14, %v1967_v23  ;;  %9398 = vst [vmem:[#allocation129_spill] sm:$0xff] %v8529_v62  ;;  %v3906_v14 = vmul.f32 %v8216_v51, %v7273_v57  ;;  %v3877_v51 = vld [vmem:[#allocation2 + $0x38] sm:$0xff]  ;;  %v9432_v6 = vld [vmem:[#allocation79_spill] sm:$0xff] }
 0x275   : > { %6128 = vmatmul.mubr.msk.f32.gmra.mxu1 %vm472_vm0, %v2703_v42  ;;  %v6002_v50 = vpop.f32.mrf.mxu1  ;;  %v8522_v56 = vpop.f32.mrf.mxu0 }
 0x276   : > { %6182 = vmatprep.mubr.msk.f32.mxu1 %vm472_vm0, %v7513_v44  ;;  %v1997_v33 = vadd.f32 %v6002_v50, %v8350_v36  ;;  %v8541_v36 = vld [vmem:[#allocation2 + $0x109] sm:$0xff] }
 0x277   : > { %6175 = vmatmul.mubr.msk.f32.gmra.mxu0 %vm472_vm0, %v8524_v55  ;;  %v6046_v23 = vpop.f32.mrf.mxu0  ;;  %9399 = vst [vmem:[#allocation130_spill] sm:$0xff] %v8541_v36  ;;  %v9431_v55 = vld [vmem:[#allocation81_spill] sm:$0xff] }
 0x278   : > { %6177 = vmatprep.mubr.msk.f32.mxu0 %vm472_vm0, %v8529_v62  ;;  %v8533_v42 = vadd.f32 %v6046_v23, %v1977_v11  ;;  %v3876_v11 = vld [vmem:[#allocation2 + $0x30] sm:$0xff]  ;;  %v9429_v62 = vld [vmem:[#allocation60_spill] sm:$0xff] }
 0x279   : > { %6183 = vmatmul.mubr.msk.f32.vlgmr.msra.gmra.mxu1 %vm472_vm0, %v7554_v5  ;;  %v8539_v44 = vpop.f32.mrf.mxu0  ;;  %v3908_v57 = vmul.f32 %v3876_v11, %v7277_v35  ;;  %v9402_v35 = vld [vmem:[#allocation9_spill] sm:$0xff]  ;;  %v8576_v11 = vpop.f32.mrf.mxu1 }
 0x27a   : > { %6185 = vmatprep.mubr.msk.f32.mxu1 %vm472_vm0, %v7592_v46  ;;  %6281 = vmatpush3.msk.msra.mxu1 %vm1537_vm1, %v8424_v8  ;;  %v9400_v8 = vld [vmem:[#allocation7_spill] sm:$0xff] }
 0x27b   : > { %6178 = vmatmul.mubr.msk.f32.gmra.mxu0 %vm472_vm0, %v8541_v36  ;;  %v6049_v5 = vpop.f32.mrf.mxu0 }
 0x27c   : > { %6232 = vmatprep.mubr.msk.f32.mxu0 %vm472_vm0, %v3906_v14  ;;  %v8550_v50 = vadd.f32 %v6049_v5, %v1987_v12  ;;  %v9403_v14 = vld [vmem:[#allocation15_spill] sm:$0xff] }
 0x27d   : > { %6186 = vmatmul.mubr.msk.f32.gmra.mxu1 %vm472_vm0, %v7839_v17  ;;  %v8556_v46 = vpop.f32.mrf.mxu0  ;;  %v9401_v17 = vld [vmem:[#allocation12_spill] sm:$0xff] }
 0x27e   : > { %6188 = vmatprep.mubr.msk.f32.mxu1 %vm472_vm0, %v7863_v20  ;;  %v3909_v20 = vmul.f32 %v3877_v51, %v7289_v25  ;;  %v9406_v25 = vld [vmem:[#allocation14_spill] sm:$0xff] }
 0x27f   : > { %6233 = vmatmul.mubr.msk.f32.vlgmr.msra.gmra.mxu0 %vm472_vm0, %v9400_v8  ;;  %v6052_v23 = vpop.f32.mrf.mxu0 }
 0x280   : > { %6235 = vmatprep.mubr.msk.f32.mxu0 %vm472_vm0, %v3908_v57  ;;  %6331 = vmatpush3.msk.msra.mxu0 %vm1537_vm1, %v8438_v31  ;;  %v8564_v12 = vadd.f32 %v6052_v23, %v1997_v33  ;;  %v9404_v31 = vld [vmem:[#allocation20_spill] sm:$0xff]  ;;  %v9405_v33 = vld [vmem:[#allocation11_spill] sm:$0xff] }
 0x281   : > { %6189 = vmatmul.mubr.msk.f32.gmra.mxu1 %vm472_vm0, %v9401_v17  ;;  %v9407_v57 = vld [vmem:[#allocation23_spill] sm:$0xff]  ;;  %v8589_v8 = vpop.f32.mrf.mxu0  ;;  %v9408_v23 = vld [vmem:[#allocation16_spill] sm:$0xff] }
 0x282   : > { %6191 = vmatprep.mubr.msk.f32.mxu1 %vm472_vm0, %v7883_v63 }
 0x283   : > { %6236 = vmatmul.mubr.msk.f32.gmra.mxu0 %vm472_vm0, %v3909_v20  ;;  %v9409_v20 = vld [vmem:[#allocation18_spill] sm:$0xff] }
 0x284   : > { %6238 = vmatprep.mubr.msk.f32.mxu0 %vm472_vm0, %v9402_v35 }
 0x285   : > { %6192 = vmatmul.mubr.msk.f32.gmra.mxu1 %vm472_vm0, %v9403_v14  ;;  %v9410_v14 = vld [vmem:[#allocation29_spill] sm:$0xff] }
 0x286   : > { %6194 = vmatprep.mubr.msk.f32.mxu1 %vm472_vm0, %v9404_v31 }
 0x287   : > { %6239 = vmatmul.mubr.msk.f32.gmra.mxu0 %vm472_vm0, %v9405_v33  ;;  %v6005_v63 = vpop.f32.mrf.mxu1  ;;  %v9411_v33 = vld [vmem:[#allocation37_spill] sm:$0xff] }
 0x288   : > { %6241 = vmatprep.mubr.msk.f32.mxu0 %vm472_vm0, %v9406_v25  ;;  %v2007_v5 = vadd.f32 %v6005_v63, %v8376_v40  ;;  %v9413_v25 = vld [vmem:[#allocation22_spill] sm:$0xff]  ;;  %v9414_v63 = vld [vmem:[#allocation39_spill] sm:$0xff] }
 0x289   : > { %6195 = vmatmul.mubr.msk.f32.gmra.mxu1 %vm472_vm0, %v9407_v57  ;;  %v797_v51 = vpop.xlane.xlu0 %796  ;;  %v9415_v57 = vld [vmem:[#allocation35_spill] sm:$0xff] }
 0x28a   : > { %6197 = vmatprep.mubr.msk.f32.mxu1 %vm472_vm0, %v7823_v0  ;;  %v833_v17 = vmul.f32 0.25, %v797_v51  ;;  %v9412_v0 = vld [vmem:[#allocation19_spill] sm:$0xff]  ;;  %v9416_v51 = vld [vmem:[#allocation25_spill] sm:$0xff] }
 0x28b   : > { %6242 = vmatmul.mubr.msk.f32.gmra.mxu0 %vm472_vm0, %v9408_v23  ;;  %v9418_v23 = vld [vmem:[#allocation43_spill] sm:$0xff] }
 0x28c   : > { %6244 = vmatprep.mubr.msk.f32.mxu0 %vm472_vm0, %v9409_v20  ;;  %v869_v35 = vadd.f32 1e-05, %v833_v17  ;;  %v6055_v40 = vpop.f32.mrf.mxu0  ;;  %v9419_v17 = vld [vmem:[#allocation48_spill] sm:$0xff]  ;;  %v8617_v20 = vpop.f32.mrf.mxu1 }
 0x28d   : > { %6198 = vmatmul.mubr.msk.f32.gmra.mxu1 %vm472_vm0, %v9410_v14  ;;  %v8597_v31 = vadd.f32 %v6055_v40, %v2007_v5  ;;  %v9417_v5 = vld [vmem:[#allocation32_spill] sm:$0xff]  ;;  %v9421_v14 = vld [vmem:[#allocation41_spill] sm:$0xff] }
 0x28e   : > { %6200 = vmatprep.mubr.msk.f32.mxu1 %vm472_vm0, %v9411_v33  ;;  %6536 = vrsqrt.f32 %v869_v35  ;;  %v9420_v35 = vld [vmem:[#allocation34_spill] sm:$0xff]  ;;  %v9422_v33 = vld [vmem:[#allocation51_spill] sm:$0xff] }
 0x28f   : > { %6245 = vmatmul.mubr.msk.f32.gmra.mxu0 %vm472_vm0, %v9412_v0  ;;  %v9423_v0 = vld [vmem:[#allocation58_spill] sm:$0xff] }
 0x290   : > { %6247 = vmatprep.mubr.msk.f32.mxu0 %vm472_vm0, %v9413_v25  ;;  %v9424_v25 = vld [vmem:[#allocation42_spill] sm:$0xff] }
 0x291   : > { %6201 = vmatmul.mubr.msk.f32.gmra.mxu1 %vm472_vm0, %v9414_v63 }
 0x292   : > { %6203 = vmatprep.mubr.msk.f32.mxu1 %vm472_vm0, %v9415_v57  ;;  %v9425_v57 = vld [vmem:[#allocation47_spill] sm:$0xff] }
 0x293   : > { %6248 = vmatmul.mubr.msk.f32.gmra.mxu0 %vm472_vm0, %v9416_v51  ;;  %v9426_v51 = vld [vmem:[#allocation68_spill] sm:$0xff] }
 0x294   : > { %6250 = vmatprep.mubr.msk.f32.mxu0 %vm472_vm0, %v9417_v5  ;;  %v3504_v5 = vmul.f32 %v9426_v51, %v9425_v57  ;;  %v9436_v57 = vld [vmem:[#allocation84_spill] sm:$0xff] }
 0x295   : > { %6204 = vmatmul.mubr.msk.f32.gmra.mxu1 %vm472_vm0, %v9418_v23  ;;  %v6008_v40 = vpop.f32.mrf.mxu1  ;;  %v9427_v23 = vld [vmem:[#allocation45_spill] sm:$0xff] }
 0x296   : > { %6206 = vmatprep.mubr.msk.f32.mxu1 %vm472_vm0, %v9419_v17  ;;  %v9428_v17 = vld [vmem:[#allocation64_spill] sm:$0xff] }
 0x297   : > { %6251 = vmatmul.mubr.msk.f32.gmra.mxu0 %vm472_vm0, %v9420_v35  ;;  %v2011_v36 = vpop.f32.mrf.mxu1 }
 0x298   : > { %6253 = vmatprep.mubr.msk.f32.mxu0 %vm472_vm0, %v9421_v14  ;;  %v8634_v14 = vpop.f32.mrf.mxu0  ;;  %v2012_v53 = vadd.f32 %v2011_v36, %v9436_v57 }
 0x299   : > { %6207 = vmatmul.mubr.msk.f32.gmra.mxu1 %vm472_vm0, %v9422_v33  ;;  %v9430_v33 = vld [vmem:[#allocation53_spill] sm:$0xff] }
 0x29a   : > { %6209 = vmatprep.mubr.msk.f32.mxu1 %vm472_vm0, %v9423_v0  ;;  %v3924_v0 = vmul.f32 %v9430_v33, %v8055_v39  ;;  %v9437_v39 = vld [vmem:[#allocation80_spill] sm:$0xff] }
 0x29b   : > { %6254 = vmatmul.mubr.msk.f32.gmra.mxu0 %vm472_vm0, %v9424_v25  ;;  %v6537_v63 = vpop.eup %6536  ;;  %v2017_v25 = vadd.f32 %v6008_v40, %v9431_v55  ;;  %v9438_v55 = vld [vmem:[#allocation66_spill] sm:$0xff]  ;;  %v9440_v33 = vld [vmem:[#allocation72_spill] sm:$0xff] }
 0x29c   : > { %6256 = vmatprep.mubr.msk.f32.mxu0 %vm472_vm0, %v9427_v23  ;;  %v941_v35 = vmul.f32 %v6537_v63, %v9428_v17  ;;  %v9434_v63 = vld [vmem:[#allocation69_spill] sm:$0xff]  ;;  %v9435_v17 = vld [vmem:[#allocation70_spill] sm:$0xff] }
 0x29d   : > { %6210 = vmatmul.mubr.msk.f32.gmra.mxu1 %vm472_vm0, %v9429_v62  ;;  %v3506_v21 = vmul.f32 %v9435_v17, %v9434_v63 }
 0x29e   : > { %6212 = vmatprep.mubr.msk.f32.mxu1 %vm472_vm0, %v3504_v5  ;;  %v984_v51 = vmul.f32 %v9432_v6, %v941_v35  ;;  %v6058_v23 = vpop.f32.mrf.mxu0  ;;  %v3926_v5 = vmul.f32 %v8105_v43, %v8044_v10  ;;  %v9439_v35 = vld [vmem:[#allocation50_spill] sm:$0xff]  ;;  %v3928_v10 = vmul.f32 %v8114_v48, %v7761_v34  ;;  %v9444_v43 = vld [vmem:[#allocation73_spill] sm:$0xff]  ;;  %v3930_v34 = vmul.f32 %v8156_v1, %v8107_v15  ;;  %v9449_v48 = vld [vmem:[#allocation56_spill] sm:$0xff] }
 0x29f   : > { %6257 = vmatmul.mubr.msk.f32.gmra.mxu0 %vm472_vm0, %v9433_v28  ;;  %v8648_v38 = vadd.f32 %v6058_v23, %v2017_v25  ;;  %v3507_v36 = vmul.f32 %v9440_v33, %v9439_v35  ;;  %v9441_v25 = vld [vmem:[#allocation55_spill] sm:$0xff] }
 0x2a0   : > { %6259 = vmatprep.mubr.msk.f32.mxu0 %vm472_vm0, %v3924_v0  ;;  %v1027_v62 = vadd.f32 %v9437_v39, %v984_v51  ;;  %v2529_v40 = vpop.f32.mrf.mxu0  ;;  %v9442_v0 = vld [vmem:[#allocation54_spill] sm:$0xff]  ;;  %v9443_v51 = vld [vmem:[#allocation75_spill] sm:$0xff] }
 0x2a1   : > { %6213 = vmatmul.mubr.msk.f32.gmra.mxu1 %vm472_vm0, %v9438_v55  ;;  %v8656_v28 = vadd.f32 %v2529_v40, %v2012_v53  ;;  %v3508_v23 = vmul.f32 %v9443_v51, %v9442_v0  ;;  %v9445_v53 = vld [vmem:[#allocation77_spill] sm:$0xff]  ;;  %v9447_v55 = vld [vmem:[#allocation76_spill] sm:$0xff]  ;;  %v9448_v40 = vld [vmem:[#allocation78_spill] sm:$0xff] }
 0x2a2   : > { %6215 = vmatprep.mubr.msk.f32.mxu1 %vm472_vm0, %v3506_v21  ;;  %v1063_v57 = vmax.f32 %v1027_v62, 0.0  ;;  %v3509_v21 = vmul.f32 %v9445_v53, %v9444_v43  ;;  %v9446_v62 = vld [vmem:[#allocation63_spill] sm:$0xff]  ;;  %v3510_v33 = vmul.f32 %v9448_v40, %v9447_v55  ;;  %v3482_v53 = vld [vmem:[#allocation2 + $0x102] sm:$0xff] }
 0x2a3   : > { %6260 = vmatmul.mubr.msk.f32.gmra.mxu0 %vm472_vm0, %v9441_v25  ;;  %v9451_v25 = vld [vmem:[#allocation67_spill] sm:$0xff] }
 0x2a4   : > { %6262 = vmatprep.mubr.msk.f32.mxu0 %vm472_vm0, %v3926_v5  ;;  %v1147_v17 = vmul.f32 0.0, %v1063_v57  ;;  %v9450_v5 = vld [vmem:[#allocation82_spill] sm:$0xff]  ;;  %v9452_v51 = vld [vmem:[#allocation59_spill] sm:$0xff] }
 0x2a5   : > { %6216 = vmatmul.mubr.msk.f32.gmra.mxu1 %vm472_vm0, %v3507_v36  ;;  %v3511_v36 = vmul.f32 %v9450_v5, %v9449_v48  ;;  %v9454_v15 = vld [vmem:[#allocation83_spill] sm:$0xff]  ;;  %v9457_v5 = vld [vmem:[#allocation85_spill] sm:$0xff] }
 0x2a6   : > { %6218 = vmatprep.mubr.msk.f32.mxu1 %vm472_vm0, %v3508_v23  ;;  %1149 = vst.msk [vmem:[#allocation2 + $0x119] sm:$0xff] %vm472_vm0, %v1147_v17  ;;  %v9453_v23 = vld [vmem:[#allocation90_spill] sm:$0xff]  ;;  %v3513_v1 = vmul.f32 %v8227_v61, %v9454_v15  ;;  %v9456_v40 = vld [vmem:[#allocation91_spill] sm:$0xff] }
 0x2a7   : > { %6263 = vmatmul.mubr.msk.f32.gmra.mxu0 %vm472_vm0, %v9446_v62  ;;  %v6011_v57 = vpop.f32.mrf.mxu1  ;;  %v3512_v17 = vmul.f32 %v9453_v23, %v9452_v51  ;;  %v9455_v62 = vld [vmem:[#allocation71_spill] sm:$0xff]  ;;  %v9459_v23 = vld [vmem:[#allocation74_spill] sm:$0xff] }
 0x2a8   : > { %6265 = vmatprep.mubr.msk.f32.mxu0 %vm472_vm0, %v3928_v10  ;;  %v3932_v10 = vmul.f32 %v8178_v60, %v7788_v22  ;;  %v3934_v22 = vmul.f32 %v8485_v45, %v8164_v2  ;;  %v9458_v60 = vld [vmem:[#allocation89_spill] sm:$0xff]  ;;  %v9461_v2 = vld [vmem:[#allocation92_spill] sm:$0xff] }
 0x2a9   : > { %6219 = vmatmul.mubr.msk.f32.gmra.mxu1 %vm472_vm0, %v3509_v21  ;;  %v2021_v21 = vpop.f32.mrf.mxu1 }
 0x2aa   : > { %6221 = vmatprep.mubr.msk.f32.mxu1 %vm472_vm0, %v3510_v33  ;;  %v3514_v33 = vmul.f32 %v3482_v53, %v9456_v40 }
 0x2ab   : > { %6266 = vmatmul.mubr.msk.f32.gmra.mxu0 %vm472_vm0, %v9451_v25  ;;  %v2027_v25 = vadd.f32 %v6011_v57, %v9457_v5  ;;  %v9460_v57 = vld [vmem:[#allocation86_spill] sm:$0xff] }
 0x2ac   : > { %6268 = vmatprep.mubr.msk.f32.mxu0 %vm472_vm0, %v3930_v34 }
 0x2ad   : > { %6222 = vmatmul.mubr.msk.f32.gmra.mxu1 %vm472_vm0, %v3511_v36  ;;  %v2022_v36 = vadd.f32 %v2021_v21, %v9458_v60 }
 0x2ae   : > { %6224 = vmatprep.mubr.msk.f32.mxu1 %vm472_vm0, %v3512_v17 }
 0x2af   : > { %6269 = vmatmul.mubr.msk.f32.gmra.mxu0 %vm472_vm0, %v9455_v62 }
 0x2b0   : > { %6271 = vmatprep.mubr.msk.f32.mxu0 %vm472_vm0, %v3932_v10  ;;  %v6061_v34 = vpop.f32.mrf.mxu0 }
 0x2b1   : > { %6225 = vmatmul.mubr.msk.f32.gmra.mxu1 %vm472_vm0, %v3513_v1  ;;  %v8704_v61 = vadd.f32 %v6061_v34, %v2027_v25 }
 0x2b2   : > { %6227 = vmatprep.mubr.msk.f32.mxu1 %vm472_vm0, %v3514_v33  ;;  %v2539_v17 = vpop.f32.mrf.mxu0 }
 0x2b3   : > { %6272 = vmatmul.mubr.msk.f32.gmra.mxu0 %vm472_vm0, %v9459_v23  ;;  %v8709_v53 = vadd.f32 %v2539_v17, %v2022_v36 }
 0x2b4   : > { %6274 = vmatprep.mubr.msk.f32.mxu0 %vm472_vm0, %v3934_v22 }
 0x2b7   : > { %6275 = vmatmul.mubr.msk.f32.gmra.mxu0 %vm472_vm0, %v9460_v57 }
 0x2b9   : > { %v6014_v10 = vpop.f32.mrf.mxu1 }
 0x2ba   : > { %v2037_v45 = vadd.f32 %v6014_v10, %v9461_v2 }
 0x2bb   : > { %v2031_v1 = vpop.f32.mrf.mxu1 }
 0x2bc   : > { %v2032_v62 = vadd.f32 %v2031_v1, %v8248_v7 }
 0x2be   : > { %v6064_v21 = vpop.f32.mrf.mxu0 }
 0x2bf   : > { %v8716_v5 = vadd.f32 %v6064_v21, %v2037_v45 }
 0x2c0   : > { %v2549_v33 = vpop.f32.mrf.mxu0 }
 0x2c1   : > { %v8718_v25 = vadd.f32 %v2549_v33, %v2032_v62 }
 0x2c4   : > { %v6017_v34 = vpop.f32.mrf.mxu1 }
 0x2c5   : > { %v2047_v36 = vadd.f32 %v6017_v34, %v8255_v26 }
 0x2c6   : > { %v2041_v60 = vpop.f32.mrf.mxu1 }
 0x2c7   : > { %v2042_v23 = vadd.f32 %v2041_v60, %v8272_v41 }
 0x2ca   : > { %v6067_v22 = vpop.f32.mrf.mxu0 }
 0x2cb   : > { %v8722_v17 = vadd.f32 %v6067_v22, %v2047_v36 }
 0x2cc   : > { %v2559_v57 = vpop.f32.mrf.mxu0 }
 0x2cd   : > { %v8724_v40 = vadd.f32 %v2559_v57, %v2042_v23 }
 0x2d2   : > { %v6020_v10 = vpop.f32.mrf.mxu1 }
 0x2d3   : > { %v2057_v7 = vadd.f32 %v6020_v10, %v8282_v32 }
 0x2d4   : > { %v2051_v2 = vpop.f32.mrf.mxu1 }
 0x2d5   : > { %v2052_v45 = vadd.f32 %v2051_v2, %v8298_v24 }
 0x2d7   : > { %v6070_v1 = vpop.f32.mrf.mxu0 }
 0x2d8   : > { %v8728_v21 = vadd.f32 %v6070_v1, %v2057_v7 }
 0x2d9   : > { %v2569_v62 = vpop.f32.mrf.mxu0 }
 0x2da   : > { %v8730_v33 = vadd.f32 %v2569_v62, %v2052_v45 }
 0x2dd   : > { %v6023_v26 = vpop.f32.mrf.mxu1 }
 0x2de   : > { %v2067_v41 = vadd.f32 %v6023_v26, %v8308_v9 }
 0x2df   : > { %v2061_v34 = vpop.f32.mrf.mxu1 }
 0x2e0   : > { %v2062_v36 = vadd.f32 %v2061_v34, %v8324_v47 }
 0x2e3   : > { %v6073_v60 = vpop.f32.mrf.mxu0 }
 0x2e4   : > { %v8734_v22 = vadd.f32 %v6073_v60, %v2067_v41 }
 0x2e5   : > { %v2579_v23 = vpop.f32.mrf.mxu0 }
 0x2e6   : > { %v8736_v57 = vadd.f32 %v2579_v23, %v2062_v36 }
 0x2eb   : > { %v6026_v32 = vpop.f32.mrf.mxu1 }
 0x2ec   : > { %v2077_v24 = vadd.f32 %v6026_v32, %v8334_v18  ;;  %v9462_v18 = vld [vmem:[#allocation88_spill] sm:$0xff] }
 0x2ed   : > { %v2071_v10 = vpop.f32.mrf.mxu1  ;;  %v1932_v32 = vadd.f32 %v8389_v29, %v9462_v18 }
 0x2ee   : > { %v2072_v7 = vadd.f32 %v2071_v10, %v8348_v52 }
 0x2f0   : > { %v6076_v2 = vpop.f32.mrf.mxu0 }
 0x2f1   : > { %v8740_v1 = vadd.f32 %v6076_v2, %v2077_v24 }
 0x2f2   : > { %v2589_v45 = vpop.f32.mrf.mxu0 }
 0x2f3   : > { %v8742_v62 = vadd.f32 %v2589_v45, %v2072_v7  ;;  %v2608_v45 = vadd.f32 %v8448_v30, %v1932_v32 }
 0x2f5   : > { %v6029_v9 = vpop.f32.mrf.mxu1 }
 0x2f6   : > { %v2087_v34 = vadd.f32 %v6029_v9, %v8358_v3 }
 0x2f7   : > { %v2081_v26 = vpop.f32.mrf.mxu1 }
 0x2f8   : > { %v2082_v52 = vadd.f32 %v2081_v26, %v8368_v4 }
 0x2f9   : > { %v6084_v47 = vpop.f32.mrf.mxu1 }
 0x2fa   : > { %v3031_v41 = vadd.f32 %v6084_v47, %v8403_v54  ;;  %v794_v60 = vpop.xlane.xlu1 %793  ;;  %v9463_v47 = vld [vmem:[#allocation114_spill] sm:$0xff] }
 0x2fb   : > { %v832_v36 = vmul.f32 0.25, %v794_v60  ;;  %v6079_v23 = vpop.f32.mrf.mxu0  ;;  %v2871_v15 = vpop.f32.mrf.mxu1  ;;  %v1942_v60 = vadd.f32 %v9463_v47, %v8241_v37  ;;  %v9466_v47 = vld [vmem:[#allocation98_spill] sm:$0xff] }
 0x2fc   : > { %v8749_v10 = vadd.f32 %v6079_v23, %v2087_v34  ;;  %v3030_v29 = vadd.f32 %v2871_v15, %v2608_v45 }
 0x2fd   : > { %v868_v24 = vadd.f32 1e-05, %v832_v36  ;;  %v2599_v2 = vpop.f32.mrf.mxu0  ;;  %v6087_v7 = vpop.f32.mrf.mxu1  ;;  %v2610_v34 = vadd.f32 %v8478_v13, %v1942_v60  ;;  %v9467_v60 = vld [vmem:[#allocation120_spill] sm:$0xff] }
 0x2fe   : > { %v8752_v51 = vadd.f32 %v2599_v2, %v2082_v52  ;;  %v3033_v54 = vadd.f32 %v6087_v7, %v8470_v27  ;;  %v9464_v27 = vld [vmem:[#allocation94_spill] sm:$0xff]  ;;  %v9465_v52 = vld [vmem:[#allocation117_spill] sm:$0xff] }
 0x2ff   : > { %6538 = vrsqrt.f32 %v868_v24  ;;  %v2881_v3 = vpop.f32.mrf.mxu1  ;;  %v6134_v9 = vpop.f32.mrf.mxu0  ;;  %v1952_v24 = vadd.f32 %v9465_v52, %v9464_v27 }
 0x300   : > { %v8757_v18 = vadd.f32 %v6134_v9, %v3031_v41  ;;  %v3032_v2 = vadd.f32 %v2881_v3, %v2610_v34 }
 0x301   : > { %v6090_v4 = vpop.f32.mrf.mxu1  ;;  %v3261_v26 = vpop.f32.mrf.mxu0  ;;  %v2612_v41 = vadd.f32 %v8503_v19, %v1952_v24  ;;  %v9468_v24 = vld [vmem:[#allocation102_spill] sm:$0xff] }
 0x302   : > { %v3035_v36 = vadd.f32 %v6090_v4, %v8499_v49  ;;  %v8761_v30 = vadd.f32 %v3261_v26, %v3030_v29  ;;  %v1962_v29 = vadd.f32 %v9467_v60, %v9466_v47 }
 0x303   : > { %v2891_v23 = vpop.f32.mrf.mxu1  ;;  %v6137_v32 = vpop.f32.mrf.mxu0 }
 0x304   : > { %v8765_v7 = vadd.f32 %v6137_v32, %v3033_v54  ;;  %v3034_v4 = vadd.f32 %v2891_v23, %v2612_v41  ;;  %v2614_v54 = vadd.f32 %v8522_v56, %v1962_v29  ;;  %v9469_v23 = vld [vmem:[#allocation123_spill] sm:$0xff] }
 0x305   : > { %v6093_v37 = vpop.f32.mrf.mxu1  ;;  %v3271_v15 = vpop.f32.mrf.mxu0 }
 0x306   : > { %v3037_v45 = vadd.f32 %v6093_v37, %v8517_v16  ;;  %v8769_v9 = vadd.f32 %v3271_v15, %v3032_v2  ;;  %v1972_v2 = vadd.f32 %v8476_v58, %v9468_v24 }
 0x307   : > { %v2901_v13 = vpop.f32.mrf.mxu1  ;;  %v6140_v49 = vpop.f32.mrf.mxu0 }
 0x308   : > { %v8773_v26 = vadd.f32 %v6140_v49, %v3035_v36  ;;  %v3036_v37 = vadd.f32 %v2901_v13, %v2614_v54  ;;  %v2616_v47 = vadd.f32 %v8539_v44, %v1972_v2 }
 0x309   : > { %v6096_v27 = vpop.f32.mrf.mxu1  ;;  %v3281_v3 = vpop.f32.mrf.mxu0 }
 0x30a   : > { %v3039_v34 = vadd.f32 %v6096_v27, %v8533_v42  ;;  %v8777_v32 = vadd.f32 %v3281_v3, %v3034_v4  ;;  %v9470_v27 = vld [vmem:[#allocation106_spill] sm:$0xff] }
 0x30b   : > { %v2911_v19 = vpop.f32.mrf.mxu1  ;;  %v6143_v16 = vpop.f32.mrf.mxu0  ;;  %v1982_v58 = vadd.f32 %v8513_v59, %v9470_v27 }
 0x30c   : > { %v6539_v52 = vpop.eup %6538  ;;  %v8781_v15 = vadd.f32 %v6143_v16, %v3037_v45  ;;  %v3038_v13 = vadd.f32 %v2911_v19, %v2616_v47 }
 0x30d   : > { %v940_v36 = vmul.f32 %v6539_v52, %v9469_v23  ;;  %v6099_v41 = vpop.f32.mrf.mxu1  ;;  %v3291_v49 = vpop.f32.mrf.mxu0  ;;  %v2618_v44 = vadd.f32 %v8556_v46, %v1982_v58 }
 0x30e   : > { %v3041_v56 = vadd.f32 %v6099_v41, %v8550_v50  ;;  %v8786_v42 = vadd.f32 %v3291_v49, %v3036_v37  ;;  %v9471_v37 = vld [vmem:[#allocation108_spill] sm:$0xff] }
 0x30f   : > { %v983_v60 = vmul.f32 %v9432_v6, %v940_v36  ;;  %v2921_v29 = vpop.f32.mrf.mxu1  ;;  %v6146_v4 = vpop.f32.mrf.mxu0  ;;  %v1992_v23 = vadd.f32 %v8576_v11, %v9471_v37 }
 0x310   : > { %v8791_v45 = vadd.f32 %v6146_v4, %v3039_v34  ;;  %v3040_v59 = vadd.f32 %v2921_v29, %v2618_v44 }
 0x311   : > { %v1026_v3 = vadd.f32 %v9437_v39, %v983_v60  ;;  %v6102_v54 = vpop.f32.mrf.mxu1  ;;  %v3301_v16 = vpop.f32.mrf.mxu0  ;;  %v2620_v41 = vadd.f32 %v8589_v8, %v1992_v23  ;;  %v9472_v60 = vld [vmem:[#allocation111_spill] sm:$0xff] }
 0x312   : > { %v3043_v50 = vadd.f32 %v6102_v54, %v8564_v12  ;;  %v8796_v52 = vadd.f32 %v3301_v16, %v3038_v13  ;;  %v2002_v4 = vadd.f32 %v8617_v20, %v9472_v60 }
 0x313   : > { %v1062_v24 = vmax.f32 %v1026_v3, 0.0  ;;  %v2931_v6 = vpop.f32.mrf.mxu1  ;;  %v6149_v2 = vpop.f32.mrf.mxu0 }
 0x314   : > { %v8800_v19 = vadd.f32 %v6149_v2, %v3041_v56  ;;  %v3042_v11 = vadd.f32 %v2931_v6, %v2620_v41  ;;  %v2622_v58 = vadd.f32 %v8634_v14, %v2002_v4 }
 0x315   : > { %v1146_v34 = vmul.f32 0.0, %v1062_v24  ;;  %v6105_v36 = vpop.f32.mrf.mxu1  ;;  %v3311_v39 = vpop.f32.mrf.mxu0 }
 0x316   : > { %v3045_v46 = vadd.f32 %v6105_v36, %v8597_v31  ;;  %v8804_v49 = vadd.f32 %v3311_v39, %v3040_v59  ;;  %v9473_v59 = vld [vmem:[#allocation62_spill] sm:$0xff] }
 0x317   : > { %1148 = vst.msk [vmem:[#allocation2 + $0x111] sm:$0xff] %vm472_vm0, %v1146_v34  ;;  %v2941_v12 = vpop.f32.mrf.mxu1  ;;  %v6152_v47 = vpop.f32.mrf.mxu0  ;;  %v9474_v36 = vld [vmem:[#allocation26_spill] sm:$0xff] }
 0x318   : > { %v8809_v29 = vadd.f32 %v6152_v47, %v3043_v50  ;;  %v3044_v54 = vadd.f32 %v2941_v12, %v2622_v58 }
 0x319   : > { %v6108_v56 = vpop.f32.mrf.mxu1  ;;  %v3321_v27 = vpop.f32.mrf.mxu0 }
 0x31a   : > { %v3047_v8 = vadd.f32 %v6108_v56, %v8648_v38  ;;  %v8813_v13 = vadd.f32 %v3321_v27, %v3042_v11  ;;  %v9476_v11 = vld [vmem:[#allocation93_spill] sm:$0xff] }
 0x31b   : > { %v2951_v31 = vpop.f32.mrf.mxu1  ;;  %v6155_v3 = vpop.f32.mrf.mxu0 }
 0x31c   : > { %v3046_v16 = vadd.f32 %v2951_v31, %v8656_v28  ;;  %v8816_v44 = vadd.f32 %v6155_v3, %v3045_v46  ;;  %v9475_v28 = vld [vmem:[#allocation87_spill] sm:$0xff] }
 0x31d   : > { %v6111_v24 = vpop.f32.mrf.mxu1  ;;  %v3331_v20 = vpop.f32.mrf.mxu0 }
 0x31e   : > { %v3049_v50 = vadd.f32 %v6111_v24, %v8704_v61  ;;  %v8819_v6 = vadd.f32 %v3331_v20, %v3044_v54  ;;  %v8821_v2 = vld [vmem:[#allocation2 + $0x10a] sm:$0xff]  ;;  %v3905_v37 = vld [vmem:[#allocation2 + $0x118] sm:$0xff] }
 0x31f   : > { %v3904_v14 = vld [vmem:[#allocation2 + $0x110] sm:$0xff]  ;;  %v2961_v38 = vpop.f32.mrf.mxu1  ;;  %v6158_v23 = vpop.f32.mrf.mxu0  ;;  %v3515_v34 = vmul.f32 %v8821_v2, %v9473_v59  ;;  %v3937_v41 = vmul.f32 %v3905_v37, %v9475_v28  ;;  %v9479_v24 = vld [vmem:[#allocation96_spill] sm:$0xff] }
 0x320   : > { %v3936_v39 = vmul.f32 %v3904_v14, %v9474_v36  ;;  %v3048_v46 = vadd.f32 %v2961_v38, %v8709_v53  ;;  %v8828_v12 = vadd.f32 %v6158_v23, %v3047_v8  ;;  %v9477_v53 = vld [vmem:[#allocation6_spill] sm:$0xff]  ;;  %v9478_v54 = vld [vmem:[#allocation95_spill] sm:$0xff]  ;;  %v9480_v20 = vld [vmem:[#allocation8_spill] sm:$0xff] }
 0x321   : > { %v6114_v61 = vpop.f32.mrf.mxu1  ;;  %v3341_v47 = vpop.f32.mrf.mxu0  ;;  %6228 = vmatmul.mubr.msk.f32.gmra.mxu1 %vm472_vm0, %v3515_v34  ;;  %v9483_v28 = vld [vmem:[#allocation99_spill] sm:$0xff] }
 0x322   : > { %6277 = vmatprep.mubr.msk.f32.mxu0 %vm472_vm0, %v3936_v39  ;;  %v3051_v60 = vadd.f32 %v6114_v61, %v8716_v5  ;;  %v8833_v4 = vadd.f32 %v3341_v47, %v3046_v16  ;;  %6282 = vmatprep.mubr.msk.f32.mxu1 %vm472_vm0, %v9476_v11 }
 0x323   : > { %6278 = vmatmul.mubr.msk.f32.gmra.mxu0 %vm472_vm0, %v3937_v41  ;;  %v2971_v56 = vpop.f32.mrf.mxu1  ;;  %v6161_v27 = vpop.f32.mrf.mxu0  ;;  %v9484_v41 = vld [vmem:[#allocation28_spill] sm:$0xff] }
 0x324   : > { %6332 = vmatprep.mubr.msk.f32.mxu0 %vm472_vm0, %v9477_v53  ;;  %v3050_v58 = vadd.f32 %v2971_v56, %v8718_v25  ;;  %v8841_v8 = vadd.f32 %v6161_v27, %v3049_v50  ;;  %v9481_v25 = vld [vmem:[#allocation10_spill] sm:$0xff] }
 0x325   : > { %v6117_v31 = vpop.f32.mrf.mxu1  ;;  %v3351_v3 = vpop.f32.mrf.mxu0  ;;  %6283 = vmatmul.mubr.msk.f32.vlgmr.msra.gmra.mxu1 %vm472_vm0, %v9478_v54 }
 0x326   : > { %v3053_v5 = vadd.f32 %v6117_v31, %v8722_v17  ;;  %v8846_v16 = vadd.f32 %v3351_v3, %v3048_v46  ;;  %6285 = vmatprep.mubr.msk.f32.mxu1 %vm472_vm0, %v9479_v24  ;;  %v9482_v17 = vld [vmem:[#allocation97_spill] sm:$0xff] }
 0x327   : > { %6333 = vmatmul.mubr.msk.f32.vlgmr.msra.gmra.mxu0 %vm472_vm0, %v9480_v20  ;;  %v2981_v14 = vpop.f32.mrf.mxu1  ;;  %v6164_v37 = vpop.f32.mrf.mxu0  ;;  %v9488_v31 = vld [vmem:[#allocation13_spill] sm:$0xff] }
 0x328   : > { %6335 = vmatprep.mubr.msk.f32.mxu0 %vm472_vm0, %v9481_v25  ;;  %v3052_v50 = vadd.f32 %v2981_v14, %v8724_v40  ;;  %v8855_v38 = vadd.f32 %v6164_v37, %v3051_v60  ;;  %v9485_v40 = vld [vmem:[#allocation31_spill] sm:$0xff] }
 0x329   : > { %v6120_v23 = vpop.f32.mrf.mxu1  ;;  %v3361_v34 = vpop.f32.mrf.mxu0  ;;  %6286 = vmatmul.mubr.msk.f32.gmra.mxu1 %vm472_vm0, %v9482_v17 }
 0x32a   : > { %v3055_v36 = vadd.f32 %v6120_v23, %v8728_v21  ;;  %v8860_v39 = vadd.f32 %v3361_v34, %v3050_v58  ;;  %6288 = vmatprep.mubr.msk.f32.mxu1 %vm472_vm0, %v9483_v28  ;;  %v9486_v21 = vld [vmem:[#allocation100_spill] sm:$0xff]  ;;  %v9487_v58 = vld [vmem:[#allocation101_spill] sm:$0xff] }
 0x32b   : > { %6336 = vmatmul.mubr.msk.f32.gmra.mxu0 %vm472_vm0, %v9484_v41  ;;  %v2991_v46 = vpop.f32.mrf.mxu1  ;;  %v6167_v61 = vpop.f32.mrf.mxu0  ;;  %v9492_v23 = vld [vmem:[#allocation17_spill] sm:$0xff] }
 0x32c   : > { %6338 = vmatprep.mubr.msk.f32.mxu0 %vm472_vm0, %v9485_v40  ;;  %v3054_v47 = vadd.f32 %v2991_v46, %v8730_v33  ;;  %v8869_v60 = vadd.f32 %v6167_v61, %v3053_v5  ;;  %v9489_v33 = vld [vmem:[#allocation33_spill] sm:$0xff]  ;;  %v4306_v61 = vld [vmem:[#allocation2 + $0x71] sm:$0xff] }
 0x32d   : > { %v6123_v11 = vpop.f32.mrf.mxu1  ;;  %v3371_v56 = vpop.f32.mrf.mxu0  ;;  %6289 = vmatmul.mubr.msk.f32.gmra.mxu1 %vm472_vm0, %v9486_v21 }
 0x32e   : > { %v3057_v27 = vadd.f32 %v6123_v11, %v8734_v22  ;;  %v8874_v53 = vadd.f32 %v3371_v56, %v3052_v50  ;;  %6291 = vmatprep.mubr.msk.f32.mxu1 %vm472_vm0, %v9487_v58  ;;  %v9490_v22 = vld [vmem:[#allocation103_spill] sm:$0xff]  ;;  %v9491_v50 = vld [vmem:[#allocation104_spill] sm:$0xff] }
 0x32f   : > { %6339 = vmatmul.mubr.msk.f32.gmra.mxu0 %vm472_vm0, %v9488_v31  ;;  %v3001_v3 = vpop.f32.mrf.mxu1  ;;  %v6170_v54 = vpop.f32.mrf.mxu0  ;;  %v9495_v11 = vld [vmem:[#allocation24_spill] sm:$0xff] }
 0x330   : > { %6341 = vmatprep.mubr.msk.f32.mxu0 %vm472_vm0, %v9489_v33  ;;  %v3056_v5 = vadd.f32 %v3001_v3, %v8736_v57  ;;  %v8883_v24 = vadd.f32 %v6170_v54, %v3055_v36  ;;  %v9493_v57 = vld [vmem:[#allocation21_spill] sm:$0xff] }
 0x331   : > { %v6126_v20 = vpop.f32.mrf.mxu1  ;;  %v3381_v14 = vpop.f32.mrf.mxu0  ;;  %6292 = vmatmul.mubr.msk.f32.gmra.mxu1 %vm472_vm0, %v9490_v22  ;;  %v4307_v31 = vld [vmem:[#allocation2 + $0x79] sm:$0xff] }
 0x332   : > { %v3059_v37 = vadd.f32 %v6126_v20, %v8740_v1  ;;  %v8888_v25 = vadd.f32 %v3381_v14, %v3054_v47  ;;  %6294 = vmatprep.mubr.msk.f32.mxu1 %vm472_vm0, %v9491_v50  ;;  %v9494_v1 = vld [vmem:[#allocation105_spill] sm:$0xff]  ;;  %v9498_v20 = vld [vmem:[#allocation30_spill] sm:$0xff] }
 0x333   : > { %6342 = vmatmul.mubr.msk.f32.gmra.mxu0 %vm472_vm0, %v9492_v23  ;;  %v3011_v34 = vpop.f32.mrf.mxu1  ;;  %v6173_v17 = vpop.f32.mrf.mxu0 }
 0x334   : > { %6344 = vmatprep.mubr.msk.f32.mxu0 %vm472_vm0, %v9493_v57  ;;  %v3058_v36 = vadd.f32 %v3011_v34, %v8742_v62  ;;  %v8897_v28 = vadd.f32 %v6173_v17, %v3057_v27  ;;  %v9496_v62 = vld [vmem:[#allocation27_spill] sm:$0xff]  ;;  %v9500_v34 = vld [vmem:[#allocation109_spill] sm:$0xff]  ;;  %v9501_v57 = vld [vmem:[#allocation110_spill] sm:$0xff] }
 0x335   : > { %v6129_v41 = vpop.f32.mrf.mxu1  ;;  %v3391_v46 = vpop.f32.mrf.mxu0  ;;  %6295 = vmatmul.mubr.msk.f32.gmra.mxu1 %vm472_vm0, %v9494_v1  ;;  %v9503_v1 = vld [vmem:[#allocation36_spill] sm:$0xff] }
 0x336   : > { %v3061_v40 = vadd.f32 %v6129_v41, %v8749_v10  ;;  %v8902_v47 = vadd.f32 %v3391_v46, %v3056_v5  ;;  %6297 = vmatprep.mubr.msk.f32.mxu1 %vm472_vm0, %v4306_v61  ;;  %v9497_v5 = vld [vmem:[#allocation107_spill] sm:$0xff] }
 0x337   : > { %6345 = vmatmul.mubr.msk.f32.gmra.mxu0 %vm472_vm0, %v9495_v11  ;;  %v3021_v56 = vpop.f32.mrf.mxu1  ;;  %v6176_v21 = vpop.f32.mrf.mxu0 }
 0x338   : > { %6347 = vmatprep.mubr.msk.f32.mxu0 %vm472_vm0, %v9496_v62  ;;  %v3060_v27 = vadd.f32 %v3021_v56, %v8752_v51  ;;  %v8910_v58 = vadd.f32 %v6176_v21, %v3059_v37  ;;  %v9499_v51 = vld [vmem:[#allocation38_spill] sm:$0xff]  ;;  %v9504_v21 = vld [vmem:[#allocation112_spill] sm:$0xff]  ;;  %v9505_v62 = vld [vmem:[#allocation113_spill] sm:$0xff] }
 0x339   : > { %v3401_v3 = vpop.f32.mrf.mxu0  ;;  %v6184_v54 = vpop.f32.mrf.mxu1  ;;  %6298 = vmatmul.mubr.msk.f32.gmra.mxu1 %vm472_vm0, %v4307_v31 }
 0x33a   : > { %v8913_v10 = vadd.f32 %v3401_v3, %v3058_v36  ;;  %v3843_v33 = vadd.f32 %v6184_v54, %v8757_v18  ;;  %6300 = vmatprep.mubr.msk.f32.mxu1 %vm472_vm0, %v9497_v5  ;;  %v9502_v36 = vld [vmem:[#allocation40_spill] sm:$0xff]  ;;  %v9507_v54 = vld [vmem:[#allocation49_spill] sm:$0xff] }
 0x33b   : > { %6348 = vmatmul.mubr.msk.f32.gmra.mxu0 %vm472_vm0, %v9498_v20  ;;  %v6179_v14 = vpop.f32.mrf.mxu0  ;;  %v8920_v22 = vpop.f32.mrf.mxu1  ;;  %v6548_v5 = vld [vmem:[#allocation2 + $0xb2] sm:$0xff]  ;;  %v9508_v20 = vld [vmem:[#allocation57_spill] sm:$0xff] }
 0x33c   : > { %6350 = vmatprep.mubr.msk.f32.mxu0 %vm472_vm0, %v9499_v51  ;;  %v8924_v37 = vadd.f32 %v6179_v14, %v3061_v40  ;;  %v4736_v14 = vmul.f32 %v6548_v5, %v9508_v20  ;;  %v6550_v5 = vld [vmem:[#allocation2 + $0xca] sm:$0xff]  ;;  %v9516_v20 = vld [vmem:[#allocation65_spill] sm:$0xff] }
 0x33d   : > { %v3411_v50 = vpop.f32.mrf.mxu0  ;;  %v6187_v23 = vpop.f32.mrf.mxu1  ;;  %6301 = vmatmul.mubr.msk.f32.gmra.mxu1 %vm472_vm0, %v9500_v34 }
 0x33e   : > { %v8928_v18 = vadd.f32 %v3411_v50, %v3060_v27  ;;  %v3845_v17 = vadd.f32 %v6187_v23, %v8765_v7  ;;  %6303 = vmatprep.mubr.msk.f32.mxu1 %vm472_vm0, %v9501_v57  ;;  %v9506_v27 = vld [vmem:[#allocation44_spill] sm:$0xff]  ;;  %v9509_v50 = vld [vmem:[#allocation115_spill] sm:$0xff] }
 0x33f   : > { %6351 = vmatmul.mubr.msk.f32.gmra.mxu0 %vm472_vm0, %v9502_v36  ;;  %v3693_v41 = vpop.f32.mrf.mxu1  ;;  %v6234_v46 = vpop.f32.mrf.mxu0  ;;  %v9510_v57 = vld [vmem:[#allocation116_spill] sm:$0xff] }
 0x340   : > { %6353 = vmatprep.mubr.msk.f32.mxu0 %vm472_vm0, %v9503_v1  ;;  %v3844_v61 = vadd.f32 %v3693_v41, %v8769_v9  ;;  %v8938_v40 = vadd.f32 %v6234_v46, %v3843_v33  ;;  %v9511_v36 = vld [vmem:[#allocation52_spill] sm:$0xff]  ;;  %v6549_v1 = vld [vmem:[#allocation2 + $0xc2] sm:$0xff] }
 0x341   : > { %v6190_v11 = vpop.f32.mrf.mxu1  ;;  %v8940_v56 = vpop.f32.mrf.mxu0  ;;  %6304 = vmatmul.mubr.msk.f32.gmra.mxu1 %vm472_vm0, %v9504_v21 }
 0x342   : > { %v3847_v7 = vadd.f32 %v6190_v11, %v8773_v26  ;;  %6306 = vmatprep.mubr.msk.f32.mxu1 %vm472_vm0, %v9505_v62  ;;  %v9512_v11 = vld [vmem:[#allocation47_spill] sm:$0xff]  ;;  %v9513_v62 = vld [vmem:[#allocation118_spill] sm:$0xff] }
 0x343   : > { %6354 = vmatmul.mubr.msk.f32.gmra.mxu0 %vm472_vm0, %v9506_v27  ;;  %v3703_v31 = vpop.f32.mrf.mxu1  ;;  %v6237_v3 = vpop.f32.mrf.mxu0  ;;  %v4738_v21 = vmul.f32 %v6549_v1, %v9512_v11  ;;  %v9518_v1 = vld [vmem:[#allocation122_spill] sm:$0xff]  ;;  %v6552_v11 = vld [vmem:[#allocation2 + $0xda] sm:$0xff] }
 0x344   : > { %6356 = vmatprep.mubr.msk.f32.mxu0 %vm472_vm0, %v9507_v54  ;;  %v3846_v9 = vadd.f32 %v3703_v31, %v8777_v32  ;;  %v8952_v33 = vadd.f32 %v6237_v3, %v3845_v17  ;;  %v9514_v3 = vld [vmem:[#allocation119_spill] sm:$0xff]  ;;  %v9515_v54 = vld [vmem:[#allocation61_spill] sm:$0xff] }
 0x345   : > { %v6193_v51 = vpop.f32.mrf.mxu1  ;;  %v4115_v26 = vpop.f32.mrf.mxu0  ;;  %6307 = vmatmul.mubr.msk.f32.gmra.mxu1 %vm472_vm0, %v9509_v50 }
 0x346   : > { %v3849_v23 = vadd.f32 %v6193_v51, %v8781_v15  ;;  %v8958_v34 = vadd.f32 %v4115_v26, %v3844_v61  ;;  %6309 = vmatprep.mubr.msk.f32.mxu1 %vm472_vm0, %v9510_v57 }
 0x347   : > { %6357 = vmatmul.mubr.msk.f32.gmra.mxu0 %vm472_vm0, %v9511_v36  ;;  %v3713_v32 = vpop.f32.mrf.mxu1  ;;  %v6240_v17 = vpop.f32.mrf.mxu0  ;;  %v9517_v36 = vld [vmem:[#allocation121_spill] sm:$0xff] }
 0x348   : > { %6359 = vmatprep.mubr.msk.f32.mxu0 %vm472_vm0, %v4736_v14  ;;  %v3848_v41 = vadd.f32 %v3713_v32, %v8786_v42  ;;  %v8966_v46 = vadd.f32 %v6240_v17, %v3847_v7  ;;  %v4739_v14 = vmul.f32 %v6550_v5, %v9516_v20 }
 0x349   : > { %v6196_v15 = vpop.f32.mrf.mxu1  ;;  %v4125_v61 = vpop.f32.mrf.mxu0  ;;  %6310 = vmatmul.mubr.msk.f32.gmra.mxu1 %vm472_vm0, %v9513_v62 }
 0x34a   : > { %v3851_v27 = vadd.f32 %v6196_v15, %v8791_v45  ;;  %v8972_v31 = vadd.f32 %v4125_v61, %v3846_v9  ;;  %6312 = vmatprep.mubr.msk.f32.mxu1 %vm472_vm0, %v9514_v3  ;;  %v6551_v45 = vld [vmem:[#allocation2 + $0xd2] sm:$0xff]  ;;  %v6553_v61 = vld [vmem:[#allocation2 + $0xe2] sm:$0xff] }
 0x34b   : > { %6360 = vmatmul.mubr.msk.f32.gmra.mxu0 %vm472_vm0, %v9515_v54  ;;  %v3723_v42 = vpop.f32.mrf.mxu1  ;;  %v6243_v7 = vpop.f32.mrf.mxu0  ;;  %v4740_v9 = vmul.f32 %v6551_v45, %v9434_v63  ;;  %v4741_v63 = vmul.f32 %v6552_v11, %v9439_v35  ;;  %v9519_v3 = vld [vmem:[#allocation124_spill] sm:$0xff] }
 0x34c   : > { %6362 = vmatprep.mubr.msk.f32.mxu0 %vm472_vm0, %v4738_v21  ;;  %v3850_v51 = vadd.f32 %v3723_v42, %v8796_v52  ;;  %v8981_v26 = vadd.f32 %v6243_v7, %v3849_v23  ;;  %v9520_v7 = vld [vmem:[#allocation125_spill] sm:$0xff] }
 0x34d   : > { %v6199_v50 = vpop.f32.mrf.mxu1  ;;  %v4135_v57 = vpop.f32.mrf.mxu0  ;;  %6313 = vmatmul.mubr.msk.f32.gmra.mxu1 %vm472_vm0, %v9517_v36  ;;  %v9522_v36 = vld [vmem:[#allocation127_spill] sm:$0xff] }
 0x34e   : > { %v3853_v32 = vadd.f32 %v6199_v50, %v8800_v19  ;;  %v8987_v17 = vadd.f32 %v4135_v57, %v3848_v41  ;;  %6315 = vmatprep.mubr.msk.f32.mxu1 %vm472_vm0, %v9518_v1  ;;  %v4742_v19 = vmul.f32 %v6553_v61, %v9442_v0 }
 0x34f   : > { %6363 = vmatmul.mubr.msk.f32.gmra.mxu0 %vm472_vm0, %v4739_v14  ;;  %v3733_v52 = vpop.f32.mrf.mxu1  ;;  %v6246_v23 = vpop.f32.mrf.mxu0  ;;  %v6555_v14 = vld [vmem:[#allocation2 + $0xf2] sm:$0xff] }
 0x350   : > { %6365 = vmatprep.mubr.msk.f32.mxu0 %vm472_vm0, %v4740_v9  ;;  %v3852_v21 = vadd.f32 %v3733_v52, %v8804_v49  ;;  %v8995_v15 = vadd.f32 %v6246_v23, %v3851_v27  ;;  %v6554_v27 = vld [vmem:[#allocation2 + $0xea] sm:$0xff] }
 0x351   : > { %v6202_v41 = vpop.f32.mrf.mxu1  ;;  %v4145_v62 = vpop.f32.mrf.mxu0  ;;  %6316 = vmatmul.mubr.msk.f32.gmra.mxu1 %vm472_vm0, %v9519_v3  ;;  %v4743_v0 = vmul.f32 %v6554_v27, %v9444_v43  ;;  %v9521_v9 = vld [vmem:[#allocation126_spill] sm:$0xff] }
 0x352   : > { %v3855_v54 = vadd.f32 %v6202_v41, %v8809_v29  ;;  %v9001_v42 = vadd.f32 %v4145_v62, %v3850_v51  ;;  %6318 = vmatprep.mubr.msk.f32.mxu1 %vm472_vm0, %v9520_v7  ;;  %v4744_v29 = vmul.f32 %v6555_v14, %v9447_v55  ;;  %v4714_v43 = vld [vmem:[#allocation2 + $0x102] sm:$0xff]  ;;  %v6556_v55 = vld [vmem:[#allocation2 + $0xfa] sm:$0xff]  ;;  %v9526_v7 = vld [vmem:[#allocation83_spill] sm:$0xff] }
 0x353   : > { %6366 = vmatmul.mubr.msk.f32.gmra.mxu0 %vm472_vm0, %v4741_v63  ;;  %v3743_v35 = vpop.f32.mrf.mxu1  ;;  %v6249_v49 = vpop.f32.mrf.mxu0  ;;  %v4745_v1 = vmul.f32 %v6556_v55, %v9449_v48  ;;  %v9523_v63 = vld [vmem:[#allocation128_spill] sm:$0xff]  ;;  %v9525_v62 = vld [vmem:[#allocation129_spill] sm:$0xff]  ;;  %v9527_v27 = vld [vmem:[#allocation130_spill] sm:$0xff] }
 0x354   : > { %6368 = vmatprep.mubr.msk.f32.mxu0 %vm472_vm0, %v4742_v19  ;;  %v3854_v5 = vadd.f32 %v3743_v35, %v8813_v13  ;;  %v9009_v20 = vadd.f32 %v6249_v49, %v3853_v32  ;;  %v4716_v48 = vld [vmem:[#allocation2 + $0x112] sm:$0xff]  ;;  %v4747_v35 = vmul.f32 %v8821_v2, %v9526_v7 }
 0x355   : > { %v6205_v51 = vpop.f32.mrf.mxu1  ;;  %v4155_v45 = vpop.f32.mrf.mxu0  ;;  %6319 = vmatmul.mubr.msk.f32.gmra.mxu1 %vm472_vm0, %v9521_v9 }
 0x356   : > { %v3857_v50 = vadd.f32 %v6205_v51, %v8816_v44  ;;  %v9015_v57 = vadd.f32 %v4155_v45, %v3852_v21  ;;  %6321 = vmatprep.mubr.msk.f32.mxu1 %vm472_vm0, %v9522_v36  ;;  %v9524_v21 = vld [vmem:[#allocation59_spill] sm:$0xff] }
 0x357   : > { %6369 = vmatmul.mubr.msk.f32.gmra.mxu0 %vm472_vm0, %v4743_v0  ;;  %v3753_v13 = vpop.f32.mrf.mxu1  ;;  %v6252_v32 = vpop.f32.mrf.mxu0  ;;  %v4746_v61 = vmul.f32 %v4714_v43, %v9524_v21  ;;  %v4326_v0 = vld [vmem:[#allocation2 + $0x111] sm:$0xff]  ;;  %v4327_v43 = vld [vmem:[#allocation2 + $0x119] sm:$0xff] }
 0x358   : > { %6371 = vmatprep.mubr.msk.f32.mxu0 %vm472_vm0, %v4744_v29  ;;  %v3856_v52 = vadd.f32 %v3753_v13, %v8819_v6  ;;  %v9023_v23 = vadd.f32 %v6252_v32, %v3855_v54  ;;  %v4717_v29 = vld [vmem:[#allocation2 + $0x11a] sm:$0xff] }
 0x359   : > { %v6208_v44 = vpop.f32.mrf.mxu1  ;;  %v4165_v11 = vpop.f32.mrf.mxu0  ;;  %6322 = vmatmul.mubr.msk.f32.gmra.mxu1 %vm472_vm0, %v9523_v63  ;;  %v4749_v13 = vmul.f32 %v4717_v29, %v9473_v59 }
 0x35a   : > { %v3859_v19 = vadd.f32 %v6208_v44, %v8828_v12  ;;  %v9029_v41 = vadd.f32 %v4165_v11, %v3854_v5  ;;  %6324 = vmatprep.mubr.msk.f32.mxu1 %vm472_vm0, %v9525_v62  ;;  %v9528_v5 = vld [vmem:[#allocation91_spill] sm:$0xff] }
 0x35b   : > { %6372 = vmatmul.mubr.msk.f32.gmra.mxu0 %vm472_vm0, %v4745_v1  ;;  %v9034_v6 = vpop.f32.mrf.mxu1  ;;  %v6255_v3 = vpop.f32.mrf.mxu0  ;;  %v4748_v14 = vmul.f32 %v4716_v48, %v9528_v5 }
 0x35c   : > { %6374 = vmatprep.mubr.msk.f32.mxu0 %vm472_vm0, %v4746_v61  ;;  %v9037_v54 = vadd.f32 %v6255_v3, %v3857_v50 }
 0x35d   : > { %v6211_v49 = vpop.f32.mrf.mxu1  ;;  %v4175_v12 = vpop.f32.mrf.mxu0  ;;  %6325 = vmatmul.mubr.msk.f32.gmra.mxu1 %vm472_vm0, %v9527_v27 }
 0x35e   : > { %v3861_v51 = vadd.f32 %v6211_v49, %v8841_v8  ;;  %v9045_v45 = vadd.f32 %v4175_v12, %v3856_v52  ;;  %6327 = vmatprep.mubr.msk.f32.mxu1 %vm472_vm0, %v4326_v0 }
 0x35f   : > { %6375 = vmatmul.mubr.msk.f32.gmra.mxu0 %vm472_vm0, %v4747_v35  ;;  %v3773_v9 = vpop.f32.mrf.mxu1  ;;  %v6258_v50 = vpop.f32.mrf.mxu0 }
 0x360   : > { %6377 = vmatprep.mubr.msk.f32.mxu0 %vm472_vm0, %v4748_v14  ;;  %v3860_v2 = vadd.f32 %v3773_v9, %v8846_v16  ;;  %v9051_v36 = vadd.f32 %v6258_v50, %v3859_v19 }
 0x361   : > { %v6214_v32 = vpop.f32.mrf.mxu1  ;;  %v9054_v55 = vpop.f32.mrf.mxu0  ;;  %6328 = vmatmul.mubr.msk.f32.gmra.mxu1 %vm472_vm0, %v4327_v43 }
 0x362   : > { %v3863_v8 = vadd.f32 %v6214_v32, %v8855_v38 }
 0x363   : > { %6378 = vmatmul.mubr.msk.f32.gmra.mxu0 %vm472_vm0, %v4749_v13  ;;  %v3783_v1 = vpop.f32.mrf.mxu1  ;;  %v6261_v52 = vpop.f32.mrf.mxu0 }
 0x364   : > { %v3862_v44 = vadd.f32 %v3783_v1, %v8860_v39  ;;  %v9060_v11 = vadd.f32 %v6261_v52, %v3861_v51 }
 0x365   : > { %v6217_v16 = vpop.f32.mrf.mxu1  ;;  %v4195_v63 = vpop.f32.mrf.mxu0 }
 0x366   : > { %v3865_v21 = vadd.f32 %v6217_v16, %v8869_v60  ;;  %v9063_v59 = vadd.f32 %v4195_v63, %v3860_v2 }
 0x367   : > { %v3793_v61 = vpop.f32.mrf.mxu1  ;;  %v6264_v19 = vpop.f32.mrf.mxu0 }
 0x368   : > { %v3864_v62 = vadd.f32 %v3793_v61, %v8874_v53  ;;  %v9066_v48 = vadd.f32 %v6264_v19, %v3863_v8 }
 0x369   : > { %v6220_v38 = vpop.f32.mrf.mxu1  ;;  %v4205_v3 = vpop.f32.mrf.mxu0 }
 0x36a   : > { %v3867_v7 = vadd.f32 %v6220_v38, %v8883_v24  ;;  %v9069_v35 = vadd.f32 %v4205_v3, %v3862_v44 }
 0x36b   : > { %v3803_v39 = vpop.f32.mrf.mxu1  ;;  %v6267_v49 = vpop.f32.mrf.mxu0 }
 0x36c   : > { %v3866_v12 = vadd.f32 %v3803_v39, %v8888_v25  ;;  %v9072_v27 = vadd.f32 %v6267_v49, %v3865_v21  ;;  %v3842_v21 = vadd.f32 %v8920_v22, %v8761_v30 }
 0x36d   : > { %v6223_v60 = vpop.f32.mrf.mxu1  ;;  %v4215_v0 = vpop.f32.mrf.mxu0 }
 0x36e   : > { %v3869_v5 = vadd.f32 %v6223_v60, %v8897_v28  ;;  %v9075_v14 = vadd.f32 %v4215_v0, %v3864_v62  ;;  %v4264_v3 = vadd.f32 %v8940_v56, %v3842_v21 }
 0x36f   : > { %v3813_v53 = vpop.f32.mrf.mxu1  ;;  %v6270_v29 = vpop.f32.mrf.mxu0 }
 0x370   : > { %v3868_v51 = vadd.f32 %v3813_v53, %v8902_v47  ;;  %v9078_v9 = vadd.f32 %v6270_v29, %v3867_v7 }
 0x371   : > { %v6226_v24 = vpop.f32.mrf.mxu1  ;;  %v4225_v50 = vpop.f32.mrf.mxu0 }
 0x372   : > { %v3871_v2 = vadd.f32 %v6226_v24, %v8910_v58  ;;  %v9081_v43 = vadd.f32 %v4225_v50, %v3866_v12 }
 0x373   : > { %v6273_v25 = vpop.f32.mrf.mxu0  ;;  %v9089_v52 = vpop.f32.mrf.mxu1 }
 0x374   : > { %v9083_v13 = vadd.f32 %v6273_v25, %v3869_v5 }
 0x375   : > { %v4235_v32 = vpop.f32.mrf.mxu0 }
 0x376   : > { %v9085_v8 = vadd.f32 %v4235_v32, %v3868_v51 }
 0x377   : > { %v6276_v28 = vpop.f32.mrf.mxu0 }
 0x378   : > { %v9087_v1 = vadd.f32 %v6276_v28, %v3871_v2 }
 0x379   : > { %v9091_v47 = vpop.f32.mrf.mxu0 }
 0x3e1   : > { %v6229_v44 = vpop.f32.mrf.mxu1 }
 0x3e2   : > { %v3873_v16 = vadd.f32 %v6229_v44, %v8924_v37 }
 0x3e3   : > { %v6279_v63 = vpop.f32.mrf.mxu0  ;;  %v3833_v58 = vpop.f32.mrf.mxu1 }
 0x3e4   : > { %v9096_v61 = vadd.f32 %v6279_v63, %v3873_v16  ;;  %v3872_v19 = vadd.f32 %v3833_v58, %v8928_v18 }
 0x3e5   : > { %v4255_v62 = vpop.f32.mrf.mxu0  ;;  %v6284_v38 = vpop.f32.mrf.mxu1 }
 0x3e6   : > { %v9100_v7 = vadd.f32 %v4255_v62, %v3872_v19  ;;  %v4655_v0 = vadd.f32 %v6284_v38, %v8938_v40 }
 0x3e7   : > { %v6334_v39 = vpop.f32.mrf.mxu0  ;;  %v4495_v49 = vpop.f32.mrf.mxu1 }
 0x3e8   : > { %v4654_v12 = vadd.f32 %v4495_v49, %v4264_v3  ;;  %v5077_v18 = vadd.f32 %v6334_v39, %v4655_v0 }
 0x3e9   : > { %v4917_v60 = vpop.f32.mrf.mxu0  ;;  %v6287_v37 = vpop.f32.mrf.mxu1 }
 0x3ea   : > { %v5076_v5 = vadd.f32 %v4917_v60, %v4654_v12  ;;  %v4657_v25 = vadd.f32 %v6287_v37, %v8952_v33 }
 0x3eb   : > { %v6337_v53 = vpop.f32.mrf.mxu0  ;;  %v4505_v30 = vpop.f32.mrf.mxu1 }
 0x3ec   : > { %5108 = vxpose.xlu1.b32.start [1/16] (narrow) %v5076_v5, 8  ;;  %v4656_v51 = vadd.f32 %v4505_v30, %v8958_v34  ;;  %v5079_v63 = vadd.f32 %v6337_v53, %v4657_v25 }
 0x3ed   : > { %v4927_v22 = vpop.f32.mrf.mxu0  ;;  %v6290_v29 = vpop.f32.mrf.mxu1 }
 0x3ee   : > { %v5078_v32 = vadd.f32 %v4927_v22, %v4656_v51  ;;  %v4659_v38 = vadd.f32 %v6290_v29, %v8966_v46  ;;  %v3858_v29 = vadd.f32 %v9034_v6, %v8833_v4 }
 0x3ef   : > { %v6340_v24 = vpop.f32.mrf.mxu0  ;;  %v4515_v56 = vpop.f32.mrf.mxu1 }
 0x3f0   : > { %5109 = vxpose.xlu1.b32.cont [2/16] (narrow) %v5077_v18, 8  ;;  %v4658_v58 = vadd.f32 %v4515_v56, %v8972_v31  ;;  %v5081_v60 = vadd.f32 %v6340_v24, %v4659_v38 }
 0x3f1   : > { %v4937_v50 = vpop.f32.mrf.mxu0  ;;  %v6293_v2 = vpop.f32.mrf.mxu1 }
 0x3f2   : > { %v5080_v3 = vadd.f32 %v4937_v50, %v4658_v58  ;;  %v4661_v30 = vadd.f32 %v6293_v2, %v8981_v26 }
 0x3f3   : > { %v6343_v28 = vpop.f32.mrf.mxu0  ;;  %v4525_v44 = vpop.f32.mrf.mxu1 }
 0x3f4   : > { %5110 = vxpose.xlu1.b32.cont [3/16] (narrow) %v5078_v32, 8  ;;  %v4660_v37 = vadd.f32 %v4525_v44, %v8987_v17  ;;  %v4280_v17 = vadd.f32 %v9054_v55, %v3858_v29  ;;  %v5083_v56 = vadd.f32 %v6343_v28, %v4661_v30 }
 0x3f5   : > { %v4947_v40 = vpop.f32.mrf.mxu0  ;;  %v6296_v16 = vpop.f32.mrf.mxu1 }
 0x3f6   : > { %v5082_v22 = vadd.f32 %v4947_v40, %v4660_v37  ;;  %v4663_v40 = vadd.f32 %v6296_v16, %v8995_v15 }
 0x3f7   : > { %v6346_v21 = vpop.f32.mrf.mxu0  ;;  %v4535_v19 = vpop.f32.mrf.mxu1 }
 0x3f8   : > { %5111 = vxpose.xlu1.b32.cont [4/16] (narrow) %v5079_v63, 8  ;;  %v4662_v50 = vadd.f32 %v4535_v19, %v9001_v42  ;;  %v5085_v55 = vadd.f32 %v6346_v21, %v4663_v40 }
 0x3f9   : > { %v4957_v34 = vpop.f32.mrf.mxu0  ;;  %v6299_v62 = vpop.f32.mrf.mxu1 }
 0x3fa   : > { %v5084_v63 = vadd.f32 %v4957_v34, %v4662_v50  ;;  %v4665_v15 = vadd.f32 %v6299_v62, %v9009_v20 }
 0x3fb   : > { %v6349_v39 = vpop.f32.mrf.mxu0  ;;  %v4545_v49 = vpop.f32.mrf.mxu1 }
 0x3fc   : > { %5112 = vxpose.xlu1.b32.cont [5/16] (narrow) %v5080_v3, 8  ;;  %v4664_v28 = vadd.f32 %v4545_v49, %v9015_v57  ;;  %v5087_v21 = vadd.f32 %v6349_v39, %v4665_v15 }
 0x3fd   : > { %v4967_v33 = vpop.f32.mrf.mxu0  ;;  %v6302_v12 = vpop.f32.mrf.mxu1 }
 0x3fe   : > { %v5086_v16 = vadd.f32 %v4967_v33, %v4664_v28  ;;  %v4667_v20 = vadd.f32 %v6302_v12, %v9023_v23 }
 0x3ff   : > { %v6352_v0 = vpop.f32.mrf.mxu0  ;;  %v4555_v5 = vpop.f32.mrf.mxu1 }
 0x400   : > { %5113 = vxpose.xlu1.b32.cont [6/16] (narrow) %v5081_v60, 8  ;;  %v4666_v57 = vadd.f32 %v4555_v5, %v9029_v41  ;;  %v5089_v39 = vadd.f32 %v6352_v0, %v4667_v20 }
 0x401   : > { %v4977_v31 = vpop.f32.mrf.mxu0  ;;  %v9108_v53 = vpop.f32.mrf.mxu1 }
 0x402   : > { %v5088_v62 = vadd.f32 %v4977_v31, %v4666_v57  ;;  %v4669_v23 = vadd.f32 %v9108_v53, %v9037_v54 }
 0x403   : > { %v9111_v18 = vpop.f32.mrf.mxu0  ;;  %v4565_v46 = vpop.f32.mrf.mxu1 }
 0x404   : > { %5114 = vxpose.xlu1.b32.cont [7/16] (narrow) %v5082_v22, 8  ;;  %v4668_v41 = vadd.f32 %v4565_v46, %v9045_v45  ;;  %v5091_v45 = vadd.f32 %v9111_v18, %v4669_v23  ;;  %v3870_v18 = vadd.f32 %v9089_v52, %v8913_v10 }
 0x405   : > { %v4987_v51 = vpop.f32.mrf.mxu0  ;;  %v6308_v24 = vpop.f32.mrf.mxu1 }
 0x406   : > { %v4671_v58 = vadd.f32 %v6308_v24, %v9051_v36  ;;  %v5090_v12 = vadd.f32 %v4987_v51, %v4668_v41 }
 0x407   : > { %v6358_v25 = vpop.f32.mrf.mxu0  ;;  %v4575_v32 = vpop.f32.mrf.mxu1 }
 0x408   : > { %v4670_v44 = vadd.f32 %v4575_v32, %v4280_v17  ;;  %5115 = vxpose.xlu1.b32.cont [8/16] (narrow) %v5083_v56, 8  ;;  %v5093_v42 = vadd.f32 %v6358_v25, %v4671_v58 }
 0x409   : > { %v4997_v26 = vpop.f32.mrf.mxu0  ;;  %v6311_v2 = vpop.f32.mrf.mxu1 }
 0x40a   : > { %v5092_v4 = vadd.f32 %v4997_v26, %v4670_v44  ;;  %v4673_v36 = vadd.f32 %v6311_v2, %v9060_v11 }
 0x40b   : > { %v6361_v6 = vpop.f32.mrf.mxu0  ;;  %v4585_v38 = vpop.f32.mrf.mxu1 }
 0x40c   : > { %5116 = vxpose.xlu1.b32.cont [9/16] (narrow) %v5084_v63, 8  ;;  %5140 = vxpose.xlu0.b32.start [1/16] (narrow) %v5092_v4, 8  ;;  %v4672_v19 = vadd.f32 %v4585_v38, %v9063_v59  ;;  %v5095_v49 = vadd.f32 %v6361_v6, %v4673_v36 }
 0x40d   : > { %v5007_v3 = vpop.f32.mrf.mxu0  ;;  %v6314_v60 = vpop.f32.mrf.mxu1 }
 0x40e   : > { %v5094_v34 = vadd.f32 %v5007_v3, %v4672_v19  ;;  %v4675_v11 = vadd.f32 %v6314_v60, %v9066_v48 }
 0x40f   : > { %v6364_v37 = vpop.f32.mrf.mxu0  ;;  %v4595_v30 = vpop.f32.mrf.mxu1 }
 0x410   : > { %5117 = vxpose.xlu1.b32.cont [10/16] (narrow) %v5085_v55, 8  ;;  %5141 = vxpose.xlu0.b32.cont [2/16] (narrow) %v5093_v42, 8  ;;  %v4674_v59 = vadd.f32 %v4595_v30, %v9069_v35  ;;  %v5097_v5 = vadd.f32 %v6364_v37, %v4675_v11 }
 0x411   : > { %v5017_v22 = vpop.f32.mrf.mxu0  ;;  %v6317_v29 = vpop.f32.mrf.mxu1 }
 0x412   : > { %v5096_v33 = vadd.f32 %v5017_v22, %v4674_v59  ;;  %v4677_v48 = vadd.f32 %v6317_v29, %v9072_v27 }
 0x413   : > { %v6367_v24 = vpop.f32.mrf.mxu0  ;;  %v4605_v17 = vpop.f32.mrf.mxu1 }
 0x414   : > { %5118 = vxpose.xlu1.b32.cont [11/16] (narrow) %v5086_v16, 8  ;;  %5142 = vxpose.xlu0.b32.cont [3/16] (narrow) %v5094_v34, 8  ;;  %v4676_v35 = vadd.f32 %v4605_v17, %v9075_v14  ;;  %v5099_v0 = vadd.f32 %v6367_v24, %v4677_v48 }
 0x415   : > { %v5027_v56 = vpop.f32.mrf.mxu0  ;;  %v6320_v50 = vpop.f32.mrf.mxu1 }
 0x416   : > { %v5098_v31 = vadd.f32 %v5027_v56, %v4676_v35  ;;  %v4679_v26 = vadd.f32 %v6320_v50, %v9078_v9  ;;  %v4292_v9 = vadd.f32 %v9091_v47, %v3870_v18 }
 0x417   : > { %v6370_v25 = vpop.f32.mrf.mxu0  ;;  %v4615_v32 = vpop.f32.mrf.mxu1 }
 0x418   : > { %5119 = vxpose.xlu1.b32.cont [12/16] (narrow) %v5087_v21, 8  ;;  %5143 = vxpose.xlu0.b32.cont [4/16] (narrow) %v5095_v49, 8  ;;  %v4678_v14 = vadd.f32 %v4615_v32, %v9081_v43  ;;  %v5101_v27 = vadd.f32 %v6370_v25, %v4679_v26 }
 0x419   : > { %v5037_v46 = vpop.f32.mrf.mxu0  ;;  %v6323_v44 = vpop.f32.mrf.mxu1 }
 0x41a   : > { %v5100_v54 = vadd.f32 %v5037_v46, %v4678_v14  ;;  %v4681_v43 = vadd.f32 %v6323_v44, %v9083_v13 }
 0x41b   : > { %v6373_v53 = vpop.f32.mrf.mxu0  ;;  %v4625_v51 = vpop.f32.mrf.mxu1 }
 0x41c   : > { %5120 = vxpose.xlu1.b32.cont [13/16] (narrow) %v5088_v62, 8  ;;  %5144 = vxpose.xlu0.b32.cont [5/16] (narrow) %v5096_v33, 8  ;;  %v4680_v2 = vadd.f32 %v4625_v51, %v9085_v8  ;;  %v5103_v38 = vadd.f32 %v6373_v53, %v4681_v43 }
 0x41d   : > { %v5047_v40 = vpop.f32.mrf.mxu0  ;;  %v6326_v63 = vpop.f32.mrf.mxu1 }
 0x41e   : > { %v5102_v58 = vadd.f32 %v5047_v40, %v4680_v2  ;;  %v4683_v8 = vadd.f32 %v6326_v63, %v9087_v1 }
 0x41f   : > { %v6376_v4 = vpop.f32.mrf.mxu0  ;;  %v4635_v6 = vpop.f32.mrf.mxu1 }
 0x420   : > { %5121 = vxpose.xlu1.b32.cont [14/16] (narrow) %v5089_v39, 8  ;;  %5145 = vxpose.xlu0.b32.cont [6/16] (narrow) %v5097_v5, 8  ;;  %v4682_v55 = vadd.f32 %v4635_v6, %v4292_v9  ;;  %v5105_v10 = vadd.f32 %v6376_v4, %v4683_v8 }
 0x421   : > { %v5057_v28 = vpop.f32.mrf.mxu0  ;;  %v6329_v42 = vpop.f32.mrf.mxu1 }
 0x422   : > { %v5104_v19 = vadd.f32 %v5057_v28, %v4682_v55  ;;  %v4685_v47 = vadd.f32 %v6329_v42, %v9096_v61 }
 0x423   : > { %v6379_v3 = vpop.f32.mrf.mxu0  ;;  %v4645_v60 = vpop.f32.mrf.mxu1 }
 0x424   : > { %5122 = vxpose.xlu1.b32.cont [15/16] (narrow) %v5090_v12, 8  ;;  %5146 = vxpose.xlu0.b32.cont [7/16] (narrow) %v5098_v31, 8  ;;  %v4684_v13 = vadd.f32 %v4645_v60, %v9100_v7  ;;  %v5107_v16 = vadd.f32 %v6379_v3, %v4685_v47 }
 0x425   : > { %v5067_v52 = vpop.f32.mrf.mxu0 }
 0x426   : > { %v5106_v15 = vadd.f32 %v5067_v52, %v4684_v13 }
 0x428   : > { %5123 = vxpose.xlu1.b32.end [16/16] (narrow) %v5091_v45, 8  ;;  %5147 = vxpose.xlu0.b32.cont [8/16] (narrow) %v5099_v0, 8 }
 0x42c   : > { %5148 = vxpose.xlu0.b32.cont [9/16] (narrow) %v5100_v54, 8 }
 0x430   : > { %5149 = vxpose.xlu0.b32.cont [10/16] (narrow) %v5101_v27, 8 }
 0x434   : > { %5150 = vxpose.xlu0.b32.cont [11/16] (narrow) %v5102_v58, 8 }
 0x438   : > { %5151 = vxpose.xlu0.b32.cont [12/16] (narrow) %v5103_v38, 8 }
 0x43c   : > { %5152 = vxpose.xlu0.b32.cont [13/16] (narrow) %v5104_v19, 8 }
 0x440   : > { %5153 = vxpose.xlu0.b32.cont [14/16] (narrow) %v5105_v10, 8 }
 0x444   : > { %5154 = vxpose.xlu0.b32.cont [15/16] (narrow) %v5106_v15, 8 }
 0x448   : > { %5155 = vxpose.xlu0.b32.end [16/16] (narrow) %v5107_v16, 8 }
 0x468   : > { %v5124_v1 = vpop.trf.xlu1 }
 0x469   : > { %5172 = vst [vmem:[%s388_s18] sm:$0xff] %v5124_v1 }
 0x488   : > { %v5156_v61 = vpop.trf.xlu0 }
 0x489   : > { %5173 = vst [vmem:[%s388_s18 + $0x8] sm:$0xff] %v5156_v61 }
 0x48a   : > { %6570 = shalt.err (!%p6567_p5)
}
 0x48b   : > { %s6571_s15 = scalar_lea.hbm %s5189_s22, 256  ;;  %s6575_s18 = scalar_lea.hbm %s9195_s7, 512 }
 0x48c   : > { %p6572_p6 = scmp.ne.s32.totalorder %s5189_s22, %s6571_s15  ;;  %p6576_p10 = scmp.lt.s32.totalorder %s5189_s22, %s9195_s7 }
 0x48d   : > { %p6577_p11 = scmp.lt.s32.totalorder %s6575_s18, %s6571_s15 }
 0x48e   : > { %p6573_p7 = pnand %p6572_p6, %p6719_p4 }
 0x48f   : > { %p6578_p12 = por %p6577_p11, %p6576_p10 }
 0x490   : > { %p6574_p9 = pneg %p6573_p7 }
 0x492   : > { %p6579_p13 = pnand %p6578_p12, %p6574_p9 }
 0x494   : > { %6582 = shalt.err (!%p6579_p13)
}
 0x495   : > { %6382 = dma.vmem_to_hbm [thread:$0]  (%p6719_p4), %s9145_s20, 256, %s5189_s22, %s5175_s30  }
 0x496 PF: > { %p6388_p0 = scmp.ge.s32.totalorder %s6633_s29, 2  ;;  %s5203_s23 = sand.u32 1, %s6613_s24  }
 0x497   : > { %s5204_s8 = scalar_lea.sflag [#allocation4], %s5203_s23 }
 0x498   : > { %p6385_p1 = pnand %p6388_p0, %p6726_p8 }
 0x49a   : > { %p6386_p2 = pneg %p6385_p1 }
 0x49c   : > { %6608 = dma.done.wait (%p6386_p2), %s5204_s8, 256  }
 0x49d   : > { %6610 = vsyncadd (%p6386_p2), %s5204_s8, 4294967040  ;;  %s20_s29 = sadd.s32 1, %s6633_s29   ;;  %s9529_s24 = smov %s6617_s25 }
 0x49e   : > { %p17_p3 = scmp.ge.s32.totalorder %s20_s29, 4   ;;  %s9530_s25 = smov %s6621_s26 }
 0x49f   : > { %s9531_s26 = smov %s6732_s14  ;;  %s9532_s27 = smov %s6629_s28 }
 0x4a0   : > { %s9533_s28 = smov %s9535_s9  ;;  %19 = sbr.rel (!%p17_p3) target bundleno = 4 (0x4), region = 97 }
 0x4a5   :  { %5209 = vsyncpa [#allocation4], 1 }
 0x4a6   :  { %5211 = vsyncpa [#allocation4 + $0x1], 1 }

</bundles_post_ra>
